<compile_context>
chip_gen: v6e
topology: v6e:2x2x1
jax: 0.10.0
libtpu: 0.0.40
codegen_flags: <defaults>
</compile_context>

<pallas_src>
import functools
import math

import numpy as np
import jax
import jax.numpy as jnp
from jax.experimental import pallas as pl
from jax.experimental.pallas import tpu as pltpu


# ----------------------------------------------------------------------------
# Sinusoid position table (same formula as get_sinusoid_encoding_table)
# ----------------------------------------------------------------------------
def get_sinusoid_encoding_table(n_position, d_hid, padding_idx=None):
    pos = np.arange(n_position, dtype=np.float64)[:, None]
    idx = np.arange(d_hid, dtype=np.float64)[None, :]
    angle = pos / np.power(10000.0, 2.0 * (idx // 2) / d_hid)
    table = np.zeros((n_position, d_hid), dtype=np.float32)
    table[:, 0::2] = np.sin(angle[:, 0::2])
    table[:, 1::2] = np.cos(angle[:, 1::2])
    if padding_idx is not None:
        table[padding_idx] = 0.0
    return jnp.asarray(table, dtype=jnp.float32)


# ----------------------------------------------------------------------------
# Shared math helpers (used by both the kernel and the reference)
# ----------------------------------------------------------------------------
def _layernorm(x, gamma, beta, eps=1e-5):
    mean = jnp.mean(x, axis=-1, keepdims=True)
    var = jnp.mean((x - mean) ** 2, axis=-1, keepdims=True)
    return (x - mean) * jax.lax.rsqrt(var + eps) * gamma + beta


def _mm(a, w):
    # bf16 MXU inputs (no-op if `a` is already bf16), f32 accumulation.
    return jnp.dot(a.astype(jnp.bfloat16), w, preferred_element_type=jnp.float32)


# ----------------------------------------------------------------------------
# Fused Pallas kernel: embed + n_layers encoder layers, one grid step per
# batch block (whole batch on 1-TC chips, one element per core on v7x).
# ----------------------------------------------------------------------------
def music_encoder_kernel(x_ref, pos_ref, emb_w_ref, emb_b_ref,
                         wqkv_ref, bqkv_ref, wo_ref, bo_ref,
                         g1_ref, be1_ref, w1_ref, b1_ref,
                         w2_ref, b2_ref, g2_ref, be2_ref,
                         out_ref, *, n_layers, n_head, d_k, d_v):
    Bb, L, Din = x_ref.shape
    D = out_ref.shape[2]
    Hk = n_head * d_k
    Hv = n_head * d_v

    def to_heads(t, dh):
        # (Bb*L, n_head*dh) f32 -> (Bb*n_head, L, dh): one relayout per tensor
        # instead of 3*n_head unaligned 32-lane slices per layer.
        t4 = t.reshape(Bb, L, n_head, dh)
        t4 = pltpu.einshape("blhd->bhld", t4)
        return t4.reshape(Bb * n_head, L, dh)

    # ---- embedding: Linear(src_seq) + positional encoding, whole-slab matmul
    xb = x_ref[...].reshape(Bb * L, Din).astype(jnp.bfloat16)      # cast once
    h = _mm(xb, emb_w_ref[...]) + emb_b_ref[...]                   # (Bb*L, D)
    h = (h.reshape(Bb, L, D) + pos_ref[...]).reshape(Bb * L, D)    # f32

    # ---- encoder layers (static loop; activation stays in VMEM/vregs) ------
    for layer in range(n_layers):
        hb = h.astype(jnp.bfloat16)                                # cast once

        # fused QKV projection; 1/sqrt(d_k) already folded into Wq/bq at init
        qkv = _mm(hb, wqkv_ref[layer]) + bqkv_ref[layer]           # (Bb*L, 3*Hk)

        # lane-aligned slices, one head-major relayout + one bf16 cast each
        q = to_heads(qkv[:, :Hk], d_k).astype(jnp.bfloat16)
        k = to_heads(qkv[:, Hk:2 * Hk], d_k).astype(jnp.bfloat16)
        v = to_heads(qkv[:, 2 * Hk:], d_v).astype(jnp.bfloat16)

        # batched (over Bb*n_head) attention: 1 score dot, 1 softmax, 1 ctx dot
        s = jnp.einsum("bqd,bkd->bqk", q, k,
                       preferred_element_type=jnp.float32)         # (Bb*H,L,L)
        s = s - jnp.max(s, axis=-1, keepdims=True)
        p = jnp.exp(s)
        p = p * pl.reciprocal(jnp.sum(p, axis=-1, keepdims=True), approx=True)
        ctx = jnp.einsum("bqk,bkd->bqd", p.astype(jnp.bfloat16), v,
                         preferred_element_type=jnp.float32)       # (Bb*H,L,dv)

        # back to (Bb*L, n_head*d_v) and ONE output projection (K = Hv = 128)
        ctx = pltpu.einshape("bhld->blhd", ctx.reshape(Bb, n_head, L, d_v))
        ctx = ctx.reshape(Bb * L, Hv).astype(jnp.bfloat16)         # cast once
        attn = _mm(ctx, wo_ref[layer]) + bo_ref[layer]             # (Bb*L, D)

        # post-LN residual 1
        y = _layernorm(attn + h, g1_ref[layer], be1_ref[layer])

        # position-wise FFN (Conv1d k=1 == Linear)
        f1 = jnp.maximum(_mm(y.astype(jnp.bfloat16), w1_ref[layer])
                         + b1_ref[layer], 0.0)
        f2 = _mm(f1.astype(jnp.bfloat16), w2_ref[layer]) + b2_ref[layer]

        # post-LN residual 2
        h = _layernorm(f2 + y, g2_ref[layer], be2_ref[layer])

    out_ref[...] = h.reshape(Bb, L, D)


# ----------------------------------------------------------------------------
# Wrapper: one pallas_call for the whole encoder
# ----------------------------------------------------------------------------
def music_encoder_forward(src_seq, params, cfg, batch_block=None):
    B, L, Din = src_seq.shape
    D = cfg["d_model"]
    pos_enc = params["pos_table"][:L]   # positions 0..L-1 (matches PyTorch fwd)

    if batch_block is None:
        # 2-TC chips (v7x): keep a B-parallel grid so each core takes one batch
        # element. 1-TC chips (v5e/v6e): fold the whole batch into ONE grid
        # step -> (B*L, .) slabs for every matmul, per-step overhead paid once.
        kind = jax.devices()[0].device_kind.lower()
        two_tc = ("v7" in kind) or ("7x" in kind)
        batch_block = 1 if (two_tc and B > 1) else B
    assert B % batch_block == 0

    weight_names = ["emb_w", "emb_b", "wqkv", "bqkv", "wo", "bo",
                    "ln1_g", "ln1_b", "w1", "b1", "w2", "b2",
                    "ln2_g", "ln2_b"]
    ws = [params[n] for n in weight_names]

    def full_spec(a):
        nd = a.ndim
        # Constant-index full block -> VMEM-resident across the grid.
        # (Default double-buffering of these never-refetched weights is
        #  negligible at this size; switch to a per-layer grid axis before it
        #  matters on v7x's 64 MiB VMEM.)
        return pl.BlockSpec(a.shape, lambda b, _nd=nd: (0,) * _nd)

    kernel = functools.partial(music_encoder_kernel,
                               n_layers=cfg["n_layers"], n_head=cfg["n_head"],
                               d_k=cfg["d_k"], d_v=cfg["d_v"])

    return pl.pallas_call(
        kernel,
        out_shape=jax.ShapeDtypeStruct((B, L, D), jnp.float32),
        grid=(B // batch_block,),
        in_specs=[pl.BlockSpec((batch_block, L, Din), lambda b: (b, 0, 0)),
                  full_spec(pos_enc)] + [full_spec(w) for w in ws],
        out_specs=pl.BlockSpec((batch_block, L, D), lambda b: (b, 0, 0)),
        compiler_params=pltpu.CompilerParams(
            dimension_semantics=("parallel",)),
    )(src_seq, pos_enc, *ws)


# ----------------------------------------------------------------------------
# Deterministic parameter init (nn.Linear-style uniform init); MXU weights bf16
# ----------------------------------------------------------------------------
def _dense(key, fan_in, fan_out):
    k1, k2 = jax.random.split(key)
    bound = 1.0 / math.sqrt(fan_in)
    w = jax.random.uniform(k1, (fan_in, fan_out), jnp.float32, -bound, bound)
    b = jax.random.uniform(k2, (1, fan_out), jnp.float32, -bound, bound)
    return w, b


def init_params(key, cfg):
    d_model, n_head = cfg["d_model"], cfg["n_head"]
    d_k, d_v, d_inner = cfg["d_k"], cfg["d_v"], cfg["d_inner"]
    n_layers = cfg["n_layers"]
    key, ek = jax.random.split(key)
    emb_w, emb_b = _dense(ek, cfg["input_size"], cfg["d_word_vec"])

    # 1/sqrt(d_k) folded into Wq / bq (mathematically identical to scaling the
    # attention scores, as the PyTorch module does).
    q_scale = 1.0 / math.sqrt(d_k)

    wqkv, bqkv, wo, bo = [], [], [], []
    w1, b1, w2, b2 = [], [], [], []
    g1, be1, g2, be2 = [], [], [], []
    for _ in range(n_layers):
        key, kq, kk, kv, ko, ka, kb = jax.random.split(key, 7)
        wq_, bq_ = _dense(kq, d_model, n_head * d_k)
        wk_, bk_ = _dense(kk, d_model, n_head * d_k)
        wv_, bv_ = _dense(kv, d_model, n_head * d_v)
        wo_, bo_ = _dense(ko, n_head * d_v, d_model)
        w1_, b1_ = _dense(ka, d_model, d_inner)
        w2_, b2_ = _dense(kb, d_inner, d_model)
        wqkv.append(jnp.concatenate([wq_ * q_scale, wk_, wv_], axis=1))
        bqkv.append(jnp.concatenate([bq_ * q_scale, bk_, bv_], axis=1))
        wo.append(wo_); bo.append(bo_)
        w1.append(w1_); b1.append(b1_)
        w2.append(w2_); b2.append(b2_)
        g1.append(jnp.ones((1, d_model), jnp.float32))
        be1.append(jnp.zeros((1, d_model), jnp.float32))
        g2.append(jnp.ones((1, d_model), jnp.float32))
        be2.append(jnp.zeros((1, d_model), jnp.float32))

    bf = jnp.bfloat16
    return dict(
        emb_w=emb_w.astype(bf), emb_b=emb_b,
        pos_table=get_sinusoid_encoding_table(cfg["max_seq_len"] + 1,
                                              cfg["d_word_vec"], padding_idx=0),
        wqkv=jnp.stack(wqkv).astype(bf), bqkv=jnp.stack(bqkv),
        wo=jnp.stack(wo).astype(bf), bo=jnp.stack(bo),
        ln1_g=jnp.stack(g1), ln1_b=jnp.stack(be1),
        w1=jnp.stack(w1).astype(bf), b1=jnp.stack(b1),
        w2=jnp.stack(w2).astype(bf), b2=jnp.stack(b2),
        ln2_g=jnp.stack(g2), ln2_b=jnp.stack(be2),
    )


# ----------------------------------------------------------------------------
# Pure-JAX reference (same math, same bf16 matmul inputs) for verification
# ----------------------------------------------------------------------------
def ref_forward(src_seq, params, cfg):
    n_head, d_k, d_v = cfg["n_head"], cfg["d_k"], cfg["d_v"]
    B, L, _ = src_seq.shape
    Hk = n_head * d_k
    x = _mm(src_seq, params["emb_w"]) + params["emb_b"] + params["pos_table"][:L]
    for l in range(cfg["n_layers"]):
        qkv = _mm(x, params["wqkv"][l]) + params["bqkv"][l]
        q = qkv[..., :Hk].reshape(B, L, n_head, d_k)
        k = qkv[..., Hk:2 * Hk].reshape(B, L, n_head, d_k)
        v = qkv[..., 2 * Hk:].reshape(B, L, n_head, d_v)
        # NOTE: 1/sqrt(d_k) already folded into Wq/bq at init (equivalent to
        # the PyTorch module's score scaling).
        s = jnp.einsum("blhd,bmhd->bhlm", q.astype(jnp.bfloat16),
                       k.astype(jnp.bfloat16),
                       preferred_element_type=jnp.float32)
        p = jax.nn.softmax(s, axis=-1)
        ctx = jnp.einsum("bhlm,bmhd->blhd", p.astype(jnp.bfloat16),
                         v.astype(jnp.bfloat16),
                         preferred_element_type=jnp.float32)
        ctx = ctx.reshape(B, L, n_head * d_v)
        y = _layernorm(_mm(ctx, params["wo"][l]) + params["bo"][l] + x,
                       params["ln1_g"][l], params["ln1_b"][l])
        f1 = jax.nn.relu(_mm(y, params["w1"][l]) + params["b1"][l])
        x = _layernorm(_mm(f1, params["w2"][l]) + params["b2"][l] + y,
                       params["ln2_g"][l], params["ln2_b"][l])
    return x


# ----------------------------------------------------------------------------
# Main
# ----------------------------------------------------------------------------
if __name__ == "__main__":
    cfg = dict(
        max_seq_len=16,
        input_size=16,
        d_word_vec=128,
        d_model=128,
        n_layers=3,
        n_head=4,
        d_k=32,
        d_v=32,
        d_inner=256,
    )
    B, L = 2, 8

    key = jax.random.PRNGKey(0)
    pkey, xkey = jax.random.split(key)
    params = init_params(pkey, cfg)
    src_seq = jax.random.normal(xkey, (B, L, cfg["input_size"]), jnp.float32)

    out = jax.block_until_ready(music_encoder_forward(src_seq, params, cfg))
    ref = jax.block_until_ready(ref_forward(src_seq, params, cfg))

    assert out.shape == (B, L, cfg["d_model"])
    np.testing.assert_allclose(np.asarray(out), np.asarray(ref),
                               rtol=2e-2, atol=2e-2)
    print("KERNEL_OK")
</pallas_src>

<mosaic_0001>
module attributes {stable_mosaic.version = 11 : i64} {
  func.func @music_encoder_kernel(%arg0: i32, %arg1: memref<2x8x16xf32, #tpu.memory_space<vmem>>, %arg2: memref<8x128xf32, #tpu.memory_space<vmem>>, %arg3: memref<16x128xbf16, #tpu.memory_space<vmem>>, %arg4: memref<1x128xf32, #tpu.memory_space<vmem>>, %arg5: memref<3x128x384xbf16, #tpu.memory_space<vmem>>, %arg6: memref<3x1x384xf32, #tpu.memory_space<vmem>>, %arg7: memref<3x128x128xbf16, #tpu.memory_space<vmem>>, %arg8: memref<3x1x128xf32, #tpu.memory_space<vmem>>, %arg9: memref<3x1x128xf32, #tpu.memory_space<vmem>>, %arg10: memref<3x1x128xf32, #tpu.memory_space<vmem>>, %arg11: memref<3x128x256xbf16, #tpu.memory_space<vmem>>, %arg12: memref<3x1x256xf32, #tpu.memory_space<vmem>>, %arg13: memref<3x256x128xbf16, #tpu.memory_space<vmem>>, %arg14: memref<3x1x128xf32, #tpu.memory_space<vmem>>, %arg15: memref<3x1x128xf32, #tpu.memory_space<vmem>>, %arg16: memref<3x1x128xf32, #tpu.memory_space<vmem>>, %arg17: memref<2x8x128xf32, #tpu.memory_space<vmem>>) attributes {dimension_semantics = [#tpu.dimension_semantics<parallel>], iteration_bounds = array<i64: 1>, scalar_prefetch = 0 : i64, scratch_operands = 0 : i64, tpu.core_type = #tpu.core_type<tc>, window_params = [{transform_indices = @transform_0, window_bounds = array<i64: 2, 8, 16>}, {pipeline_mode = #tpu.pipeline_mode<synchronous>, transform_indices = @transform_1, window_bounds = array<i64: 8, 128>}, {pipeline_mode = #tpu.pipeline_mode<synchronous>, transform_indices = @transform_2, window_bounds = array<i64: 16, 128>}, {pipeline_mode = #tpu.pipeline_mode<synchronous>, transform_indices = @transform_3, window_bounds = array<i64: 1, 128>}, {pipeline_mode = #tpu.pipeline_mode<synchronous>, transform_indices = @transform_4, window_bounds = array<i64: 3, 128, 384>}, {pipeline_mode = #tpu.pipeline_mode<synchronous>, transform_indices = @transform_5, window_bounds = array<i64: 3, 1, 384>}, {pipeline_mode = #tpu.pipeline_mode<synchronous>, transform_indices = @transform_6, window_bounds = array<i64: 3, 128, 128>}, {pipeline_mode = #tpu.pipeline_mode<synchronous>, transform_indices = @transform_7, window_bounds = array<i64: 3, 1, 128>}, {pipeline_mode = #tpu.pipeline_mode<synchronous>, transform_indices = @transform_8, window_bounds = array<i64: 3, 1, 128>}, {pipeline_mode = #tpu.pipeline_mode<synchronous>, transform_indices = @transform_9, window_bounds = array<i64: 3, 1, 128>}, {pipeline_mode = #tpu.pipeline_mode<synchronous>, transform_indices = @transform_10, window_bounds = array<i64: 3, 128, 256>}, {pipeline_mode = #tpu.pipeline_mode<synchronous>, transform_indices = @transform_11, window_bounds = array<i64: 3, 1, 256>}, {pipeline_mode = #tpu.pipeline_mode<synchronous>, transform_indices = @transform_12, window_bounds = array<i64: 3, 256, 128>}, {pipeline_mode = #tpu.pipeline_mode<synchronous>, transform_indices = @transform_13, window_bounds = array<i64: 3, 1, 128>}, {pipeline_mode = #tpu.pipeline_mode<synchronous>, transform_indices = @transform_14, window_bounds = array<i64: 3, 1, 128>}, {pipeline_mode = #tpu.pipeline_mode<synchronous>, transform_indices = @transform_15, window_bounds = array<i64: 3, 1, 128>}, {transform_indices = @transform_16, window_bounds = array<i64: 2, 8, 128>}]} {
    %c0 = arith.constant 0 : index
    %c0_0 = arith.constant 0 : index
    %c0_1 = arith.constant 0 : index
    %0 = vector.load %arg1[%c0, %c0_0, %c0_1] : memref<2x8x16xf32, #tpu.memory_space<vmem>>, vector<2x8x16xf32>
    %1 = vector.shape_cast %0 : vector<2x8x16xf32> to vector<16x16xf32>
    %2 = arith.truncf %1 : vector<16x16xf32> to vector<16x16xbf16>
    %c0_2 = arith.constant 0 : index
    %c0_3 = arith.constant 0 : index
    %3 = vector.load %arg3[%c0_2, %c0_3] : memref<16x128xbf16, #tpu.memory_space<vmem>>, vector<16x128xbf16>
    %cst = arith.constant dense<0.000000e+00> : vector<16x128xf32>
    %4 = tpu.matmul %2, %3, %cst {dimension_numbers = #tpu.dot_dimension_numbers<[1], [0], [0], [1], [0, 0, 1, 1], [], []>} : vector<16x16xbf16>, vector<16x128xbf16>, vector<16x128xf32> -> vector<16x128xf32>
    %c0_4 = arith.constant 0 : index
    %c0_5 = arith.constant 0 : index
    %5 = vector.load %arg4[%c0_4, %c0_5] : memref<1x128xf32, #tpu.memory_space<vmem>>, vector<1x128xf32>
    %6 = vector.broadcast %5 : vector<1x128xf32> to vector<16x128xf32>
    %7 = arith.addf %4, %6 : vector<16x128xf32>
    %8 = vector.shape_cast %7 : vector<16x128xf32> to vector<2x8x128xf32>
    %c0_6 = arith.constant 0 : index
    %c0_7 = arith.constant 0 : index
    %9 = vector.load %arg2[%c0_6, %c0_7] : memref<8x128xf32, #tpu.memory_space<vmem>>, vector<8x128xf32>
    %10 = vector.shape_cast %9 : vector<8x128xf32> to vector<1x8x128xf32>
    %11 = vector.broadcast %10 : vector<1x8x128xf32> to vector<2x8x128xf32>
    %12 = arith.addf %8, %11 : vector<2x8x128xf32>
    %13 = vector.shape_cast %12 : vector<2x8x128xf32> to vector<16x128xf32>
    %14 = arith.truncf %13 : vector<16x128xf32> to vector<16x128xbf16>
    %c0_8 = arith.constant 0 : index
    %c0_9 = arith.constant 0 : index
    %c0_10 = arith.constant 0 : index
    %15 = vector.load %arg5[%c0_8, %c0_9, %c0_10] : memref<3x128x384xbf16, #tpu.memory_space<vmem>>, vector<1x128x384xbf16>
    %16 = vector.shape_cast %15 : vector<1x128x384xbf16> to vector<128x384xbf16>
    %cst_11 = arith.constant dense<0.000000e+00> : vector<16x384xf32>
    %17 = tpu.matmul %14, %16, %cst_11 {dimension_numbers = #tpu.dot_dimension_numbers<[1], [0], [0], [1], [0, 0, 1, 1], [], []>} : vector<16x128xbf16>, vector<128x384xbf16>, vector<16x384xf32> -> vector<16x384xf32>
    %c0_12 = arith.constant 0 : index
    %c0_13 = arith.constant 0 : index
    %c0_14 = arith.constant 0 : index
    %18 = vector.load %arg6[%c0_12, %c0_13, %c0_14] : memref<3x1x384xf32, #tpu.memory_space<vmem>>, vector<1x1x384xf32>
    %19 = vector.shape_cast %18 : vector<1x1x384xf32> to vector<1x384xf32>
    %20 = vector.broadcast %19 : vector<1x384xf32> to vector<16x384xf32>
    %21 = arith.addf %17, %20 : vector<16x384xf32>
    %22 = vector.extract_strided_slice %21 {offsets = [0, 0], sizes = [16, 128], strides = [1, 1]} : vector<16x384xf32> to vector<16x128xf32>
    %23 = vector.shape_cast %22 : vector<16x128xf32> to vector<2x8x4x32xf32>
    %24 = tpu.transpose %23, [0, 2, 1, 3] : vector<2x8x4x32xf32> -> vector<2x4x8x32xf32>
    %25 = vector.shape_cast %24 : vector<2x4x8x32xf32> to vector<8x8x32xf32>
    %26 = arith.truncf %25 : vector<8x8x32xf32> to vector<8x8x32xbf16>
    %27 = vector.extract_strided_slice %21 {offsets = [0, 128], sizes = [16, 128], strides = [1, 1]} : vector<16x384xf32> to vector<16x128xf32>
    %28 = vector.shape_cast %27 : vector<16x128xf32> to vector<2x8x4x32xf32>
    %29 = tpu.transpose %28, [0, 2, 1, 3] : vector<2x8x4x32xf32> -> vector<2x4x8x32xf32>
    %30 = vector.shape_cast %29 : vector<2x4x8x32xf32> to vector<8x8x32xf32>
    %31 = arith.truncf %30 : vector<8x8x32xf32> to vector<8x8x32xbf16>
    %32 = vector.extract_strided_slice %21 {offsets = [0, 256], sizes = [16, 128], strides = [1, 1]} : vector<16x384xf32> to vector<16x128xf32>
    %33 = vector.shape_cast %32 : vector<16x128xf32> to vector<2x8x4x32xf32>
    %34 = tpu.transpose %33, [0, 2, 1, 3] : vector<2x8x4x32xf32> -> vector<2x4x8x32xf32>
    %35 = vector.shape_cast %34 : vector<2x4x8x32xf32> to vector<8x8x32xf32>
    %36 = arith.truncf %35 : vector<8x8x32xf32> to vector<8x8x32xbf16>
    "tpu.trace_start"() <{level = 10 : i32, message = "bqd,bkd->bqk"}> : () -> ()
    %cst_15 = arith.constant dense<0.000000e+00> : vector<8x8x8xf32>
    %37 = tpu.matmul %26, %31, %cst_15 {dimension_numbers = #tpu.dot_dimension_numbers<[2], [2], [1], [1], [0, 0, 0, 1, 1, 1], [0], [0]>} : vector<8x8x32xbf16>, vector<8x8x32xbf16>, vector<8x8x8xf32> -> vector<8x8x8xf32>
    "tpu.trace_stop"() : () -> ()
    %cst_16 = arith.constant dense<0xFF800000> : vector<8x8xf32>
    %38 = vector.multi_reduction <maximumf>, %37, %cst_16 [2] : vector<8x8x8xf32> to vector<8x8xf32>
    %39 = vector.shape_cast %38 : vector<8x8xf32> to vector<8x8x1xf32>
    %40 = vector.broadcast %39 : vector<8x8x1xf32> to vector<8x8x8xf32>
    %41 = arith.subf %37, %40 : vector<8x8x8xf32>
    %42 = math.exp %41 : vector<8x8x8xf32>
    %cst_17 = arith.constant dense<0.000000e+00> : vector<8x8xf32>
    %43 = vector.multi_reduction <add>, %42, %cst_17 [2] : vector<8x8x8xf32> to vector<8x8xf32>
    %44 = vector.shape_cast %43 : vector<8x8xf32> to vector<8x8x1xf32>
    %45 = tpu.reciprocal %44 {approx = true} : vector<8x8x1xf32> -> vector<8x8x1xf32>
    %46 = vector.broadcast %45 : vector<8x8x1xf32> to vector<8x8x8xf32>
    %47 = arith.mulf %42, %46 : vector<8x8x8xf32>
    %48 = arith.truncf %47 : vector<8x8x8xf32> to vector<8x8x8xbf16>
    "tpu.trace_start"() <{level = 10 : i32, message = "bqk,bkd->bqd"}> : () -> ()
    %cst_18 = arith.constant dense<0.000000e+00> : vector<8x8x32xf32>
    %49 = tpu.matmul %48, %36, %cst_18 {dimension_numbers = #tpu.dot_dimension_numbers<[2], [1], [1], [2], [0, 0, 0, 1, 1, 2], [0], [0]>} : vector<8x8x8xbf16>, vector<8x8x32xbf16>, vector<8x8x32xf32> -> vector<8x8x32xf32>
    "tpu.trace_stop"() : () -> ()
    %50 = vector.shape_cast %49 : vector<8x8x32xf32> to vector<2x4x8x32xf32>
    %51 = tpu.transpose %50, [0, 2, 1, 3] : vector<2x4x8x32xf32> -> vector<2x8x4x32xf32>
    %52 = vector.shape_cast %51 : vector<2x8x4x32xf32> to vector<16x128xf32>
    %53 = arith.truncf %52 : vector<16x128xf32> to vector<16x128xbf16>
    %c0_19 = arith.constant 0 : index
    %c0_20 = arith.constant 0 : index
    %c0_21 = arith.constant 0 : index
    %54 = vector.load %arg7[%c0_19, %c0_20, %c0_21] : memref<3x128x128xbf16, #tpu.memory_space<vmem>>, vector<1x128x128xbf16>
    %55 = vector.shape_cast %54 : vector<1x128x128xbf16> to vector<128x128xbf16>
    %cst_22 = arith.constant dense<0.000000e+00> : vector<16x128xf32>
    %56 = tpu.matmul %53, %55, %cst_22 {dimension_numbers = #tpu.dot_dimension_numbers<[1], [0], [0], [1], [0, 0, 1, 1], [], []>} : vector<16x128xbf16>, vector<128x128xbf16>, vector<16x128xf32> -> vector<16x128xf32>
    %c0_23 = arith.constant 0 : index
    %c0_24 = arith.constant 0 : index
    %c0_25 = arith.constant 0 : index
    %57 = vector.load %arg8[%c0_23, %c0_24, %c0_25] : memref<3x1x128xf32, #tpu.memory_space<vmem>>, vector<1x1x128xf32>
    %58 = vector.shape_cast %57 : vector<1x1x128xf32> to vector<1x128xf32>
    %59 = vector.broadcast %58 : vector<1x128xf32> to vector<16x128xf32>
    %60 = arith.addf %56, %59 : vector<16x128xf32>
    %61 = arith.addf %60, %13 : vector<16x128xf32>
    %c0_26 = arith.constant 0 : index
    %c0_27 = arith.constant 0 : index
    %c0_28 = arith.constant 0 : index
    %62 = vector.load %arg9[%c0_26, %c0_27, %c0_28] : memref<3x1x128xf32, #tpu.memory_space<vmem>>, vector<1x1x128xf32>
    %63 = vector.shape_cast %62 : vector<1x1x128xf32> to vector<1x128xf32>
    %c0_29 = arith.constant 0 : index
    %c0_30 = arith.constant 0 : index
    %c0_31 = arith.constant 0 : index
    %64 = vector.load %arg10[%c0_29, %c0_30, %c0_31] : memref<3x1x128xf32, #tpu.memory_space<vmem>>, vector<1x1x128xf32>
    %65 = vector.shape_cast %64 : vector<1x1x128xf32> to vector<1x128xf32>
    %cst_32 = arith.constant dense<0.000000e+00> : vector<16xf32>
    %66 = vector.multi_reduction <add>, %61, %cst_32 [1] : vector<16x128xf32> to vector<16xf32>
    %67 = vector.shape_cast %66 : vector<16xf32> to vector<16x1xf32>
    %cst_33 = arith.constant 1.280000e+02 : f32
    %68 = vector.broadcast %cst_33 : f32 to vector<16x1xf32>
    %69 = arith.divf %67, %68 : vector<16x1xf32>
    %70 = vector.broadcast %69 : vector<16x1xf32> to vector<16x128xf32>
    %71 = arith.subf %61, %70 : vector<16x128xf32>
    %72 = arith.mulf %71, %71 : vector<16x128xf32>
    %cst_34 = arith.constant dense<0.000000e+00> : vector<16xf32>
    %73 = vector.multi_reduction <add>, %72, %cst_34 [1] : vector<16x128xf32> to vector<16xf32>
    %74 = vector.shape_cast %73 : vector<16xf32> to vector<16x1xf32>
    %cst_35 = arith.constant 1.280000e+02 : f32
    %75 = vector.broadcast %cst_35 : f32 to vector<16x1xf32>
    %76 = arith.divf %74, %75 : vector<16x1xf32>
    %77 = vector.broadcast %69 : vector<16x1xf32> to vector<16x128xf32>
    %78 = arith.subf %61, %77 : vector<16x128xf32>
    %cst_36 = arith.constant 9.99999974E-6 : f32
    %79 = vector.broadcast %cst_36 : f32 to vector<16x1xf32>
    %80 = arith.addf %76, %79 : vector<16x1xf32>
    %81 = math.rsqrt %80 : vector<16x1xf32>
    %82 = vector.broadcast %81 : vector<16x1xf32> to vector<16x128xf32>
    %83 = arith.mulf %78, %82 : vector<16x128xf32>
    %84 = vector.broadcast %63 : vector<1x128xf32> to vector<16x128xf32>
    %85 = arith.mulf %83, %84 : vector<16x128xf32>
    %86 = vector.broadcast %65 : vector<1x128xf32> to vector<16x128xf32>
    %87 = arith.addf %85, %86 : vector<16x128xf32>
    %88 = arith.truncf %87 : vector<16x128xf32> to vector<16x128xbf16>
    %c0_37 = arith.constant 0 : index
    %c0_38 = arith.constant 0 : index
    %c0_39 = arith.constant 0 : index
    %89 = vector.load %arg11[%c0_37, %c0_38, %c0_39] : memref<3x128x256xbf16, #tpu.memory_space<vmem>>, vector<1x128x256xbf16>
    %90 = vector.shape_cast %89 : vector<1x128x256xbf16> to vector<128x256xbf16>
    %cst_40 = arith.constant dense<0.000000e+00> : vector<16x256xf32>
    %91 = tpu.matmul %88, %90, %cst_40 {dimension_numbers = #tpu.dot_dimension_numbers<[1], [0], [0], [1], [0, 0, 1, 1], [], []>} : vector<16x128xbf16>, vector<128x256xbf16>, vector<16x256xf32> -> vector<16x256xf32>
    %c0_41 = arith.constant 0 : index
    %c0_42 = arith.constant 0 : index
    %c0_43 = arith.constant 0 : index
    %92 = vector.load %arg12[%c0_41, %c0_42, %c0_43] : memref<3x1x256xf32, #tpu.memory_space<vmem>>, vector<1x1x256xf32>
    %93 = vector.shape_cast %92 : vector<1x1x256xf32> to vector<1x256xf32>
    %94 = vector.broadcast %93 : vector<1x256xf32> to vector<16x256xf32>
    %95 = arith.addf %91, %94 : vector<16x256xf32>
    %cst_44 = arith.constant 0.000000e+00 : f32
    %96 = vector.broadcast %cst_44 : f32 to vector<16x256xf32>
    %97 = arith.maximumf %95, %96 : vector<16x256xf32>
    %98 = arith.truncf %97 : vector<16x256xf32> to vector<16x256xbf16>
    %c0_45 = arith.constant 0 : index
    %c0_46 = arith.constant 0 : index
    %c0_47 = arith.constant 0 : index
    %99 = vector.load %arg13[%c0_45, %c0_46, %c0_47] : memref<3x256x128xbf16, #tpu.memory_space<vmem>>, vector<1x256x128xbf16>
    %100 = vector.shape_cast %99 : vector<1x256x128xbf16> to vector<256x128xbf16>
    %cst_48 = arith.constant dense<0.000000e+00> : vector<16x128xf32>
    %101 = tpu.matmul %98, %100, %cst_48 {dimension_numbers = #tpu.dot_dimension_numbers<[1], [0], [0], [1], [0, 0, 1, 1], [], []>} : vector<16x256xbf16>, vector<256x128xbf16>, vector<16x128xf32> -> vector<16x128xf32>
    %c0_49 = arith.constant 0 : index
    %c0_50 = arith.constant 0 : index
    %c0_51 = arith.constant 0 : index
    %102 = vector.load %arg14[%c0_49, %c0_50, %c0_51] : memref<3x1x128xf32, #tpu.memory_space<vmem>>, vector<1x1x128xf32>
    %103 = vector.shape_cast %102 : vector<1x1x128xf32> to vector<1x128xf32>
    %104 = vector.broadcast %103 : vector<1x128xf32> to vector<16x128xf32>
    %105 = arith.addf %101, %104 : vector<16x128xf32>
    %106 = arith.addf %105, %87 : vector<16x128xf32>
    %c0_52 = arith.constant 0 : index
    %c0_53 = arith.constant 0 : index
    %c0_54 = arith.constant 0 : index
    %107 = vector.load %arg15[%c0_52, %c0_53, %c0_54] : memref<3x1x128xf32, #tpu.memory_space<vmem>>, vector<1x1x128xf32>
    %108 = vector.shape_cast %107 : vector<1x1x128xf32> to vector<1x128xf32>
    %c0_55 = arith.constant 0 : index
    %c0_56 = arith.constant 0 : index
    %c0_57 = arith.constant 0 : index
    %109 = vector.load %arg16[%c0_55, %c0_56, %c0_57] : memref<3x1x128xf32, #tpu.memory_space<vmem>>, vector<1x1x128xf32>
    %110 = vector.shape_cast %109 : vector<1x1x128xf32> to vector<1x128xf32>
    %cst_58 = arith.constant dense<0.000000e+00> : vector<16xf32>
    %111 = vector.multi_reduction <add>, %106, %cst_58 [1] : vector<16x128xf32> to vector<16xf32>
    %112 = vector.shape_cast %111 : vector<16xf32> to vector<16x1xf32>
    %cst_59 = arith.constant 1.280000e+02 : f32
    %113 = vector.broadcast %cst_59 : f32 to vector<16x1xf32>
    %114 = arith.divf %112, %113 : vector<16x1xf32>
    %115 = vector.broadcast %114 : vector<16x1xf32> to vector<16x128xf32>
    %116 = arith.subf %106, %115 : vector<16x128xf32>
    %117 = arith.mulf %116, %116 : vector<16x128xf32>
    %cst_60 = arith.constant dense<0.000000e+00> : vector<16xf32>
    %118 = vector.multi_reduction <add>, %117, %cst_60 [1] : vector<16x128xf32> to vector<16xf32>
    %119 = vector.shape_cast %118 : vector<16xf32> to vector<16x1xf32>
    %cst_61 = arith.constant 1.280000e+02 : f32
    %120 = vector.broadcast %cst_61 : f32 to vector<16x1xf32>
    %121 = arith.divf %119, %120 : vector<16x1xf32>
    %122 = vector.broadcast %114 : vector<16x1xf32> to vector<16x128xf32>
    %123 = arith.subf %106, %122 : vector<16x128xf32>
    %cst_62 = arith.constant 9.99999974E-6 : f32
    %124 = vector.broadcast %cst_62 : f32 to vector<16x1xf32>
    %125 = arith.addf %121, %124 : vector<16x1xf32>
    %126 = math.rsqrt %125 : vector<16x1xf32>
    %127 = vector.broadcast %126 : vector<16x1xf32> to vector<16x128xf32>
    %128 = arith.mulf %123, %127 : vector<16x128xf32>
    %129 = vector.broadcast %108 : vector<1x128xf32> to vector<16x128xf32>
    %130 = arith.mulf %128, %129 : vector<16x128xf32>
    %131 = vector.broadcast %110 : vector<1x128xf32> to vector<16x128xf32>
    %132 = arith.addf %130, %131 : vector<16x128xf32>
    %133 = arith.truncf %132 : vector<16x128xf32> to vector<16x128xbf16>
    %c1 = arith.constant 1 : index
    %c0_63 = arith.constant 0 : index
    %c0_64 = arith.constant 0 : index
    %134 = vector.load %arg5[%c1, %c0_63, %c0_64] : memref<3x128x384xbf16, #tpu.memory_space<vmem>>, vector<1x128x384xbf16>
    %135 = vector.shape_cast %134 : vector<1x128x384xbf16> to vector<128x384xbf16>
    %cst_65 = arith.constant dense<0.000000e+00> : vector<16x384xf32>
    %136 = tpu.matmul %133, %135, %cst_65 {dimension_numbers = #tpu.dot_dimension_numbers<[1], [0], [0], [1], [0, 0, 1, 1], [], []>} : vector<16x128xbf16>, vector<128x384xbf16>, vector<16x384xf32> -> vector<16x384xf32>
    %c1_66 = arith.constant 1 : index
    %c0_67 = arith.constant 0 : index
    %c0_68 = arith.constant 0 : index
    %137 = vector.load %arg6[%c1_66, %c0_67, %c0_68] : memref<3x1x384xf32, #tpu.memory_space<vmem>>, vector<1x1x384xf32>
    %138 = vector.shape_cast %137 : vector<1x1x384xf32> to vector<1x384xf32>
    %139 = vector.broadcast %138 : vector<1x384xf32> to vector<16x384xf32>
    %140 = arith.addf %136, %139 : vector<16x384xf32>
    %141 = vector.extract_strided_slice %140 {offsets = [0, 0], sizes = [16, 128], strides = [1, 1]} : vector<16x384xf32> to vector<16x128xf32>
    %142 = vector.shape_cast %141 : vector<16x128xf32> to vector<2x8x4x32xf32>
    %143 = tpu.transpose %142, [0, 2, 1, 3] : vector<2x8x4x32xf32> -> vector<2x4x8x32xf32>
    %144 = vector.shape_cast %143 : vector<2x4x8x32xf32> to vector<8x8x32xf32>
    %145 = arith.truncf %144 : vector<8x8x32xf32> to vector<8x8x32xbf16>
    %146 = vector.extract_strided_slice %140 {offsets = [0, 128], sizes = [16, 128], strides = [1, 1]} : vector<16x384xf32> to vector<16x128xf32>
    %147 = vector.shape_cast %146 : vector<16x128xf32> to vector<2x8x4x32xf32>
    %148 = tpu.transpose %147, [0, 2, 1, 3] : vector<2x8x4x32xf32> -> vector<2x4x8x32xf32>
    %149 = vector.shape_cast %148 : vector<2x4x8x32xf32> to vector<8x8x32xf32>
    %150 = arith.truncf %149 : vector<8x8x32xf32> to vector<8x8x32xbf16>
    %151 = vector.extract_strided_slice %140 {offsets = [0, 256], sizes = [16, 128], strides = [1, 1]} : vector<16x384xf32> to vector<16x128xf32>
    %152 = vector.shape_cast %151 : vector<16x128xf32> to vector<2x8x4x32xf32>
    %153 = tpu.transpose %152, [0, 2, 1, 3] : vector<2x8x4x32xf32> -> vector<2x4x8x32xf32>
    %154 = vector.shape_cast %153 : vector<2x4x8x32xf32> to vector<8x8x32xf32>
    %155 = arith.truncf %154 : vector<8x8x32xf32> to vector<8x8x32xbf16>
    "tpu.trace_start"() <{level = 10 : i32, message = "bqd,bkd->bqk"}> : () -> ()
    %cst_69 = arith.constant dense<0.000000e+00> : vector<8x8x8xf32>
    %156 = tpu.matmul %145, %150, %cst_69 {dimension_numbers = #tpu.dot_dimension_numbers<[2], [2], [1], [1], [0, 0, 0, 1, 1, 1], [0], [0]>} : vector<8x8x32xbf16>, vector<8x8x32xbf16>, vector<8x8x8xf32> -> vector<8x8x8xf32>
    "tpu.trace_stop"() : () -> ()
    %cst_70 = arith.constant dense<0xFF800000> : vector<8x8xf32>
    %157 = vector.multi_reduction <maximumf>, %156, %cst_70 [2] : vector<8x8x8xf32> to vector<8x8xf32>
    %158 = vector.shape_cast %157 : vector<8x8xf32> to vector<8x8x1xf32>
    %159 = vector.broadcast %158 : vector<8x8x1xf32> to vector<8x8x8xf32>
    %160 = arith.subf %156, %159 : vector<8x8x8xf32>
    %161 = math.exp %160 : vector<8x8x8xf32>
    %cst_71 = arith.constant dense<0.000000e+00> : vector<8x8xf32>
    %162 = vector.multi_reduction <add>, %161, %cst_71 [2] : vector<8x8x8xf32> to vector<8x8xf32>
    %163 = vector.shape_cast %162 : vector<8x8xf32> to vector<8x8x1xf32>
    %164 = tpu.reciprocal %163 {approx = true} : vector<8x8x1xf32> -> vector<8x8x1xf32>
    %165 = vector.broadcast %164 : vector<8x8x1xf32> to vector<8x8x8xf32>
    %166 = arith.mulf %161, %165 : vector<8x8x8xf32>
    %167 = arith.truncf %166 : vector<8x8x8xf32> to vector<8x8x8xbf16>
    "tpu.trace_start"() <{level = 10 : i32, message = "bqk,bkd->bqd"}> : () -> ()
    %cst_72 = arith.constant dense<0.000000e+00> : vector<8x8x32xf32>
    %168 = tpu.matmul %167, %155, %cst_72 {dimension_numbers = #tpu.dot_dimension_numbers<[2], [1], [1], [2], [0, 0, 0, 1, 1, 2], [0], [0]>} : vector<8x8x8xbf16>, vector<8x8x32xbf16>, vector<8x8x32xf32> -> vector<8x8x32xf32>
    "tpu.trace_stop"() : () -> ()
    %169 = vector.shape_cast %168 : vector<8x8x32xf32> to vector<2x4x8x32xf32>
    %170 = tpu.transpose %169, [0, 2, 1, 3] : vector<2x4x8x32xf32> -> vector<2x8x4x32xf32>
    %171 = vector.shape_cast %170 : vector<2x8x4x32xf32> to vector<16x128xf32>
    %172 = arith.truncf %171 : vector<16x128xf32> to vector<16x128xbf16>
    %c1_73 = arith.constant 1 : index
    %c0_74 = arith.constant 0 : index
    %c0_75 = arith.constant 0 : index
    %173 = vector.load %arg7[%c1_73, %c0_74, %c0_75] : memref<3x128x128xbf16, #tpu.memory_space<vmem>>, vector<1x128x128xbf16>
    %174 = vector.shape_cast %173 : vector<1x128x128xbf16> to vector<128x128xbf16>
    %cst_76 = arith.constant dense<0.000000e+00> : vector<16x128xf32>
    %175 = tpu.matmul %172, %174, %cst_76 {dimension_numbers = #tpu.dot_dimension_numbers<[1], [0], [0], [1], [0, 0, 1, 1], [], []>} : vector<16x128xbf16>, vector<128x128xbf16>, vector<16x128xf32> -> vector<16x128xf32>
    %c1_77 = arith.constant 1 : index
    %c0_78 = arith.constant 0 : index
    %c0_79 = arith.constant 0 : index
    %176 = vector.load %arg8[%c1_77, %c0_78, %c0_79] : memref<3x1x128xf32, #tpu.memory_space<vmem>>, vector<1x1x128xf32>
    %177 = vector.shape_cast %176 : vector<1x1x128xf32> to vector<1x128xf32>
    %178 = vector.broadcast %177 : vector<1x128xf32> to vector<16x128xf32>
    %179 = arith.addf %175, %178 : vector<16x128xf32>
    %180 = arith.addf %179, %132 : vector<16x128xf32>
    %c1_80 = arith.constant 1 : index
    %c0_81 = arith.constant 0 : index
    %c0_82 = arith.constant 0 : index
    %181 = vector.load %arg9[%c1_80, %c0_81, %c0_82] : memref<3x1x128xf32, #tpu.memory_space<vmem>>, vector<1x1x128xf32>
    %182 = vector.shape_cast %181 : vector<1x1x128xf32> to vector<1x128xf32>
    %c1_83 = arith.constant 1 : index
    %c0_84 = arith.constant 0 : index
    %c0_85 = arith.constant 0 : index
    %183 = vector.load %arg10[%c1_83, %c0_84, %c0_85] : memref<3x1x128xf32, #tpu.memory_space<vmem>>, vector<1x1x128xf32>
    %184 = vector.shape_cast %183 : vector<1x1x128xf32> to vector<1x128xf32>
    %cst_86 = arith.constant dense<0.000000e+00> : vector<16xf32>
    %185 = vector.multi_reduction <add>, %180, %cst_86 [1] : vector<16x128xf32> to vector<16xf32>
    %186 = vector.shape_cast %185 : vector<16xf32> to vector<16x1xf32>
    %cst_87 = arith.constant 1.280000e+02 : f32
    %187 = vector.broadcast %cst_87 : f32 to vector<16x1xf32>
    %188 = arith.divf %186, %187 : vector<16x1xf32>
    %189 = vector.broadcast %188 : vector<16x1xf32> to vector<16x128xf32>
    %190 = arith.subf %180, %189 : vector<16x128xf32>
    %191 = arith.mulf %190, %190 : vector<16x128xf32>
    %cst_88 = arith.constant dense<0.000000e+00> : vector<16xf32>
    %192 = vector.multi_reduction <add>, %191, %cst_88 [1] : vector<16x128xf32> to vector<16xf32>
    %193 = vector.shape_cast %192 : vector<16xf32> to vector<16x1xf32>
    %cst_89 = arith.constant 1.280000e+02 : f32
    %194 = vector.broadcast %cst_89 : f32 to vector<16x1xf32>
    %195 = arith.divf %193, %194 : vector<16x1xf32>
    %196 = vector.broadcast %188 : vector<16x1xf32> to vector<16x128xf32>
    %197 = arith.subf %180, %196 : vector<16x128xf32>
    %cst_90 = arith.constant 9.99999974E-6 : f32
    %198 = vector.broadcast %cst_90 : f32 to vector<16x1xf32>
    %199 = arith.addf %195, %198 : vector<16x1xf32>
    %200 = math.rsqrt %199 : vector<16x1xf32>
    %201 = vector.broadcast %200 : vector<16x1xf32> to vector<16x128xf32>
    %202 = arith.mulf %197, %201 : vector<16x128xf32>
    %203 = vector.broadcast %182 : vector<1x128xf32> to vector<16x128xf32>
    %204 = arith.mulf %202, %203 : vector<16x128xf32>
    %205 = vector.broadcast %184 : vector<1x128xf32> to vector<16x128xf32>
    %206 = arith.addf %204, %205 : vector<16x128xf32>
    %207 = arith.truncf %206 : vector<16x128xf32> to vector<16x128xbf16>
    %c1_91 = arith.constant 1 : index
    %c0_92 = arith.constant 0 : index
    %c0_93 = arith.constant 0 : index
    %208 = vector.load %arg11[%c1_91, %c0_92, %c0_93] : memref<3x128x256xbf16, #tpu.memory_space<vmem>>, vector<1x128x256xbf16>
    %209 = vector.shape_cast %208 : vector<1x128x256xbf16> to vector<128x256xbf16>
    %cst_94 = arith.constant dense<0.000000e+00> : vector<16x256xf32>
    %210 = tpu.matmul %207, %209, %cst_94 {dimension_numbers = #tpu.dot_dimension_numbers<[1], [0], [0], [1], [0, 0, 1, 1], [], []>} : vector<16x128xbf16>, vector<128x256xbf16>, vector<16x256xf32> -> vector<16x256xf32>
    %c1_95 = arith.constant 1 : index
    %c0_96 = arith.constant 0 : index
    %c0_97 = arith.constant 0 : index
    %211 = vector.load %arg12[%c1_95, %c0_96, %c0_97] : memref<3x1x256xf32, #tpu.memory_space<vmem>>, vector<1x1x256xf32>
    %212 = vector.shape_cast %211 : vector<1x1x256xf32> to vector<1x256xf32>
    %213 = vector.broadcast %212 : vector<1x256xf32> to vector<16x256xf32>
    %214 = arith.addf %210, %213 : vector<16x256xf32>
    %cst_98 = arith.constant 0.000000e+00 : f32
    %215 = vector.broadcast %cst_98 : f32 to vector<16x256xf32>
    %216 = arith.maximumf %214, %215 : vector<16x256xf32>
    %217 = arith.truncf %216 : vector<16x256xf32> to vector<16x256xbf16>
    %c1_99 = arith.constant 1 : index
    %c0_100 = arith.constant 0 : index
    %c0_101 = arith.constant 0 : index
    %218 = vector.load %arg13[%c1_99, %c0_100, %c0_101] : memref<3x256x128xbf16, #tpu.memory_space<vmem>>, vector<1x256x128xbf16>
    %219 = vector.shape_cast %218 : vector<1x256x128xbf16> to vector<256x128xbf16>
    %cst_102 = arith.constant dense<0.000000e+00> : vector<16x128xf32>
    %220 = tpu.matmul %217, %219, %cst_102 {dimension_numbers = #tpu.dot_dimension_numbers<[1], [0], [0], [1], [0, 0, 1, 1], [], []>} : vector<16x256xbf16>, vector<256x128xbf16>, vector<16x128xf32> -> vector<16x128xf32>
    %c1_103 = arith.constant 1 : index
    %c0_104 = arith.constant 0 : index
    %c0_105 = arith.constant 0 : index
    %221 = vector.load %arg14[%c1_103, %c0_104, %c0_105] : memref<3x1x128xf32, #tpu.memory_space<vmem>>, vector<1x1x128xf32>
    %222 = vector.shape_cast %221 : vector<1x1x128xf32> to vector<1x128xf32>
    %223 = vector.broadcast %222 : vector<1x128xf32> to vector<16x128xf32>
    %224 = arith.addf %220, %223 : vector<16x128xf32>
    %225 = arith.addf %224, %206 : vector<16x128xf32>
    %c1_106 = arith.constant 1 : index
    %c0_107 = arith.constant 0 : index
    %c0_108 = arith.constant 0 : index
    %226 = vector.load %arg15[%c1_106, %c0_107, %c0_108] : memref<3x1x128xf32, #tpu.memory_space<vmem>>, vector<1x1x128xf32>
    %227 = vector.shape_cast %226 : vector<1x1x128xf32> to vector<1x128xf32>
    %c1_109 = arith.constant 1 : index
    %c0_110 = arith.constant 0 : index
    %c0_111 = arith.constant 0 : index
    %228 = vector.load %arg16[%c1_109, %c0_110, %c0_111] : memref<3x1x128xf32, #tpu.memory_space<vmem>>, vector<1x1x128xf32>
    %229 = vector.shape_cast %228 : vector<1x1x128xf32> to vector<1x128xf32>
    %cst_112 = arith.constant dense<0.000000e+00> : vector<16xf32>
    %230 = vector.multi_reduction <add>, %225, %cst_112 [1] : vector<16x128xf32> to vector<16xf32>
    %231 = vector.shape_cast %230 : vector<16xf32> to vector<16x1xf32>
    %cst_113 = arith.constant 1.280000e+02 : f32
    %232 = vector.broadcast %cst_113 : f32 to vector<16x1xf32>
    %233 = arith.divf %231, %232 : vector<16x1xf32>
    %234 = vector.broadcast %233 : vector<16x1xf32> to vector<16x128xf32>
    %235 = arith.subf %225, %234 : vector<16x128xf32>
    %236 = arith.mulf %235, %235 : vector<16x128xf32>
    %cst_114 = arith.constant dense<0.000000e+00> : vector<16xf32>
    %237 = vector.multi_reduction <add>, %236, %cst_114 [1] : vector<16x128xf32> to vector<16xf32>
    %238 = vector.shape_cast %237 : vector<16xf32> to vector<16x1xf32>
    %cst_115 = arith.constant 1.280000e+02 : f32
    %239 = vector.broadcast %cst_115 : f32 to vector<16x1xf32>
    %240 = arith.divf %238, %239 : vector<16x1xf32>
    %241 = vector.broadcast %233 : vector<16x1xf32> to vector<16x128xf32>
    %242 = arith.subf %225, %241 : vector<16x128xf32>
    %cst_116 = arith.constant 9.99999974E-6 : f32
    %243 = vector.broadcast %cst_116 : f32 to vector<16x1xf32>
    %244 = arith.addf %240, %243 : vector<16x1xf32>
    %245 = math.rsqrt %244 : vector<16x1xf32>
    %246 = vector.broadcast %245 : vector<16x1xf32> to vector<16x128xf32>
    %247 = arith.mulf %242, %246 : vector<16x128xf32>
    %248 = vector.broadcast %227 : vector<1x128xf32> to vector<16x128xf32>
    %249 = arith.mulf %247, %248 : vector<16x128xf32>
    %250 = vector.broadcast %229 : vector<1x128xf32> to vector<16x128xf32>
    %251 = arith.addf %249, %250 : vector<16x128xf32>
    %252 = arith.truncf %251 : vector<16x128xf32> to vector<16x128xbf16>
    %c2 = arith.constant 2 : index
    %c0_117 = arith.constant 0 : index
    %c0_118 = arith.constant 0 : index
    %253 = vector.load %arg5[%c2, %c0_117, %c0_118] : memref<3x128x384xbf16, #tpu.memory_space<vmem>>, vector<1x128x384xbf16>
    %254 = vector.shape_cast %253 : vector<1x128x384xbf16> to vector<128x384xbf16>
    %cst_119 = arith.constant dense<0.000000e+00> : vector<16x384xf32>
    %255 = tpu.matmul %252, %254, %cst_119 {dimension_numbers = #tpu.dot_dimension_numbers<[1], [0], [0], [1], [0, 0, 1, 1], [], []>} : vector<16x128xbf16>, vector<128x384xbf16>, vector<16x384xf32> -> vector<16x384xf32>
    %c2_120 = arith.constant 2 : index
    %c0_121 = arith.constant 0 : index
    %c0_122 = arith.constant 0 : index
    %256 = vector.load %arg6[%c2_120, %c0_121, %c0_122] : memref<3x1x384xf32, #tpu.memory_space<vmem>>, vector<1x1x384xf32>
    %257 = vector.shape_cast %256 : vector<1x1x384xf32> to vector<1x384xf32>
    %258 = vector.broadcast %257 : vector<1x384xf32> to vector<16x384xf32>
    %259 = arith.addf %255, %258 : vector<16x384xf32>
    %260 = vector.extract_strided_slice %259 {offsets = [0, 0], sizes = [16, 128], strides = [1, 1]} : vector<16x384xf32> to vector<16x128xf32>
    %261 = vector.shape_cast %260 : vector<16x128xf32> to vector<2x8x4x32xf32>
    %262 = tpu.transpose %261, [0, 2, 1, 3] : vector<2x8x4x32xf32> -> vector<2x4x8x32xf32>
    %263 = vector.shape_cast %262 : vector<2x4x8x32xf32> to vector<8x8x32xf32>
    %264 = arith.truncf %263 : vector<8x8x32xf32> to vector<8x8x32xbf16>
    %265 = vector.extract_strided_slice %259 {offsets = [0, 128], sizes = [16, 128], strides = [1, 1]} : vector<16x384xf32> to vector<16x128xf32>
    %266 = vector.shape_cast %265 : vector<16x128xf32> to vector<2x8x4x32xf32>
    %267 = tpu.transpose %266, [0, 2, 1, 3] : vector<2x8x4x32xf32> -> vector<2x4x8x32xf32>
    %268 = vector.shape_cast %267 : vector<2x4x8x32xf32> to vector<8x8x32xf32>
    %269 = arith.truncf %268 : vector<8x8x32xf32> to vector<8x8x32xbf16>
    %270 = vector.extract_strided_slice %259 {offsets = [0, 256], sizes = [16, 128], strides = [1, 1]} : vector<16x384xf32> to vector<16x128xf32>
    %271 = vector.shape_cast %270 : vector<16x128xf32> to vector<2x8x4x32xf32>
    %272 = tpu.transpose %271, [0, 2, 1, 3] : vector<2x8x4x32xf32> -> vector<2x4x8x32xf32>
    %273 = vector.shape_cast %272 : vector<2x4x8x32xf32> to vector<8x8x32xf32>
    %274 = arith.truncf %273 : vector<8x8x32xf32> to vector<8x8x32xbf16>
    "tpu.trace_start"() <{level = 10 : i32, message = "bqd,bkd->bqk"}> : () -> ()
    %cst_123 = arith.constant dense<0.000000e+00> : vector<8x8x8xf32>
    %275 = tpu.matmul %264, %269, %cst_123 {dimension_numbers = #tpu.dot_dimension_numbers<[2], [2], [1], [1], [0, 0, 0, 1, 1, 1], [0], [0]>} : vector<8x8x32xbf16>, vector<8x8x32xbf16>, vector<8x8x8xf32> -> vector<8x8x8xf32>
    "tpu.trace_stop"() : () -> ()
    %cst_124 = arith.constant dense<0xFF800000> : vector<8x8xf32>
    %276 = vector.multi_reduction <maximumf>, %275, %cst_124 [2] : vector<8x8x8xf32> to vector<8x8xf32>
    %277 = vector.shape_cast %276 : vector<8x8xf32> to vector<8x8x1xf32>
    %278 = vector.broadcast %277 : vector<8x8x1xf32> to vector<8x8x8xf32>
    %279 = arith.subf %275, %278 : vector<8x8x8xf32>
    %280 = math.exp %279 : vector<8x8x8xf32>
    %cst_125 = arith.constant dense<0.000000e+00> : vector<8x8xf32>
    %281 = vector.multi_reduction <add>, %280, %cst_125 [2] : vector<8x8x8xf32> to vector<8x8xf32>
    %282 = vector.shape_cast %281 : vector<8x8xf32> to vector<8x8x1xf32>
    %283 = tpu.reciprocal %282 {approx = true} : vector<8x8x1xf32> -> vector<8x8x1xf32>
    %284 = vector.broadcast %283 : vector<8x8x1xf32> to vector<8x8x8xf32>
    %285 = arith.mulf %280, %284 : vector<8x8x8xf32>
    %286 = arith.truncf %285 : vector<8x8x8xf32> to vector<8x8x8xbf16>
    "tpu.trace_start"() <{level = 10 : i32, message = "bqk,bkd->bqd"}> : () -> ()
    %cst_126 = arith.constant dense<0.000000e+00> : vector<8x8x32xf32>
    %287 = tpu.matmul %286, %274, %cst_126 {dimension_numbers = #tpu.dot_dimension_numbers<[2], [1], [1], [2], [0, 0, 0, 1, 1, 2], [0], [0]>} : vector<8x8x8xbf16>, vector<8x8x32xbf16>, vector<8x8x32xf32> -> vector<8x8x32xf32>
    "tpu.trace_stop"() : () -> ()
    %288 = vector.shape_cast %287 : vector<8x8x32xf32> to vector<2x4x8x32xf32>
    %289 = tpu.transpose %288, [0, 2, 1, 3] : vector<2x4x8x32xf32> -> vector<2x8x4x32xf32>
    %290 = vector.shape_cast %289 : vector<2x8x4x32xf32> to vector<16x128xf32>
    %291 = arith.truncf %290 : vector<16x128xf32> to vector<16x128xbf16>
    %c2_127 = arith.constant 2 : index
    %c0_128 = arith.constant 0 : index
    %c0_129 = arith.constant 0 : index
    %292 = vector.load %arg7[%c2_127, %c0_128, %c0_129] : memref<3x128x128xbf16, #tpu.memory_space<vmem>>, vector<1x128x128xbf16>
    %293 = vector.shape_cast %292 : vector<1x128x128xbf16> to vector<128x128xbf16>
    %cst_130 = arith.constant dense<0.000000e+00> : vector<16x128xf32>
    %294 = tpu.matmul %291, %293, %cst_130 {dimension_numbers = #tpu.dot_dimension_numbers<[1], [0], [0], [1], [0, 0, 1, 1], [], []>} : vector<16x128xbf16>, vector<128x128xbf16>, vector<16x128xf32> -> vector<16x128xf32>
    %c2_131 = arith.constant 2 : index
    %c0_132 = arith.constant 0 : index
    %c0_133 = arith.constant 0 : index
    %295 = vector.load %arg8[%c2_131, %c0_132, %c0_133] : memref<3x1x128xf32, #tpu.memory_space<vmem>>, vector<1x1x128xf32>
    %296 = vector.shape_cast %295 : vector<1x1x128xf32> to vector<1x128xf32>
    %297 = vector.broadcast %296 : vector<1x128xf32> to vector<16x128xf32>
    %298 = arith.addf %294, %297 : vector<16x128xf32>
    %299 = arith.addf %298, %251 : vector<16x128xf32>
    %c2_134 = arith.constant 2 : index
    %c0_135 = arith.constant 0 : index
    %c0_136 = arith.constant 0 : index
    %300 = vector.load %arg9[%c2_134, %c0_135, %c0_136] : memref<3x1x128xf32, #tpu.memory_space<vmem>>, vector<1x1x128xf32>
    %301 = vector.shape_cast %300 : vector<1x1x128xf32> to vector<1x128xf32>
    %c2_137 = arith.constant 2 : index
    %c0_138 = arith.constant 0 : index
    %c0_139 = arith.constant 0 : index
    %302 = vector.load %arg10[%c2_137, %c0_138, %c0_139] : memref<3x1x128xf32, #tpu.memory_space<vmem>>, vector<1x1x128xf32>
    %303 = vector.shape_cast %302 : vector<1x1x128xf32> to vector<1x128xf32>
    %cst_140 = arith.constant dense<0.000000e+00> : vector<16xf32>
    %304 = vector.multi_reduction <add>, %299, %cst_140 [1] : vector<16x128xf32> to vector<16xf32>
    %305 = vector.shape_cast %304 : vector<16xf32> to vector<16x1xf32>
    %cst_141 = arith.constant 1.280000e+02 : f32
    %306 = vector.broadcast %cst_141 : f32 to vector<16x1xf32>
    %307 = arith.divf %305, %306 : vector<16x1xf32>
    %308 = vector.broadcast %307 : vector<16x1xf32> to vector<16x128xf32>
    %309 = arith.subf %299, %308 : vector<16x128xf32>
    %310 = arith.mulf %309, %309 : vector<16x128xf32>
    %cst_142 = arith.constant dense<0.000000e+00> : vector<16xf32>
    %311 = vector.multi_reduction <add>, %310, %cst_142 [1] : vector<16x128xf32> to vector<16xf32>
    %312 = vector.shape_cast %311 : vector<16xf32> to vector<16x1xf32>
    %cst_143 = arith.constant 1.280000e+02 : f32
    %313 = vector.broadcast %cst_143 : f32 to vector<16x1xf32>
    %314 = arith.divf %312, %313 : vector<16x1xf32>
    %315 = vector.broadcast %307 : vector<16x1xf32> to vector<16x128xf32>
    %316 = arith.subf %299, %315 : vector<16x128xf32>
    %cst_144 = arith.constant 9.99999974E-6 : f32
    %317 = vector.broadcast %cst_144 : f32 to vector<16x1xf32>
    %318 = arith.addf %314, %317 : vector<16x1xf32>
    %319 = math.rsqrt %318 : vector<16x1xf32>
    %320 = vector.broadcast %319 : vector<16x1xf32> to vector<16x128xf32>
    %321 = arith.mulf %316, %320 : vector<16x128xf32>
    %322 = vector.broadcast %301 : vector<1x128xf32> to vector<16x128xf32>
    %323 = arith.mulf %321, %322 : vector<16x128xf32>
    %324 = vector.broadcast %303 : vector<1x128xf32> to vector<16x128xf32>
    %325 = arith.addf %323, %324 : vector<16x128xf32>
    %326 = arith.truncf %325 : vector<16x128xf32> to vector<16x128xbf16>
    %c2_145 = arith.constant 2 : index
    %c0_146 = arith.constant 0 : index
    %c0_147 = arith.constant 0 : index
    %327 = vector.load %arg11[%c2_145, %c0_146, %c0_147] : memref<3x128x256xbf16, #tpu.memory_space<vmem>>, vector<1x128x256xbf16>
    %328 = vector.shape_cast %327 : vector<1x128x256xbf16> to vector<128x256xbf16>
    %cst_148 = arith.constant dense<0.000000e+00> : vector<16x256xf32>
    %329 = tpu.matmul %326, %328, %cst_148 {dimension_numbers = #tpu.dot_dimension_numbers<[1], [0], [0], [1], [0, 0, 1, 1], [], []>} : vector<16x128xbf16>, vector<128x256xbf16>, vector<16x256xf32> -> vector<16x256xf32>
    %c2_149 = arith.constant 2 : index
    %c0_150 = arith.constant 0 : index
    %c0_151 = arith.constant 0 : index
    %330 = vector.load %arg12[%c2_149, %c0_150, %c0_151] : memref<3x1x256xf32, #tpu.memory_space<vmem>>, vector<1x1x256xf32>
    %331 = vector.shape_cast %330 : vector<1x1x256xf32> to vector<1x256xf32>
    %332 = vector.broadcast %331 : vector<1x256xf32> to vector<16x256xf32>
    %333 = arith.addf %329, %332 : vector<16x256xf32>
    %cst_152 = arith.constant 0.000000e+00 : f32
    %334 = vector.broadcast %cst_152 : f32 to vector<16x256xf32>
    %335 = arith.maximumf %333, %334 : vector<16x256xf32>
    %336 = arith.truncf %335 : vector<16x256xf32> to vector<16x256xbf16>
    %c2_153 = arith.constant 2 : index
    %c0_154 = arith.constant 0 : index
    %c0_155 = arith.constant 0 : index
    %337 = vector.load %arg13[%c2_153, %c0_154, %c0_155] : memref<3x256x128xbf16, #tpu.memory_space<vmem>>, vector<1x256x128xbf16>
    %338 = vector.shape_cast %337 : vector<1x256x128xbf16> to vector<256x128xbf16>
    %cst_156 = arith.constant dense<0.000000e+00> : vector<16x128xf32>
    %339 = tpu.matmul %336, %338, %cst_156 {dimension_numbers = #tpu.dot_dimension_numbers<[1], [0], [0], [1], [0, 0, 1, 1], [], []>} : vector<16x256xbf16>, vector<256x128xbf16>, vector<16x128xf32> -> vector<16x128xf32>
    %c2_157 = arith.constant 2 : index
    %c0_158 = arith.constant 0 : index
    %c0_159 = arith.constant 0 : index
    %340 = vector.load %arg14[%c2_157, %c0_158, %c0_159] : memref<3x1x128xf32, #tpu.memory_space<vmem>>, vector<1x1x128xf32>
    %341 = vector.shape_cast %340 : vector<1x1x128xf32> to vector<1x128xf32>
    %342 = vector.broadcast %341 : vector<1x128xf32> to vector<16x128xf32>
    %343 = arith.addf %339, %342 : vector<16x128xf32>
    %344 = arith.addf %343, %325 : vector<16x128xf32>
    %c2_160 = arith.constant 2 : index
    %c0_161 = arith.constant 0 : index
    %c0_162 = arith.constant 0 : index
    %345 = vector.load %arg15[%c2_160, %c0_161, %c0_162] : memref<3x1x128xf32, #tpu.memory_space<vmem>>, vector<1x1x128xf32>
    %346 = vector.shape_cast %345 : vector<1x1x128xf32> to vector<1x128xf32>
    %c2_163 = arith.constant 2 : index
    %c0_164 = arith.constant 0 : index
    %c0_165 = arith.constant 0 : index
    %347 = vector.load %arg16[%c2_163, %c0_164, %c0_165] : memref<3x1x128xf32, #tpu.memory_space<vmem>>, vector<1x1x128xf32>
    %348 = vector.shape_cast %347 : vector<1x1x128xf32> to vector<1x128xf32>
    %cst_166 = arith.constant dense<0.000000e+00> : vector<16xf32>
    %349 = vector.multi_reduction <add>, %344, %cst_166 [1] : vector<16x128xf32> to vector<16xf32>
    %350 = vector.shape_cast %349 : vector<16xf32> to vector<16x1xf32>
    %cst_167 = arith.constant 1.280000e+02 : f32
    %351 = vector.broadcast %cst_167 : f32 to vector<16x1xf32>
    %352 = arith.divf %350, %351 : vector<16x1xf32>
    %353 = vector.broadcast %352 : vector<16x1xf32> to vector<16x128xf32>
    %354 = arith.subf %344, %353 : vector<16x128xf32>
    %355 = arith.mulf %354, %354 : vector<16x128xf32>
    %cst_168 = arith.constant dense<0.000000e+00> : vector<16xf32>
    %356 = vector.multi_reduction <add>, %355, %cst_168 [1] : vector<16x128xf32> to vector<16xf32>
    %357 = vector.shape_cast %356 : vector<16xf32> to vector<16x1xf32>
    %cst_169 = arith.constant 1.280000e+02 : f32
    %358 = vector.broadcast %cst_169 : f32 to vector<16x1xf32>
    %359 = arith.divf %357, %358 : vector<16x1xf32>
    %360 = vector.broadcast %352 : vector<16x1xf32> to vector<16x128xf32>
    %361 = arith.subf %344, %360 : vector<16x128xf32>
    %cst_170 = arith.constant 9.99999974E-6 : f32
    %362 = vector.broadcast %cst_170 : f32 to vector<16x1xf32>
    %363 = arith.addf %359, %362 : vector<16x1xf32>
    %364 = math.rsqrt %363 : vector<16x1xf32>
    %365 = vector.broadcast %364 : vector<16x1xf32> to vector<16x128xf32>
    %366 = arith.mulf %361, %365 : vector<16x128xf32>
    %367 = vector.broadcast %346 : vector<1x128xf32> to vector<16x128xf32>
    %368 = arith.mulf %366, %367 : vector<16x128xf32>
    %369 = vector.broadcast %348 : vector<1x128xf32> to vector<16x128xf32>
    %370 = arith.addf %368, %369 : vector<16x128xf32>
    %371 = vector.shape_cast %370 : vector<16x128xf32> to vector<2x8x128xf32>
    %c0_171 = arith.constant 0 : index
    %c0_172 = arith.constant 0 : index
    %c0_173 = arith.constant 0 : index
    %372 = vector.load %arg17[%c0_171, %c0_172, %c0_173] : memref<2x8x128xf32, #tpu.memory_space<vmem>>, vector<2x8x128xf32>
    tpu.vector_store %arg17[%c0_171, %c0_172, %c0_173], %371 {strides = array<i32>} : memref<2x8x128xf32, #tpu.memory_space<vmem>>, vector<2x8x128xf32>,
    return
  }
  func.func @transform_0(%arg0: i32) -> (i32, i32, i32) {
    %c0_i32 = arith.constant 0 : i32
    %c0_i32_0 = arith.constant 0 : i32
    %c0_i32_1 = arith.constant 0 : i32
    return %arg0, %c0_i32, %c0_i32_0 : i32, i32, i32
  }
  func.func @transform_1(%arg0: i32) -> (i32, i32) {
    %c0_i32 = arith.constant 0 : i32
    %c0_i32_0 = arith.constant 0 : i32
    %c0_i32_1 = arith.constant 0 : i32
    return %c0_i32, %c0_i32_0 : i32, i32
  }
  func.func @transform_2(%arg0: i32) -> (i32, i32) {
    %c0_i32 = arith.constant 0 : i32
    %c0_i32_0 = arith.constant 0 : i32
    %c0_i32_1 = arith.constant 0 : i32
    return %c0_i32, %c0_i32_0 : i32, i32
  }
  func.func @transform_3(%arg0: i32) -> (i32, i32) {
    %c0_i32 = arith.constant 0 : i32
    %c0_i32_0 = arith.constant 0 : i32
    %c0_i32_1 = arith.constant 0 : i32
    return %c0_i32, %c0_i32_0 : i32, i32
  }
  func.func @transform_4(%arg0: i32) -> (i32, i32, i32) {
    %c0_i32 = arith.constant 0 : i32
    %c0_i32_0 = arith.constant 0 : i32
    %c0_i32_1 = arith.constant 0 : i32
    %c0_i32_2 = arith.constant 0 : i32
    return %c0_i32, %c0_i32_0, %c0_i32_1 : i32, i32, i32
  }
  func.func @transform_5(%arg0: i32) -> (i32, i32, i32) {
    %c0_i32 = arith.constant 0 : i32
    %c0_i32_0 = arith.constant 0 : i32
    %c0_i32_1 = arith.constant 0 : i32
    %c0_i32_2 = arith.constant 0 : i32
    return %c0_i32, %c0_i32_0, %c0_i32_1 : i32, i32, i32
  }
  func.func @transform_6(%arg0: i32) -> (i32, i32, i32) {
    %c0_i32 = arith.constant 0 : i32
    %c0_i32_0 = arith.constant 0 : i32
    %c0_i32_1 = arith.constant 0 : i32
    %c0_i32_2 = arith.constant 0 : i32
    return %c0_i32, %c0_i32_0, %c0_i32_1 : i32, i32, i32
  }
  func.func @transform_7(%arg0: i32) -> (i32, i32, i32) {
    %c0_i32 = arith.constant 0 : i32
    %c0_i32_0 = arith.constant 0 : i32
    %c0_i32_1 = arith.constant 0 : i32
    %c0_i32_2 = arith.constant 0 : i32
    return %c0_i32, %c0_i32_0, %c0_i32_1 : i32, i32, i32
  }
  func.func @transform_8(%arg0: i32) -> (i32, i32, i32) {
    %c0_i32 = arith.constant 0 : i32
    %c0_i32_0 = arith.constant 0 : i32
    %c0_i32_1 = arith.constant 0 : i32
    %c0_i32_2 = arith.constant 0 : i32
    return %c0_i32, %c0_i32_0, %c0_i32_1 : i32, i32, i32
  }
  func.func @transform_9(%arg0: i32) -> (i32, i32, i32) {
    %c0_i32 = arith.constant 0 : i32
    %c0_i32_0 = arith.constant 0 : i32
    %c0_i32_1 = arith.constant 0 : i32
    %c0_i32_2 = arith.constant 0 : i32
    return %c0_i32, %c0_i32_0, %c0_i32_1 : i32, i32, i32
  }
  func.func @transform_10(%arg0: i32) -> (i32, i32, i32) {
    %c0_i32 = arith.constant 0 : i32
    %c0_i32_0 = arith.constant 0 : i32
    %c0_i32_1 = arith.constant 0 : i32
    %c0_i32_2 = arith.constant 0 : i32
    return %c0_i32, %c0_i32_0, %c0_i32_1 : i32, i32, i32
  }
  func.func @transform_11(%arg0: i32) -> (i32, i32, i32) {
    %c0_i32 = arith.constant 0 : i32
    %c0_i32_0 = arith.constant 0 : i32
    %c0_i32_1 = arith.constant 0 : i32
    %c0_i32_2 = arith.constant 0 : i32
    return %c0_i32, %c0_i32_0, %c0_i32_1 : i32, i32, i32
  }
  func.func @transform_12(%arg0: i32) -> (i32, i32, i32) {
    %c0_i32 = arith.constant 0 : i32
    %c0_i32_0 = arith.constant 0 : i32
    %c0_i32_1 = arith.constant 0 : i32
    %c0_i32_2 = arith.constant 0 : i32
    return %c0_i32, %c0_i32_0, %c0_i32_1 : i32, i32, i32
  }
  func.func @transform_13(%arg0: i32) -> (i32, i32, i32) {
    %c0_i32 = arith.constant 0 : i32
    %c0_i32_0 = arith.constant 0 : i32
    %c0_i32_1 = arith.constant 0 : i32
    %c0_i32_2 = arith.constant 0 : i32
    return %c0_i32, %c0_i32_0, %c0_i32_1 : i32, i32, i32
  }
  func.func @transform_14(%arg0: i32) -> (i32, i32, i32) {
    %c0_i32 = arith.constant 0 : i32
    %c0_i32_0 = arith.constant 0 : i32
    %c0_i32_1 = arith.constant 0 : i32
    %c0_i32_2 = arith.constant 0 : i32
    return %c0_i32, %c0_i32_0, %c0_i32_1 : i32, i32, i32
  }
  func.func @transform_15(%arg0: i32) -> (i32, i32, i32) {
    %c0_i32 = arith.constant 0 : i32
    %c0_i32_0 = arith.constant 0 : i32
    %c0_i32_1 = arith.constant 0 : i32
    %c0_i32_2 = arith.constant 0 : i32
    return %c0_i32, %c0_i32_0, %c0_i32_1 : i32, i32, i32
  }
  func.func @transform_16(%arg0: i32) -> (i32, i32, i32) {
    %c0_i32 = arith.constant 0 : i32
    %c0_i32_0 = arith.constant 0 : i32
    %c0_i32_1 = arith.constant 0 : i32
    return %arg0, %c0_i32, %c0_i32_0 : i32, i32, i32
  }
}

</mosaic_0001>

<bundles_post_ra>
// kernel: tpu_custom_call.1
= control target key start
LH: loop header
LB: loop body
LE: loop exit
PB: predicated region body
PF: predicated region fallthrough
CT: control target
= control target key end

     0   :  { %s11984_s0 = inlined_call_operand.hbm [shape: f32[2,8,16], index: 0, kind: input, shape index: {}]   ;;  %s11985_s1 = inlined_call_operand.hbm [shape: f32[8,128], index: 1, kind: input, shape index: {}]   ;;  %s11986_s2 = inlined_call_operand.hbm [shape: bf16[16,128], index: 2, kind: input, shape index: {}]   ;;  %s11987_s3 = inlined_call_operand.hbm [shape: f32[1,128], index: 3, kind: input, shape index: {}]   ;;  %s11988_s4 = inlined_call_operand.hbm [shape: bf16[3,128,384], index: 4, kind: input, shape index: {}]   ;;  %s11989_s5 = inlined_call_operand.vmem [shape: f32[3,1,384], index: 5, kind: input, shape index: {}]   ;;  %s11990_s6 = inlined_call_operand.hbm [shape: bf16[3,128,128], index: 6, kind: input, shape index: {}]   ;;  %s11991_s7 = inlined_call_operand.hbm [shape: f32[3,1,128], index: 7, kind: input, shape index: {}]   ;;  %s11992_s8 = inlined_call_operand.hbm [shape: f32[3,1,128], index: 8, kind: input, shape index: {}]   ;;  %s11993_s9 = inlined_call_operand.hbm [shape: f32[3,1,128], index: 9, kind: input, shape index: {}]   ;;  %s11994_s10 = inlined_call_operand.hbm [shape: bf16[3,128,256], index: 10, kind: input, shape index: {}]   ;;  %s11995_s11 = inlined_call_operand.vmem [shape: f32[3,1,256], index: 11, kind: input, shape index: {}]   ;;  %s11996_s12 = inlined_call_operand.hbm [shape: bf16[3,256,128], index: 12, kind: input, shape index: {}]   ;;  %s11997_s13 = inlined_call_operand.vmem [shape: f32[3,1,128], index: 13, kind: input, shape index: {}]   ;;  %s11998_s14 = inlined_call_operand.vmem [shape: f32[3,1,128], index: 14, kind: input, shape index: {}]   ;;  %s11999_s15 = inlined_call_operand.vmem [shape: f32[3,1,128], index: 15, kind: input, shape index: {}]   ;;  %s12000_s16 = inlined_call_operand.hbm [shape: f32[2,8,128], index: 16, kind: output, shape index: {}]  }
   0x1   :  { %12001 = sst [smem:[#allocation28_spill]] %s11984_s0 }
   0x2   :  { %21 = vsyncpa [#allocation3], 0 }
   0x3   :  { %22 = vsyncpa [#allocation6], 0 }
   0x4   :  { %23 = vsyncpa [#allocation9], 0 }
   0x5   :  { %24 = vsyncpa [#allocation12], 0 }
   0x6   :  { %25 = vsyncpa [#allocation15], 0 }
   0x7   :  { %26 = vsyncpa [#allocation18], 0 }
   0x8   :  { %27 = vsyncpa [#allocation4], 0  ;;  %s10439_s21 = smov [#allocation5]   ;;  %s10440_s23 = smov [#allocation8]  }
   0x9   :  { %s46_s22 = sshll.u32 %s10439_s21, 4  ;;  %s68_s24 = sshll.u32 %s10440_s23, 4  ;;  %s47_s22 = int_to_ptr.vmem [resolvable:$true] %s46_s22  ;;  %s69_s24 = int_to_ptr.vmem [resolvable:$true] %s68_s24 }
   0xa   :  { %s10193_s25 = scalar_lea.vmem %s47_s22, 128  ;;  %p10198_p1 = scmp.lt.s32.totalorder %s47_s22, %s47_s22 }
   0xb   :  { %p10194_p0 = scmp.ne.s32.totalorder %s47_s22, %s10193_s25  ;;  %p10199_p2 = scmp.lt.s32.totalorder %s10193_s25, %s10193_s25 }
   0xd   :  { %p10200_p3 = por %p10199_p2, %p10198_p1 }
   0xf   :  { %p10201_p4 = pnand %p10200_p3, %p10194_p0 }
  0x11   :  { %10204 = shalt.err (!%p10201_p4)
}
  0x12   :  { %49 = dma.hbm_to_vmem [thread:$0]  %s11985_s1, 128, %s47_s22, [#allocation6]  }
  0x13   :  { %s10213_s28 = scalar_lea.vmem %s69_s24, 16  ;;  %s10217_s29 = scalar_lea.vmem %s69_s24, 32 }
  0x14   :  { %p10214_p5 = scmp.ne.s32.totalorder %s69_s24, %s10213_s28  ;;  %p10218_p6 = scmp.lt.s32.totalorder %s69_s24, %s69_s24 }
  0x15   :  { %p10219_p7 = scmp.lt.s32.totalorder %s10217_s29, %s10213_s28 }
  0x17   :  { %p10220_p8 = por %p10219_p7, %p10218_p6 }
  0x19   :  { %p10221_p9 = pnand %p10220_p8, %p10214_p5 }
  0x1b   :  { %10224 = shalt.err (!%p10221_p9)
}
  0x1c   :  { %71 = dma.hbm_to_vmem [thread:$0]  %s11987_s3, 16, %s69_s24, [#allocation9]  }
  0x1d   :  { %s10441_s17 = smov [#allocation11]  }
  0x1e   :  { %s91_s18 = sshll.u32 %s10441_s17, 4  ;;  %s92_s18 = int_to_ptr.vmem [resolvable:$true] %s91_s18 }
  0x1f   :  { %s10233_s19 = scalar_lea.vmem %s92_s18, 3072  ;;  %p10238_p11 = scmp.lt.s32.totalorder %s92_s18, %s92_s18 }
  0x20   :  { %p10234_p10 = scmp.ne.s32.totalorder %s92_s18, %s10233_s19  ;;  %p10239_p12 = scmp.lt.s32.totalorder %s10233_s19, %s10233_s19 }
  0x22   :  { %p10240_p13 = por %p10239_p12, %p10238_p11 }
  0x24   :  { %p10241_p0 = pnand %p10240_p13, %p10234_p10 }
  0x26   :  { %10244 = shalt.err (!%p10241_p0)
}
  0x27   :  { %s10442_s1 = smov 64   ;;  %s10443_s20 = smov 4  }
  0x28   :  { %97 = dma.hbm_to_vmem [thread:$0]  %s11990_s6, 3072, %s92_s18, [#allocation12], %s10442_s1, %s10442_s1, %s10443_s20  }
  0x29   :  { %s10444_s3 = smov [#allocation14]  }
  0x2a   :  { %s115_s23 = sshll.u32 %s10444_s3, 4  ;;  %s116_s23 = int_to_ptr.vmem [resolvable:$true] %s115_s23 }
  0x2b   :  { %s10253_s24 = scalar_lea.vmem %s116_s23, 48  ;;  %s10257_s25 = scalar_lea.vmem %s116_s23, 64 }
  0x2c   :  { %p10254_p1 = scmp.ne.s32.totalorder %s116_s23, %s10253_s24  ;;  %p10258_p2 = scmp.lt.s32.totalorder %s116_s23, %s116_s23 }
  0x2d   :  { %p10259_p3 = scmp.lt.s32.totalorder %s10257_s25, %s10253_s24 }
  0x2f   :  { %p10260_p4 = por %p10259_p3, %p10258_p2 }
  0x31   :  { %p10261_p5 = pnand %p10260_p4, %p10254_p1 }
  0x33   :  { %10264 = shalt.err (!%p10261_p5)
}
  0x34   :  { %s10445_s26 = smov 16   ;;  %s10446_s27 = smov 1  }
  0x35   :  { %121 = dma.hbm_to_vmem [thread:$0]  %s11992_s8, 48, %s116_s23, [#allocation15], %s10445_s26, %s10445_s26, %s10446_s27  }
  0x36   :  { %s10447_s6 = smov [#allocation17]   ;;  %s10448_s0 = smov [#allocation2]  }
  0x37   :  { %s139_s30 = sshll.u32 %s10447_s6, 4  ;;  %s33_s17 = sshll.u32 %s10448_s0, 4  ;;  %s140_s30 = int_to_ptr.vmem [resolvable:$true] %s139_s30  ;;  %s34_s17 = int_to_ptr.vmem [resolvable:$true] %s33_s17 }
  0x38   :  { %s10273_s18 = scalar_lea.vmem %s140_s30, 6144  ;;  %p10278_p7 = scmp.lt.s32.totalorder %s140_s30, %s140_s30 }
  0x39   :  { %p10274_p6 = scmp.ne.s32.totalorder %s140_s30, %s10273_s18  ;;  %p10279_p8 = scmp.lt.s32.totalorder %s10273_s18, %s10273_s18 }
  0x3b   :  { %p10280_p9 = por %p10279_p8, %p10278_p7 }
  0x3d   :  { %p10281_p10 = pnand %p10280_p9, %p10274_p6 }
  0x3f   :  { %10284 = shalt.err (!%p10281_p10)
}
  0x40   :  { %s10449_s19 = smov 128   ;;  %s10450_s21 = smov 8  }
  0x41   :  { %145 = dma.hbm_to_vmem [thread:$0]  %s11994_s10, 6144, %s140_s30, [#allocation18], %s10449_s19, %s10449_s19, %s10450_s21  }
  0x42   :  { %s10293_s3 = scalar_lea.vmem %s34_s17, 256  ;;  %p10298_p12 = scmp.lt.s32.totalorder %s34_s17, %s34_s17 }
  0x43   :  { %p10294_p11 = scmp.ne.s32.totalorder %s34_s17, %s10293_s3  ;;  %p10299_p13 = scmp.lt.s32.totalorder %s10293_s3, %s10293_s3 }
  0x45   :  { %p10300_p0 = por %p10299_p13, %p10298_p12 }
  0x47   :  { %p10301_p1 = pnand %p10300_p0, %p10294_p11 }
  0x49   :  { %10304 = shalt.err (!%p10301_p1)
}
  0x4a   :  { %s12002_s25 = sld [smem:[#allocation28_spill]]  ;;  %s10451_s28 = smov [#allocation7]  }
  0x4b   :  { %s55_s29 = sshll.u32 %s10451_s28, 4  ;;  %s10452_s6 = smov [#allocation10]   ;;  %s56_s29 = int_to_ptr.vmem [resolvable:$true] %s55_s29 }
  0x4c   :  { %s77_s0 = sshll.u32 %s10452_s6, 4  ;;  %s10313_s10 = scalar_lea.vmem %s56_s29, 128  ;;  %s78_s0 = int_to_ptr.vmem [resolvable:$true] %s77_s0 }
  0x4d   :  { %p10314_p2 = scmp.ne.s32.totalorder %s56_s29, %s10313_s10  ;;  %p10318_p3 = scmp.lt.s32.totalorder %s56_s29, %s56_s29 }
  0x4e   :  { %p10319_p4 = scmp.lt.s32.totalorder %s10313_s10, %s10313_s10 }
  0x50   :  { %39 = dma.hbm_to_vmem [thread:$0]  %s12002_s25, 256, %s34_s17, [#allocation3], %s10449_s19, %s10449_s19, %s10450_s21  }
  0x51   :  { %p10320_p5 = por %p10319_p4, %p10318_p3 }
  0x53   :  { %p10321_p6 = pnand %p10320_p5, %p10314_p2 }
  0x55   :  { %10324 = shalt.err (!%p10321_p6)
}
  0x56   :  { %61 = dma.hbm_to_vmem [thread:$0]  %s11986_s2, 128, %s56_s29, [#allocation6], %s10442_s1, %s10442_s1, %s10443_s20  }
  0x57   :  { %s10333_s17 = scalar_lea.vmem %s78_s0, 9216  ;;  %p10338_p8 = scmp.lt.s32.totalorder %s78_s0, %s78_s0 }
  0x58   :  { %p10334_p7 = scmp.ne.s32.totalorder %s78_s0, %s10333_s17  ;;  %p10339_p9 = scmp.lt.s32.totalorder %s10333_s17, %s10333_s17 }
  0x5a   :  { %p10340_p10 = por %p10339_p9, %p10338_p8 }
  0x5c   :  { %p10341_p11 = pnand %p10340_p10, %p10334_p7 }
  0x5e   :  { %10344 = shalt.err (!%p10341_p11)
}
  0x5f   :  { %s10453_s22 = smov 192   ;;  %s10454_s8 = smov 12  }
  0x60   :  { %83 = dma.hbm_to_vmem [thread:$0]  %s11988_s4, 9216, %s78_s0, [#allocation9], %s10453_s22, %s10453_s22, %s10454_s8  }
  0x61   :  { %s10455_s24 = smov [#allocation13]   ;;  %s10456_s28 = smov [#allocation16]  }
  0x62   :  { %s103_s25 = sshll.u32 %s10455_s24, 4  ;;  %s127_s6 = sshll.u32 %s10456_s28, 4  ;;  %s104_s25 = int_to_ptr.vmem [resolvable:$true] %s103_s25  ;;  %s128_s6 = int_to_ptr.vmem [resolvable:$true] %s127_s6 }
  0x63   :  { %s10353_s2 = scalar_lea.vmem %s104_s25, 48  ;;  %s10357_s29 = scalar_lea.vmem %s104_s25, 64 }
  0x64   :  { %p10354_p12 = scmp.ne.s32.totalorder %s104_s25, %s10353_s2  ;;  %p10358_p13 = scmp.lt.s32.totalorder %s104_s25, %s104_s25 }
  0x65   :  { %p10359_p0 = scmp.lt.s32.totalorder %s10357_s29, %s10353_s2 }
  0x67   :  { %p10360_p1 = por %p10359_p0, %p10358_p13 }
  0x69   :  { %p10361_p2 = pnand %p10360_p1, %p10354_p12 }
  0x6b   :  { %10364 = shalt.err (!%p10361_p2)
}
  0x6c   :  { %109 = dma.hbm_to_vmem [thread:$0]  %s11991_s7, 48, %s104_s25, [#allocation12], %s10445_s26, %s10445_s26, %s10446_s27  }
  0x6d   :  { %s10373_s4 = scalar_lea.vmem %s128_s6, 48  ;;  %s10377_s0 = scalar_lea.vmem %s128_s6, 64 }
  0x6e   :  { %p10374_p3 = scmp.ne.s32.totalorder %s128_s6, %s10373_s4  ;;  %p10378_p4 = scmp.lt.s32.totalorder %s128_s6, %s128_s6 }
  0x6f   :  { %p10379_p5 = scmp.lt.s32.totalorder %s10377_s0, %s10373_s4 }
  0x71   :  { %p10380_p6 = por %p10379_p5, %p10378_p4 }
  0x73   :  { %p10381_p7 = pnand %p10380_p6, %p10374_p3 }
  0x75   :  { %10384 = shalt.err (!%p10381_p7)
}
  0x76   :  { %133 = dma.hbm_to_vmem [thread:$0]  %s11993_s9, 48, %s128_s6, [#allocation15], %s10445_s26, %s10445_s26, %s10446_s27  }
  0x77   :  { %s10457_s22 = smov [#allocation19]  }
  0x78   :  { %s153_s8 = sshll.u32 %s10457_s22, 4  ;;  %s154_s8 = int_to_ptr.vmem [resolvable:$true] %s153_s8 }
  0x79   :  { %s10393_s3 = scalar_lea.vmem %s154_s8, 6144  ;;  %p10398_p9 = scmp.lt.s32.totalorder %s154_s8, %s154_s8 }
  0x7a   :  { %p10394_p8 = scmp.ne.s32.totalorder %s154_s8, %s10393_s3  ;;  %p10399_p10 = scmp.lt.s32.totalorder %s10393_s3, %s10393_s3 }
  0x7c   :  { %p10400_p11 = por %p10399_p10, %p10398_p9 }
  0x7e   :  { %p10401_p12 = pnand %p10400_p11, %p10394_p8 }
  0x80   :  { %10404 = shalt.err (!%p10401_p12)
}
  0x81   :  { %159 = dma.hbm_to_vmem [thread:$0]  %s11996_s12, 6144, %s154_s8, [#allocation18], %s10442_s1, %s10442_s1, %s10443_s20  }
  0x82   :  { %10425 = dma.done.wait [#allocation3], 256  }
  0x83   :  { %10426 = vsyncadd [#allocation3], 4294967040 }
  0x84   :  { %10427 = dma.done.wait [#allocation6], 256  }
  0x85   :  { %10428 = vsyncadd [#allocation6], 4294967040 }
  0x86   :  { %10429 = dma.done.wait [#allocation9], 9232  }
  0x87   :  { %10430 = vsyncadd [#allocation9], 4294958064 }
  0x88   :  { %10431 = dma.done.wait [#allocation12], 3120  }
  0x89   :  { %10432 = vsyncadd [#allocation12], 4294964176 }
  0x8a   :  { %10433 = dma.done.wait [#allocation15], 96  }
  0x8b   :  { %10434 = vsyncadd [#allocation15], 4294967200 }
  0x8c   :  { %10435 = dma.done.wait [#allocation18], 12288  }
  0x8d   :  { %10436 = vsyncadd [#allocation18], 4294955008  ;;  %v10458_v0 = vmov 0.0   ;;  %vm10459_vm0 = vmmov 0   ;;  %v9824_v1 = vld [vmem:[#allocation7] sm:$0xff]   ;;  %v200_v2 = vld [vmem:[#allocation2] sm:$0xff]  ;;  %v301_v41 = vlaneseq }
  0x8e   :  { %9338 = vmatprep.subr.bf16.mxu0 %v10458_v0  ;;  %9340 = vmatprep.mubr.msk.bf16.mxu0 %vm10459_vm0, %v10458_v0  ;;  %v201_v3 = vld [vmem:[#allocation2 + $0x8] sm:$0xff]  ;;  %vm218_vm1 = vcmask 130048   ;;  %v9828_v7 = vld [vmem:[#allocation10 + $0xb0] ss:$12 sps:$4 sm:$0xff]   ;;  %v9829_v8 = vld [vmem:[#allocation10 + $0x94] ss:$12 sps:$4 sm:$0xff]  }
  0x8f   :  { %9339 = vmatpush3.bf16.msra.mxu0 %v9824_v1  ;;  %v202_v4 = vpack.c.bf16 %v201_v3, %v200_v2  ;;  %v9825_v5 = vld [vmem:[#allocation10 + $0xac] ss:$12 sps:$4 sm:$0xff]   ;;  %v9827_v6 = vld [vmem:[#allocation10 + $0xa8] ss:$12 sps:$4 sm:$0xff]   ;;  %v9831_v9 = vld [vmem:[#allocation10 + $0x90] ss:$12 sps:$4 sm:$0xff]  }
  0x90   :  { %9344 = vmatprep.subr.bf16.mxu0 %v10458_v0  ;;  %444 = vmatprep.subr.bf16.mxu1 %v9825_v5  ;;  %v9832_v10 = vld [vmem:[#allocation10 + $0x98] ss:$12 sps:$4 sm:$0xff]   ;;  %v9833_v11 = vld [vmem:[#allocation10 + $0x7c] ss:$12 sps:$4 sm:$0xff]   ;;  %v9836_v13 = vld [vmem:[#allocation10 + $0x80] ss:$12 sps:$4 sm:$0xff]  }
  0x91   :  { %445 = vmatpush1.bf16.msra.mxu1 %v9827_v6  ;;  %v9835_v12 = vld [vmem:[#allocation10 + $0x78] ss:$12 sps:$4 sm:$0xff]   ;;  %v9839_v15 = vld [vmem:[#allocation10 + $0x60] ss:$12 sps:$4 sm:$0xff]   ;;  %v9840_v16 = vld [vmem:[#allocation10 + $0x68] ss:$12 sps:$4 sm:$0xff]  }
  0x92   :  { %9341 = vmatmul.mubr.msk.bf16.vlgmr.msra.gmra.mxu0 %vm218_vm1, %v202_v4  ;;  %446 = vmatprep.subr.bf16.mxu1 %v9829_v8  ;;  %v9837_v14 = vld [vmem:[#allocation10 + $0x64] ss:$12 sps:$4 sm:$0xff]   ;;  %v9841_v17 = vld [vmem:[#allocation10 + $0x4c] ss:$12 sps:$4 sm:$0xff]   ;;  %v9843_v18 = vld [vmem:[#allocation10 + $0x48] ss:$12 sps:$4 sm:$0xff]  }
  0x93   :  { %9345 = vmatpush3.bf16.msra.mxu0 %v9828_v7  ;;  %9360 = vmatprep.mubr.msk.bf16.mxu0 %vm10459_vm0, %v10458_v0  ;;  %v9844_v19 = vld [vmem:[#allocation10 + $0x50] ss:$12 sps:$4 sm:$0xff]   ;;  %v9845_v20 = vld [vmem:[#allocation10 + $0x34] ss:$12 sps:$4 sm:$0xff]   ;;  %v9848_v22 = vld [vmem:[#allocation10 + $0x38] ss:$12 sps:$4 sm:$0xff]  }
  0x94   :  { %9346 = vmatprep.subr.bf16.mxu0 %v10458_v0  ;;  %v9847_v21 = vld [vmem:[#allocation10 + $0x30] ss:$12 sps:$4 sm:$0xff]   ;;  %v9851_v24 = vld [vmem:[#allocation10 + $0x18] ss:$12 sps:$4 sm:$0xff]   ;;  %v9852_v25 = vld [vmem:[#allocation10 + $0x20] ss:$12 sps:$4 sm:$0xff]  }
  0x95   :  { %447 = vmatpush1.bf16.msra.mxu1 %v9831_v9  ;;  %v9849_v23 = vld [vmem:[#allocation10 + $0x1c] ss:$12 sps:$4 sm:$0xff]   ;;  %v9853_v26 = vld [vmem:[#allocation10 + $0x4] ss:$12 sps:$4 sm:$0xff]   ;;  %v9855_v27 = vld [vmem:[#allocation10] ss:$12 sps:$4 sm:$0xff]  }
  0x96   :  { %448 = vmatprep.subr.bf16.mxu1 %v9833_v11  ;;  %v9856_v28 = vld [vmem:[#allocation10 + $0x8] ss:$12 sps:$4 sm:$0xff]   ;;  %v10460_v29 = vmov 0   ;;  %v8801_v30 = vld [vmem:[#allocation8] ss:$0 sm:$0xff]  ;;  %v302_v42 = vshrl.u32 %v301_v41, 7 }
  0x97   :  { %9347 = vmatpush3.bf16.msra.mxu0 %v9832_v10  ;;  %476 = vmatprep.mubr.bf16.mxu1 %v10460_v29  ;;  %v263_v34 = vld [vmem:[#allocation5] sm:$0xff]  ;;  %v299_v44 = vld [vmem:[%s11989_s5] sm:$0x7]  ;;  %s10461_s20 = smov 32   ;;  %s10462_s26 = smov 96   ;;  %vm1428_vm2 = vcmask 261120  }
  0x98   :  { %9348 = vmatprep.subr.bf16.mxu0 %v10458_v0  ;;  %v10634_v43 = vsub.s32 1, %v302_v42  ;;  %v10639_v45 = vsub.s32 0, %v302_v42  ;;  %v10641_v46 = vsub.s32 2, %v302_v42  ;;  %v10463_v1 = vmov 1983009808   ;;  %s10465_s25 = smov [#allocation20]  }
  0x99   :  { %449 = vmatpush1.bf16.msra.mxu1 %v9835_v12  ;;  %v551_v2 = vunpack.c.l.s4 %v10463_v1  ;;  %v10464_v3 = vmov 1934713408   ;;  %vm1797_vm3 = vcmask 64512   ;;  %vm1897_vm4 = vcmask 1043456   ;;  %s8784_s28 = sshll.u32 %s10465_s25, 4  ;;  %s8785_s28 = int_to_ptr.vmem [resolvable:$true] %s8784_s28 }
  0x9a   :  { %450 = vmatprep.subr.bf16.mxu1 %v9837_v14  ;;  %v308_v47 = vrot.slane %v299_v44, %v10634_v43  ;;  %v304_v52 = vrot.slane %v299_v44, %v10639_v45  ;;  %v312_v53 = vrot.slane %v299_v44, %v10641_v46  ;;  %v583_v4 = vunpack.c.l.s4 %v10464_v3  ;;  %s10405_s6 = scalar_lea.vmem %s8785_s28, 256  ;;  %p10410_p0 = scmp.lt.s32.totalorder %s8785_s28, %s8785_s28 }
  0x9b   :  { %9349 = vmatpush3.bf16.msra.mxu0 %v9836_v13  ;;  %v552_v5 = vunpack.c.0.s8 %v551_v2  ;;  %vm2561_vm5 = vcmask 523264   ;;  %vm2564_vm6 = vcmask 785408   ;;  %p10406_p13 = scmp.ne.s32.totalorder %s8785_s28, %s10405_s6  ;;  %p10411_p1 = scmp.lt.s32.totalorder %s10405_s6, %s10405_s6 }
  0x9c   :  { %9350 = vmatprep.subr.bf16.mxu0 %v10458_v0  ;;  %v584_v8 = vunpack.c.0.s8 %v583_v4 }
  0x9d   :  { %451 = vmatpush1.bf16.msra.mxu1 %v9839_v15  ;;  %v10674_v9 = vsub.s32 %v552_v5, %v302_v42  ;;  %p10412_p2 = por %p10411_p1, %p10410_p0 }
  0x9e   :  { %452 = vmatprep.subr.bf16.mxu1 %v9841_v17 }
  0x9f   :  { %9351 = vmatpush3.bf16.msra.mxu0 %v9840_v16  ;;  %v10676_v16 = vsub.s32 %v584_v8, %v302_v42  ;;  %p10413_p3 = pnand %p10412_p2, %p10406_p13 }
  0xa0   :  { %9352 = vmatprep.subr.bf16.mxu0 %v10458_v0 }
  0xa1   :  { %453 = vmatpush1.bf16.msra.mxu1 %v9843_v18 }
  0xa2   :  { %454 = vmatprep.subr.bf16.mxu1 %v9845_v20 }
  0xa3   :  { %9353 = vmatpush3.bf16.msra.mxu0 %v9844_v19 }
  0xa4   :  { %9354 = vmatprep.subr.bf16.mxu0 %v10458_v0 }
  0xa5   :  { %455 = vmatpush1.bf16.msra.mxu1 %v9847_v21 }
  0xa6   :  { %456 = vmatprep.subr.bf16.mxu1 %v9849_v23 }
  0xa7   :  { %9355 = vmatpush3.bf16.msra.mxu0 %v9848_v22 }
  0xa8   :  { %9356 = vmatprep.subr.bf16.mxu0 %v10458_v0 }
  0xa9   :  { %457 = vmatpush1.bf16.msra.mxu1 %v9851_v24 }
  0xaa   :  { %458 = vmatprep.subr.bf16.mxu1 %v9853_v26 }
  0xab   :  { %9357 = vmatpush3.bf16.msra.mxu0 %v9852_v25 }
  0xac   :  { %9358 = vmatprep.subr.bf16.mxu0 %v10458_v0 }
  0xad   :  { %459 = vmatpush1.bf16.msra.mxu1 %v9855_v27 }
  0xae   :  { %9388 = vmatprep.subr.bf16.mxu1 %v10458_v0 }
  0xaf   :  { %9359 = vmatpush3.bf16.msra.mxu0 %v9856_v28 }
  0xb0   :  { %9364 = vmatprep.subr.bf16.mxu0 %v10458_v0 }
 0x152   :  { %v256_v31 = vpop.f32.mrf.mxu0 }
 0x153   :  { %v257_v33 = vadd.f32 %v8801_v30, %v256_v31 }
 0x154   :  { %v9342_v32 = vpop.f32.mrf.mxu0 }
 0x155   :  { %v10624_v38 = vadd.f32 %v263_v34, %v257_v33 }
 0x156   :  { %v259_v35 = vpop.f32.mrf.mxu0 }
 0x157   :  { %v260_v36 = vadd.f32 %v8801_v30, %v259_v35 }
 0x158   :  { %v9343_v37 = vpop.f32.mrf.mxu0 }
 0x159   :  { %v10626_v39 = vadd.f32 %v263_v34, %v260_v36 }
 0x15b   :  { %v266_v40 = vpack.c.bf16 %v10626_v39, %v10624_v38 }
 0x15d   :  { %477 = vmatmul.mubr.bf16.vlgmr.msra.gmra.mxu1 %v266_v40  ;;  %9361 = vmatmul.mubr.bf16.vlgmr.msra.gmra.mxu0 %v266_v40 }
 0x15e   :  { %9366 = vmatprep.mubr.msk.bf16.mxu0 %vm10459_vm0, %v10458_v0  ;;  %9390 = vmatprep.mubr.msk.bf16.mxu1 %vm10459_vm0, %v10458_v0 }
 0x21d   :  { %v478_v48 = vpop.f32.mrf.mxu1  ;;  %v521_v49 = vpop.f32.mrf.mxu0 }
 0x21e   :  { %v479_v58 = vadd.f32 %v478_v48, %v304_v52  ;;  %v10670_v63 = vadd.f32 %v521_v49, %v312_v53 }
 0x21f   :  { %v480_v50 = vpop.f32.mrf.mxu1  ;;  %v9362_v51 = vpop.f32.mrf.mxu0 }
 0x220   :  { %v481_v54 = vadd.f32 %v480_v50, %v308_v47 }
 0x221   :  { %v524_v55 = vpop.f32.mrf.mxu0  ;;  %v482_v59 = vpop.f32.mrf.mxu1 }
 0x222   :  { %v10646_v56 = vadd.f32 %v524_v55, %v312_v53  ;;  %842 = vrot.lane.b32.xlu1 %v481_v54, %s10461_s20  ;;  %830 = vrot.lane.b32.xlu0 %v481_v54, %s10462_s26  ;;  %v10660_v62 = vadd.f32 %v482_v59, %v304_v52 }
 0x223   :  { %v9363_v57 = vpop.f32.mrf.mxu0  ;;  %v484_v60 = vpop.f32.mrf.mxu1 }
 0x224   :  { %v10654_v61 = vadd.f32 %v484_v60, %v308_v47 }
 0x226   :  { %836 = vrot.lane.b32.xlu0 %v481_v54, %s10442_s1  ;;  %530 = vrot.lane.b32.xlu1 %v479_v58, %s10462_s26 }
 0x22a   :  { %536 = vrot.lane.b32.xlu0 %v479_v58, %s10442_s1  ;;  %542 = vrot.lane.b32.xlu1 %v479_v58, %s10461_s20 }
 0x22e   :  { %832 = vrot.lane.b32.xlu0 %v10654_v61, %s10462_s26  ;;  %838 = vrot.lane.b32.xlu1 %v10654_v61, %s10442_s1 }
 0x232   :  { %844 = vrot.lane.b32.xlu0 %v10654_v61, %s10461_s20  ;;  %532 = vrot.lane.b32.xlu1 %v10660_v62, %s10462_s26 }
 0x236   :  { %538 = vrot.lane.b32.xlu0 %v10660_v62, %s10442_s1  ;;  %544 = vrot.lane.b32.xlu1 %v10660_v62, %s10461_s20 }
 0x23a   :  { %1130 = vrot.lane.b32.xlu1 %v10670_v63, %s10462_s26 }
 0x294   :  { %v843_v6 = vpop.permute.xlu1 %842  ;;  %v831_v7 = vpop.permute.xlu0 %830 }
 0x295   :  { %v864_v10 = vcombine.low %v831_v7, %v843_v6  ;;  %v865_v11 = vcombine.high %v831_v7, %v843_v6 }
 0x297   :  { %v872_v17 = vrot.slane %v864_v10, %v10674_v9  ;;  %v879_v18 = vrot.slane %v865_v11, %v10674_v9 }
 0x298   :  { %v837_v12 = vpop.permute.xlu0 %836  ;;  %v531_v13 = vpop.permute.xlu1 %530 }
 0x299   :  { %v848_v14 = vcombine.low %v481_v54, %v837_v12  ;;  %v849_v15 = vcombine.high %v481_v54, %v837_v12 }
 0x29b   :  { %v856_v19 = vrot.slane %v848_v14, %v10674_v9  ;;  %v863_v20 = vrot.slane %v849_v15, %v10674_v9 }
 0x29c   :  { %v537_v21 = vpop.permute.xlu0 %536  ;;  %v543_v22 = vpop.permute.xlu1 %542 }
 0x29d   :  { %v880_v23 = vcombine.low %v856_v19, %v872_v17  ;;  %v881_v24 = vcombine.high %v856_v19, %v872_v17  ;;  %v896_v25 = vcombine.low %v863_v20, %v879_v18  ;;  %v897_v26 = vcombine.high %v863_v20, %v879_v18 }
 0x29e   :  { %v548_v27 = vcombine.low %v479_v58, %v537_v21  ;;  %v549_v28 = vcombine.high %v479_v58, %v537_v21  ;;  %v564_v30 = vcombine.low %v531_v13, %v543_v22  ;;  %v565_v31 = vcombine.high %v531_v13, %v543_v22 }
 0x29f   :  { %v888_v32 = vrot.slane %v880_v23, %v10676_v16  ;;  %v895_v33 = vrot.slane %v881_v24, %v10676_v16  ;;  %v904_v42 = vrot.slane %v896_v25, %v10676_v16  ;;  %v911_v44 = vrot.slane %v897_v26, %v10676_v16 }
 0x2a0   :  { %v556_v34 = vrot.slane %v548_v27, %v10674_v9  ;;  %v563_v35 = vrot.slane %v549_v28, %v10674_v9  ;;  %v572_v36 = vrot.slane %v564_v30, %v10674_v9  ;;  %v579_v37 = vrot.slane %v565_v31, %v10674_v9  ;;  %v833_v40 = vpop.permute.xlu0 %832  ;;  %v839_v41 = vpop.permute.xlu1 %838 }
 0x2a1   :  { %v984_v51 = vcombine.low %v888_v32, %v895_v33  ;;  %v8832_v52 = vcombine.high %v888_v32, %v895_v33  ;;  %v916_v53 = vcombine.low %v10654_v61, %v839_v41  ;;  %v917_v54 = vcombine.high %v10654_v61, %v839_v41 }
 0x2a2   :  { %v580_v47 = vcombine.low %v556_v34, %v572_v36  ;;  %v581_v48 = vcombine.high %v556_v34, %v572_v36  ;;  %v596_v49 = vcombine.low %v563_v35, %v579_v37  ;;  %v597_v50 = vcombine.high %v563_v35, %v579_v37 }
 0x2a3   :  { %v1000_v2 = vcombine.low %v904_v42, %v911_v44  ;;  %v8833_v3 = vcombine.high %v904_v42, %v911_v44  ;;  %v924_v61 = vrot.slane %v916_v53, %v10674_v9  ;;  %v931_v11 = vrot.slane %v917_v54, %v10674_v9 }
 0x2a4   :  { %v588_v55 = vrot.slane %v580_v47, %v10676_v16  ;;  %v595_v57 = vrot.slane %v581_v48, %v10676_v16  ;;  %v604_v58 = vrot.slane %v596_v49, %v10676_v16  ;;  %v611_v59 = vrot.slane %v597_v50, %v10676_v16  ;;  %v845_v60 = vpop.permute.xlu0 %844  ;;  %v533_v1 = vpop.permute.xlu1 %532 }
 0x2a5   :  { %v932_v4 = vcombine.low %v833_v40, %v845_v60  ;;  %v933_v5 = vcombine.high %v833_v40, %v845_v60  ;;  %v10713_v25 = vrot.slane %v984_v51, %v10674_v9  ;;  %v10716_v26 = vrot.slane %v8832_v52, %v10674_v9 }
 0x2a6   :  { %v684_v6 = vcombine.low %v588_v55, %v595_v57  ;;  %v8828_v7 = vcombine.high %v588_v55, %v595_v57  ;;  %v700_v8 = vcombine.low %v604_v58, %v611_v59  ;;  %v8829_v10 = vcombine.high %v604_v58, %v611_v59 }
 0x2a7   :  { %v940_v12 = vrot.slane %v932_v4, %v10674_v9  ;;  %v947_v13 = vrot.slane %v933_v5, %v10674_v9  ;;  %v10719_v27 = vrot.slane %v1000_v2, %v10674_v9  ;;  %v10722_v28 = vrot.slane %v8833_v3, %v10674_v9 }
 0x2a8   :  { %v10701_v14 = vrot.slane %v684_v6, %v10674_v9  ;;  %v10704_v15 = vrot.slane %v8828_v7, %v10674_v9  ;;  %v10707_v17 = vrot.slane %v700_v8, %v10674_v9  ;;  %v10710_v18 = vrot.slane %v8829_v10, %v10674_v9  ;;  %v539_v23 = vpop.permute.xlu0 %538  ;;  %v545_v24 = vpop.permute.xlu1 %544 }
 0x2a9   :  { %v948_v19 = vcombine.low %v924_v61, %v940_v12  ;;  %v949_v20 = vcombine.high %v924_v61, %v940_v12  ;;  %v964_v21 = vcombine.low %v931_v11, %v947_v13  ;;  %v965_v22 = vcombine.high %v931_v11, %v947_v13 }
 0x2aa   :  { %v616_v34 = vcombine.low %v10660_v62, %v539_v23  ;;  %v617_v35 = vcombine.high %v10660_v62, %v539_v23  ;;  %v632_v36 = vcombine.low %v533_v1, %v545_v24  ;;  %v633_v37 = vcombine.high %v533_v1, %v545_v24 }
 0x2ab   :  { %v956_v30 = vrot.slane %v948_v19, %v10676_v16  ;;  %v963_v31 = vrot.slane %v949_v20, %v10676_v16  ;;  %v972_v32 = vrot.slane %v964_v21, %v10676_v16  ;;  %v979_v33 = vrot.slane %v965_v22, %v10676_v16 }
 0x2ac   :  { %v716_v40 = vcombine.low %v10701_v14, %v10704_v15  ;;  %v732_v41 = vcombine.low %v10707_v17, %v10710_v18  ;;  %v624_v44 = vrot.slane %v616_v34, %v10674_v9  ;;  %v631_v47 = vrot.slane %v617_v35, %v10674_v9 }
 0x2ad   :  { %v1052_v42 = vcombine.low %v956_v30, %v963_v31  ;;  %v640_v48 = vrot.slane %v632_v36, %v10674_v9  ;;  %v647_v49 = vrot.slane %v633_v37, %v10674_v9  ;;  %v8834_v50 = vcombine.high %v956_v30, %v963_v31 }
 0x2ae   :  { %v1068_v62 = vcombine.low %v972_v32, %v979_v33  ;;  %v1016_v51 = vcombine.low %v10713_v25, %v10716_v26  ;;  %v1032_v52 = vcombine.low %v10719_v27, %v10722_v28  ;;  %v8835_v58 = vcombine.high %v972_v32, %v979_v33 }
 0x2af   :  { %v648_v53 = vcombine.low %v624_v44, %v640_v48  ;;  %v649_v54 = vcombine.high %v624_v44, %v640_v48  ;;  %v664_v55 = vcombine.low %v631_v47, %v647_v49  ;;  %v665_v57 = vcombine.high %v631_v47, %v647_v49 }
 0x2b0   :  { %v1024_v59 = vrot.slane %v1016_v51, %v10676_v16  ;;  %v1040_v60 = vrot.slane %v1032_v52, %v10676_v16  ;;  %v724_v1 = vrot.slane %v716_v40, %v10676_v16  ;;  %v740_v7 = vrot.slane %v732_v41, %v10676_v16 }
 0x2b1   :  { %v656_v2 = vrot.slane %v648_v53, %v10676_v16  ;;  %v663_v3 = vrot.slane %v649_v54, %v10676_v16  ;;  %v672_v4 = vrot.slane %v664_v55, %v10676_v16  ;;  %v679_v5 = vrot.slane %v665_v57, %v10676_v16 }
 0x2b2   :  { %v1048_v6 = vcombine.low %v1024_v59, %v1040_v60  ;;  %v1059_v8 = vrot.slane %v1052_v42, %v10674_v9  ;;  %v1067_v10 = vrot.slane %v8834_v50, %v10674_v9  ;;  %v1075_v20 = vrot.slane %v1068_v62, %v10674_v9 }
 0x2b3   :  { %v752_v61 = vcombine.low %v656_v2, %v663_v3  ;;  %v8830_v11 = vcombine.high %v656_v2, %v663_v3  ;;  %v768_v12 = vcombine.low %v672_v4, %v679_v5  ;;  %v8831_v13 = vcombine.high %v672_v4, %v679_v5 }
 0x2b4   :  { %v1120_v19 = vpack.c.bf16 %v1048_v6, %v1048_v6  ;;  %v1083_v21 = vrot.slane %v8835_v58, %v10674_v9  ;;  %v1049_v32 = vcombine.high %v1024_v59, %v1040_v60  ;;  %v1084_v33 = vcombine.low %v1059_v8, %v1067_v10 }
 0x2b5   :  { %v759_v22 = vrot.slane %v752_v61, %v10674_v9  ;;  %v767_v23 = vrot.slane %v8830_v11, %v10674_v9  ;;  %v775_v24 = vrot.slane %v768_v12, %v10674_v9  ;;  %v783_v30 = vrot.slane %v8831_v13, %v10674_v9 }
 0x2b6   :  { %v1433_v31 = vsel %vm1428_vm2, %v1120_v19, 0  ;;  %v1100_v34 = vcombine.low %v1075_v20, %v1083_v21  ;;  %v748_v36 = vcombine.low %v724_v1, %v740_v7  ;;  %v1092_v40 = vrot.slane %v1084_v33, %v10676_v16 }
 0x2b7   :  { %v784_v35 = vcombine.low %v759_v22, %v767_v23  ;;  %9365 = vmatpush3.bf16.xpose.msra.mxu0 %v1433_v31  ;;  %v800_v37 = vcombine.low %v775_v24, %v783_v30  ;;  %v1017_v42 = vcombine.high %v10713_v25, %v10716_v26  ;;  %v1033_v44 = vcombine.high %v10719_v27, %v10722_v28 }
 0x2b8   :  { %9370 = vmatprep.subr.bf16.mxu0 %v10458_v0  ;;  %v1108_v41 = vrot.slane %v1100_v34, %v10676_v16  ;;  %v1085_v47 = vcombine.high %v1059_v8, %v1067_v10  ;;  %v1121_v48 = vpack.c.bf16 %v1049_v32, %v1049_v32  ;;  %v1101_v62 = vcombine.high %v1075_v20, %v1083_v21 }
 0x2b9   :  { %v1031_v50 = vrot.slane %v1017_v42, %v10676_v16  ;;  %v820_v51 = vpack.c.bf16 %v748_v36, %v748_v36  ;;  %v1047_v52 = vrot.slane %v1033_v44, %v10676_v16  ;;  %v792_v55 = vrot.slane %v784_v35, %v10676_v16 }
 0x2ba   :  { %v1116_v49 = vcombine.low %v1092_v40, %v1108_v41  ;;  %v1099_v53 = vrot.slane %v1085_v47, %v10676_v16  ;;  %v808_v57 = vrot.slane %v800_v37, %v10676_v16  ;;  %v1115_v25 = vrot.slane %v1101_v62, %v10676_v16 }
 0x2bb   :  { %v1479_v26 = vsel %vm1428_vm2, %v1121_v48, 0  ;;  %v1050_v28 = vcombine.low %v1031_v50, %v1047_v52  ;;  %v717_v59 = vcombine.high %v10701_v14, %v10704_v15  ;;  %v733_v60 = vcombine.high %v10707_v17, %v10710_v18 }
 0x2bc   :  { %v1124_v54 = vpack.c.bf16 %v1116_v49, %v1116_v49  ;;  %v1118_v58 = vcombine.low %v1099_v53, %v1115_v25  ;;  %v749_v2 = vcombine.high %v724_v1, %v740_v7  ;;  %v785_v3 = vcombine.high %v759_v22, %v767_v23 }
 0x2bd   :  { %v801_v4 = vcombine.high %v775_v24, %v783_v30  ;;  %v816_v5 = vcombine.low %v792_v55, %v808_v57  ;;  %v1122_v6 = vpack.c.bf16 %v1050_v28, %v1050_v28  ;;  %v731_v14 = vrot.slane %v717_v59, %v10676_v16 }
 0x2be   :  { %9367 = vmatmul.mubr.msk.bf16.vlgmr.msra.gmra.mxu0 %vm1428_vm2, %v820_v51  ;;  %v1617_v27 = vsel %vm1428_vm2, %v1124_v54, 0  ;;  %v1126_v8 = vpack.c.bf16 %v1118_v58, %v1118_v58  ;;  %v821_v10 = vpack.c.bf16 %v749_v2, %v749_v2  ;;  %v747_v17 = vrot.slane %v733_v60, %v10676_v16 }
 0x2bf   :  { %9371 = vmatpush3.bf16.xpose.msra.mxu0 %v1479_v26  ;;  %9389 = vmatpush3.bf16.xpose.msra.mxu1 %v1617_v27  ;;  %v824_v15 = vpack.c.bf16 %v816_v5, %v816_v5  ;;  %v799_v18 = vrot.slane %v785_v3, %v10676_v16  ;;  %v815_v1 = vrot.slane %v801_v4, %v10676_v16  ;;  %v1525_v7 = vsel %vm1428_vm2, %v1122_v6, 0 }
 0x2c0   :  { %9372 = vmatprep.mubr.msk.bf16.mxu0 %vm10459_vm0, %v10458_v0  ;;  %9376 = vmatprep.subr.bf16.mxu0 %v10458_v0  ;;  %v1709_v61 = vsel %vm1428_vm2, %v1126_v8, 0  ;;  %v1051_v11 = vcombine.high %v1031_v50, %v1047_v52  ;;  %v750_v12 = vcombine.low %v731_v14, %v747_v17  ;;  %v1117_v23 = vcombine.high %v1092_v40, %v1108_v41 }
 0x2c1   :  { %9400 = vmatprep.subr.bf16.mxu1 %v10458_v0  ;;  %v818_v13 = vcombine.low %v799_v18, %v815_v1  ;;  %v751_v24 = vcombine.high %v731_v14, %v747_v17  ;;  %v1119_v33 = vcombine.high %v1099_v53, %v1115_v25  ;;  %v817_v34 = vcombine.high %v792_v55, %v808_v57 }
 0x2c2   :  { %v1123_v19 = vpack.c.bf16 %v1051_v11, %v1051_v11  ;;  %v822_v20 = vpack.c.bf16 %v750_v12, %v750_v12  ;;  %v1125_v30 = vpack.c.bf16 %v1117_v23, %v1117_v23  ;;  %v819_v40 = vcombine.high %v799_v18, %v815_v1 }
 0x2c3   :  { %v826_v21 = vpack.c.bf16 %v818_v13, %v818_v13  ;;  %v823_v31 = vpack.c.bf16 %v751_v24, %v751_v24  ;;  %v1127_v35 = vpack.c.bf16 %v1119_v33, %v1119_v33  ;;  %v825_v36 = vpack.c.bf16 %v817_v34, %v817_v34 }
 0x2c4   :  { %v1571_v22 = vsel %vm1428_vm2, %v1123_v19, 0  ;;  %v1663_v32 = vsel %vm1428_vm2, %v1125_v30, 0  ;;  %v827_v41 = vpack.c.bf16 %v819_v40, %v819_v40  ;;  %v1131_v30 = vpop.permute.xlu1 %1130 }
 0x2c5   :  { %v1755_v37 = vsel %vm1428_vm2, %v1127_v35, 0 }
 0x2c6   :  { %9373 = vmatmul.mubr.msk.bf16.vlgmr.msra.gmra.mxu0 %vm1428_vm2, %v821_v10  ;;  %9391 = vmatmul.mubr.msk.bf16.vlgmr.msra.gmra.mxu1 %vm1428_vm2, %v824_v15 }
 0x2c7   :  { %9377 = vmatpush3.bf16.xpose.msra.mxu0 %v1525_v7  ;;  %9401 = vmatpush3.bf16.xpose.msra.mxu1 %v1709_v61 }
 0x2c8   :  { %9378 = vmatprep.mubr.msk.bf16.mxu0 %vm10459_vm0, %v10458_v0  ;;  %9382 = vmatprep.subr.bf16.mxu0 %v10458_v0 }
 0x2c9   :  { %9402 = vmatprep.mubr.msk.bf16.mxu1 %vm10459_vm0, %v10458_v0  ;;  %9412 = vmatprep.subr.bf16.mxu1 %v10458_v0 }
 0x2ce   :  { %9379 = vmatmul.mubr.msk.bf16.vlgmr.msra.gmra.mxu0 %vm1428_vm2, %v822_v20  ;;  %9403 = vmatmul.mubr.msk.bf16.vlgmr.msra.gmra.mxu1 %vm1428_vm2, %v826_v21 }
 0x2cf   :  { %9383 = vmatpush3.bf16.xpose.msra.mxu0 %v1571_v22  ;;  %9384 = vmatprep.mubr.msk.bf16.mxu0 %vm10459_vm0, %v10458_v0 }
 0x2d0   :  { %9394 = vmatprep.subr.bf16.mxu0 %v10458_v0  ;;  %9414 = vmatprep.mubr.msk.bf16.mxu1 %vm10459_vm0, %v10458_v0 }
 0x2d6   :  { %9385 = vmatmul.mubr.msk.bf16.vlgmr.msra.gmra.mxu0 %vm1428_vm2, %v823_v31 }
 0x2d7   :  { %9395 = vmatpush3.bf16.xpose.msra.mxu0 %v1663_v32  ;;  %9396 = vmatprep.mubr.msk.bf16.mxu0 %vm10459_vm0, %v10458_v0 }
 0x2d8   :  { %9406 = vmatprep.subr.bf16.mxu0 %v10458_v0 }
 0x2de   :  { %9397 = vmatmul.mubr.msk.bf16.vlgmr.msra.gmra.mxu0 %vm1428_vm2, %v825_v36 }
 0x2df   :  { %9407 = vmatpush3.bf16.xpose.msra.mxu0 %v1755_v37  ;;  %9408 = vmatprep.mubr.msk.bf16.mxu0 %vm10459_vm0, %v10458_v0 }
 0x2e0   :  { %9418 = vmatprep.subr.bf16.mxu0 %v10458_v0 }
 0x2e6   :  { %9409 = vmatmul.mubr.msk.bf16.vlgmr.msra.gmra.mxu0 %vm1428_vm2, %v827_v41 }
 0x2e7   :  { %9420 = vmatprep.mubr.msk.bf16.mxu0 %vm10459_vm0, %v10458_v0 }
 0x37e   :  { %v1469_v42 = vpop.f32.mrf.mxu0 }
 0x37f   :  { %v1798_v44 = vsel %vm1797_vm3, %v1469_v42, -inf }
 0x380   :  { %1799 = vmax.xlane.f32.xlu0 %v1798_v44  ;;  %v9368_v47 = vpop.f32.mrf.mxu0 }
 0x382   :  { %v1472_v48 = vpop.f32.mrf.mxu0 }
 0x384   :  { %v9369_v49 = vpop.f32.mrf.mxu0 }
 0x386   :  { %v1515_v50 = vpop.f32.mrf.mxu0  ;;  %v1653_v62 = vpop.f32.mrf.mxu1 }
 0x387   :  { %v1810_v51 = vsel %vm1797_vm3, %v1653_v62, -inf  ;;  %v1801_v57 = vsel %vm1797_vm3, %v1515_v50, -inf }
 0x388   :  { %v9374_v52 = vpop.f32.mrf.mxu0  ;;  %v9392_v53 = vpop.f32.mrf.mxu1  ;;  %1811 = vmax.xlane.f32.xlu1 %v1810_v51 }
 0x38a   :  { %v1518_v54 = vpop.f32.mrf.mxu0  ;;  %v1656_v55 = vpop.f32.mrf.mxu1 }
 0x38c   :  { %v9375_v25 = vpop.f32.mrf.mxu0  ;;  %v9393_v26 = vpop.f32.mrf.mxu1  ;;  %1802 = vmax.xlane.f32.xlu1 %v1801_v57 }
 0x38e   :  { %v1561_v27 = vpop.f32.mrf.mxu0  ;;  %v10821_v28 = vpop.f32.mrf.mxu1 }
 0x38f   :  { %v1804_v58 = vsel %vm1797_vm3, %v1561_v27, -inf  ;;  %v1816_v59 = vsel %vm1797_vm3, %v10821_v28, -inf }
 0x390   :  { %1805 = vmax.xlane.f32.xlu0 %v1804_v58  ;;  %v9380_v60 = vpop.f32.mrf.mxu0  ;;  %v9404_v2 = vpop.f32.mrf.mxu1  ;;  %1817 = vmax.xlane.f32.xlu1 %v1816_v59 }
 0x392   :  { %v1564_v3 = vpop.f32.mrf.mxu0  ;;  %v1748_v4 = vpop.f32.mrf.mxu1 }
 0x394   :  { %v9381_v5 = vpop.f32.mrf.mxu0  ;;  %v9405_v6 = vpop.f32.mrf.mxu1 }
 0x396   :  { %v1607_v8 = vpop.f32.mrf.mxu0 }
 0x397   :  { %v1807_v10 = vsel %vm1797_vm3, %v1607_v8, -inf }
 0x398   :  { %1808 = vmax.xlane.f32.xlu0 %v1807_v10  ;;  %v9386_v14 = vpop.f32.mrf.mxu0 }
 0x39a   :  { %v1610_v15 = vpop.f32.mrf.mxu0 }
 0x39c   :  { %v9387_v17 = vpop.f32.mrf.mxu0 }
 0x39e   :  { %v10827_v18 = vpop.f32.mrf.mxu0 }
 0x39f   :  { %v1813_v1 = vsel %vm1797_vm3, %v10827_v18, -inf }
 0x3a0   :  { %1814 = vmax.xlane.f32.xlu0 %v1813_v1  ;;  %v9398_v7 = vpop.f32.mrf.mxu0 }
 0x3a1   :  { %1142 = vrot.lane.b32.xlu1 %v10670_v63, %s10461_s20 }
 0x3a2   :  { %v1702_v61 = vpop.f32.mrf.mxu0 }
 0x3a4   :  { %v9399_v11 = vpop.f32.mrf.mxu0 }
 0x3a6   :  { %v10833_v12 = vpop.f32.mrf.mxu0 }
 0x3a7   :  { %v1819_v13 = vsel %vm1797_vm3, %v10833_v12, -inf }
 0x3a8   :  { %1820 = vmax.xlane.f32.xlu0 %v1819_v13  ;;  %v9410_v19 = vpop.f32.mrf.mxu0 }
 0x3aa   :  { %v1794_v20 = vpop.f32.mrf.mxu0 }
 0x3ac   :  { %v9411_v21 = vpop.f32.mrf.mxu0 }
 0x3be   :  { %1136 = vrot.lane.b32.xlu0 %v10670_v63, %s10442_s1 }
 0x409   :  { %v1800_v22 = vpop.xlane.xlu0 %1799 }
 0x40a   :  { %v1822_v23 = vsub.f32 %v1469_v42, %v1800_v22 }
 0x40c   :  { %v1830_v24 = vmul.f32 1.442695, %v1822_v23 }
 0x40e   :  { %10065 = vpow2.f32 %v1830_v24 }
 0x411   :  { %v1812_v31 = vpop.xlane.xlu1 %1811 }
 0x412   :  { %v1826_v32 = vsub.f32 %v1653_v62, %v1812_v31 }
 0x414   :  { %v1838_v33 = vmul.f32 1.442695, %v1826_v32 }
 0x415   :  { %v1803_v34 = vpop.xlane.xlu1 %1802 }
 0x416   :  { %10067 = vpow2.f32 %v1838_v33  ;;  %v1823_v35 = vsub.f32 %v1515_v50, %v1803_v34 }
 0x418   :  { %v1832_v36 = vmul.f32 1.442695, %v1823_v35 }
 0x419   :  { %v1806_v37 = vpop.xlane.xlu0 %1805  ;;  %v1818_v54 = vpop.xlane.xlu1 %1817 }
 0x41a   :  { %10069 = vpow2.f32 %v1832_v36  ;;  %v1824_v40 = vsub.f32 %v1561_v27, %v1806_v37 }
 0x41b   :  { %v10839_v41 = vpop.eup %10065 }
 0x41c   :  { %v1834_v44 = vmul.f32 1.442695, %v1824_v40  ;;  %v1846_v47 = vsel %vm1797_vm3, %v10839_v41, 0.0 }
 0x41d   :  { %1847 = vadd.xlane.f32.xlu1 %v1846_v47  ;;  %v1143_v25 = vpop.permute.xlu1 %1142 }
 0x41e   :  { %10071 = vpow2.f32 %v1834_v44  ;;  %v1164_v58 = vcombine.low %v1131_v30, %v1143_v25  ;;  %v1165_v59 = vcombine.high %v1131_v30, %v1143_v25 }
 0x420   :  { %v1172_v5 = vrot.slane %v1164_v58, %v10674_v9  ;;  %v1179_v6 = vrot.slane %v1165_v59, %v10674_v9  ;;  %v1828_v59 = vsub.f32 %v10821_v28, %v1818_v54 }
 0x421   :  { %v1809_v42 = vpop.xlane.xlu0 %1808 }
 0x422   :  { %v1825_v48 = vsub.f32 %v1607_v8, %v1809_v42 }
 0x423   :  { %v10843_v49 = vpop.eup %10067 }
 0x424   :  { %v1836_v62 = vmul.f32 1.442695, %v1825_v48  ;;  %v1858_v50 = vsel %vm1797_vm3, %v10843_v49, 0.0 }
 0x425   :  { %1859 = vadd.xlane.f32.xlu0 %v1858_v50 }
 0x426   :  { %10073 = vpow2.f32 %v1836_v62 }
 0x427   :  { %v10847_v51 = vpop.eup %10069 }
 0x428   :  { %v1849_v52 = vsel %vm1797_vm3, %v10847_v51, 0.0 }
 0x429   :  { %1850 = vadd.xlane.f32.xlu0 %v1849_v52  ;;  %v1815_v57 = vpop.xlane.xlu0 %1814 }
 0x42a   :  { %v1827_v52 = vsub.f32 %v10827_v18, %v1815_v57 }
 0x42b   :  { %v10851_v53 = vpop.eup %10071 }
 0x42c   :  { %v1852_v55 = vsel %vm1797_vm3, %v10851_v53, 0.0  ;;  %v1840_v58 = vmul.f32 1.442695, %v1827_v52 }
 0x42d   :  { %1853 = vadd.xlane.f32.xlu1 %v1852_v55 }
 0x42e   :  { %10075 = vpow2.f32 %v1840_v58 }
 0x431   :  { %v10855_v26 = vpop.xlane.xlu0 %1820 }
 0x432   :  { %v1829_v28 = vsub.f32 %v10833_v12, %v10855_v26 }
 0x433   :  { %v10857_v27 = vpop.eup %10073 }
 0x434   :  { %v1855_v60 = vsel %vm1797_vm3, %v10857_v27, 0.0  ;;  %v1844_v54 = vmul.f32 1.442695, %v1829_v28 }
 0x435   :  { %1856 = vadd.xlane.f32.xlu0 %v1855_v60  ;;  %v1137_v2 = vpop.permute.xlu0 %1136  ;;  %v1842_v60 = vmul.f32 1.442695, %v1828_v59 }
 0x436   :  { %v1148_v3 = vcombine.low %v10670_v63, %v1137_v2  ;;  %v1149_v4 = vcombine.high %v10670_v63, %v1137_v2 }
 0x437   :  { %10077 = vpow2.f32 %v1842_v60 }
 0x438   :  { %v1156_v8 = vrot.slane %v1148_v3, %v10674_v9  ;;  %v1163_v10 = vrot.slane %v1149_v4, %v10674_v9  ;;  %10079 = vpow2.f32 %v1844_v54 }
 0x43a   :  { %v1180_v14 = vcombine.low %v1156_v8, %v1172_v5  ;;  %v1181_v15 = vcombine.high %v1156_v8, %v1172_v5  ;;  %v1196_v17 = vcombine.low %v1163_v10, %v1179_v6  ;;  %v1197_v1 = vcombine.high %v1163_v10, %v1179_v6 }
 0x43b   :  { %v10889_v18 = vpop.eup %10075 }
 0x43c   :  { %v1188_v7 = vrot.slane %v1180_v14, %v10676_v16  ;;  %v1195_v61 = vrot.slane %v1181_v15, %v10676_v16  ;;  %v1204_v11 = vrot.slane %v1196_v17, %v10676_v16  ;;  %v1211_v63 = vrot.slane %v1197_v1, %v10676_v16 }
 0x43d   :  { %v1861_v57 = vsel %vm1797_vm3, %v10889_v18, 0.0 }
 0x43e   :  { %v1284_v13 = vcombine.low %v1188_v7, %v1195_v61  ;;  %v8836_v19 = vcombine.high %v1188_v7, %v1195_v61  ;;  %v1300_v20 = vcombine.low %v1204_v11, %v1211_v63  ;;  %v8837_v21 = vcombine.high %v1204_v11, %v1211_v63  ;;  %1138 = vrot.lane.b32.xlu1 %v10646_v56, %s10442_s1 }
 0x440   :  { %v1291_v22 = vrot.slane %v1284_v13, %v10674_v9  ;;  %v1299_v23 = vrot.slane %v8836_v19, %v10674_v9  ;;  %v1307_v24 = vrot.slane %v1300_v20, %v10674_v9  ;;  %v1315_v30 = vrot.slane %v8837_v21, %v10674_v9 }
 0x442   :  { %v1316_v31 = vcombine.low %v1291_v22, %v1299_v23  ;;  %v1332_v32 = vcombine.low %v1307_v24, %v1315_v30  ;;  %v1317_v33 = vcombine.high %v1291_v22, %v1299_v23  ;;  %v1333_v34 = vcombine.high %v1307_v24, %v1315_v30 }
 0x444   :  { %v1324_v35 = vrot.slane %v1316_v31, %v10676_v16  ;;  %v1340_v36 = vrot.slane %v1332_v32, %v10676_v16  ;;  %v1331_v37 = vrot.slane %v1317_v33, %v10676_v16  ;;  %v1347_v40 = vrot.slane %v1333_v34, %v10676_v16  ;;  %v10893_v2 = vpop.eup %10077 }
 0x445   :  { %v1864_v3 = vsel %vm1797_vm3, %v10893_v2, 0.0  ;;  %v10901_v4 = vpop.eup %10079 }
 0x446   :  { %v1348_v44 = vcombine.low %v1324_v35, %v1340_v36  ;;  %v1349_v47 = vcombine.high %v1324_v35, %v1340_v36  ;;  %v1350_v42 = vcombine.low %v1331_v37, %v1347_v40  ;;  %v1351_v48 = vcombine.high %v1331_v37, %v1347_v40 }
 0x447   :  { %v1867_v5 = vsel %vm1797_vm3, %v10901_v4, 0.0 }
 0x448   :  { %v1420_v62 = vpack.c.bf16 %v1348_v44, %v1348_v44  ;;  %v1421_v50 = vpack.c.bf16 %v1349_v47, %v1349_v47  ;;  %v1422_v17 = vpack.c.bf16 %v1350_v42, %v1350_v42 }
 0x44a   :  { %v1899_v55 = vsel %vm1897_vm4, %v1420_v62, 0  ;;  %v1945_v25 = vsel %vm1897_vm4, %v1421_v50, 0  ;;  %v1991_v26 = vsel %vm1897_vm4, %v1422_v17, 0 }
 0x44b   :  { %1132 = vrot.lane.b32.xlu0 %v10646_v56, %s10462_s26  ;;  %9413 = vmatpush3.bf16.msra.mxu1 %v1899_v55 }
 0x44c   :  { %9419 = vmatpush3.bf16.msra.mxu0 %v1945_v25  ;;  %9424 = vmatprep.subr.bf16.mxu1 %v10458_v0 }
 0x44d   :  { %9430 = vmatprep.subr.bf16.mxu0 %v10458_v0 }
 0x462   :  { %1862 = vadd.xlane.f32.xlu1 %v1861_v57 }
 0x46a   :  { %1865 = vadd.xlane.f32.xlu0 %v1864_v3 }
 0x473   :  { %1144 = vrot.lane.b32.xlu1 %v10646_v56, %s10461_s20 }
 0x497   :  { %1868 = vadd.xlane.f32.xlu1 %v1867_v5 }
 0x4a6   :  { %v1848_v6 = vpop.xlane.xlu1 %1847 }
 0x4a7   :  { %10081 = vrcp.f32 %v1848_v6 }
 0x4ae   :  { %v1860_v8 = vpop.xlane.xlu0 %1859 }
 0x4b2   :  { %v1851_v10 = vpop.xlane.xlu0 %1850 }
 0x4b3   :  { %10083 = vrcp.f32 %v1851_v10 }
 0x4b4   :  { %v10082_v14 = vpop.eup %10081 }
 0x4b5   :  { %v1878_v15 = vmul.f32 %v10082_v14, %v10839_v41  ;;  %v1423_v41 = vpack.c.bf16 %v1351_v48, %v1351_v48 }
 0x4b6   :  { %v1854_v1 = vpop.xlane.xlu1 %1853 }
 0x4b7   :  { %10085 = vrcp.f32 %v1854_v1  ;;  %v1886_v12 = vpack.c.bf16 %v1878_v15, %v1878_v15  ;;  %v2037_v20 = vsel %vm1897_vm4, %v1423_v41, 0 }
 0x4b9   :  { %9415 = vmatmul.mubr.msk.bf16.vlgmr.msra.gmra.mxu1 %vm1797_vm3, %v1886_v12 }
 0x4ba   :  { %9425 = vmatpush3.bf16.msra.mxu1 %v1991_v26  ;;  %9426 = vmatprep.mubr.msk.bf16.mxu1 %vm10459_vm0, %v10458_v0 }
 0x4bb   :  { %9436 = vmatprep.subr.bf16.mxu1 %v10458_v0 }
 0x4be   :  { %v1857_v7 = vpop.xlane.xlu0 %1856 }
 0x4bf   :  { %10087 = vrcp.f32 %v1857_v7 }
 0x4c0   :  { %v10084_v61 = vpop.eup %10083  ;;  %10089 = vrcp.f32 %v1860_v8 }
 0x4c1   :  { %v1879_v11 = vmul.f32 %v10084_v61, %v10847_v51 }
 0x4c2   :  { %v1133_v32 = vpop.permute.xlu0 %1132 }
 0x4c3   :  { %v1887_v63 = vpack.c.bf16 %v1879_v11, %v1879_v11 }
 0x4c4   :  { %v10086_v13 = vpop.eup %10085 }
 0x4c5   :  { %9421 = vmatmul.mubr.msk.bf16.vlgmr.msra.gmra.mxu0 %vm1797_vm3, %v1887_v63  ;;  %v1880_v19 = vmul.f32 %v10086_v13, %v10851_v53  ;;  %v1139_v53 = vpop.permute.xlu1 %1138 }
 0x4c6   :  { %9431 = vmatpush3.bf16.msra.mxu0 %v2037_v20  ;;  %9432 = vmatprep.mubr.msk.bf16.mxu0 %vm10459_vm0, %v10458_v0  ;;  %v1216_v30 = vcombine.low %v10646_v56, %v1139_v53  ;;  %v1217_v31 = vcombine.high %v10646_v56, %v1139_v53 }
 0x4c7   :  { %v1888_v21 = vpack.c.bf16 %v1880_v19, %v1880_v19  ;;  %9442 = vmatprep.subr.bf16.mxu0 %v10458_v0 }
 0x4c8   :  { %v1224_v36 = vrot.slane %v1216_v30, %v10674_v9 }
 0x4c9   :  { %9427 = vmatmul.mubr.msk.bf16.vlgmr.msra.gmra.mxu1 %vm1797_vm3, %v1888_v21 }
 0x4ca   :  { %9438 = vmatprep.mubr.msk.bf16.mxu1 %vm10459_vm0, %v10458_v0 }
 0x4cc   :  { %v10088_v51 = vpop.eup %10087 }
 0x4cd   :  { %v1881_v22 = vmul.f32 %v10088_v51, %v10857_v27  ;;  %v1231_v27 = vrot.slane %v1217_v31, %v10674_v9  ;;  %v10090_v14 = vpop.eup %10089 }
 0x4ce   :  { %v1882_v19 = vmul.f32 %v10090_v14, %v10843_v49 }
 0x4cf   :  { %v1889_v23 = vpack.c.bf16 %v1881_v22, %v1881_v22 }
 0x4d1   :  { %9433 = vmatmul.mubr.msk.bf16.vlgmr.msra.gmra.mxu0 %vm1797_vm3, %v1889_v23 }
 0x4d2   :  { %9444 = vmatprep.mubr.msk.bf16.mxu0 %vm10459_vm0, %v10458_v0 }
 0x4eb   :  { %v1863_v24 = vpop.xlane.xlu1 %1862 }
 0x4ec   :  { %10091 = vrcp.f32 %v1863_v24  ;;  %v1890_v24 = vpack.c.bf16 %v1882_v19, %v1882_v19 }
 0x4ef   :  { %v1145_v33 = vpop.permute.xlu1 %1144 }
 0x4f0   :  { %v1232_v34 = vcombine.low %v1133_v32, %v1145_v33  ;;  %v1233_v35 = vcombine.high %v1133_v32, %v1145_v33 }
 0x4f2   :  { %v1240_v37 = vrot.slane %v1232_v34, %v10674_v9  ;;  %v1247_v40 = vrot.slane %v1233_v35, %v10674_v9 }
 0x4f3   :  { %v1866_v55 = vpop.xlane.xlu0 %1865 }
 0x4f4   :  { %v1248_v44 = vcombine.low %v1224_v36, %v1240_v37  ;;  %v1249_v47 = vcombine.high %v1224_v36, %v1240_v37  ;;  %v1264_v42 = vcombine.low %v1231_v27, %v1247_v40  ;;  %v1265_v48 = vcombine.high %v1231_v27, %v1247_v40 }
 0x4f5   :  { %10093 = vrcp.f32 %v1866_v55  ;;  %v9857_v55 = vld [vmem:[#allocation11 + $0x38] sm:$0xff]  }
 0x4f6   :  { %v1256_v56 = vrot.slane %v1248_v44, %v10676_v16  ;;  %v1263_v62 = vrot.slane %v1249_v47, %v10676_v16  ;;  %v1272_v50 = vrot.slane %v1264_v42, %v10676_v16  ;;  %v1279_v52 = vrot.slane %v1265_v48, %v10676_v16 }
 0x4f8   :  { %v1352_v25 = vcombine.low %v1256_v56, %v1263_v62  ;;  %v8838_v58 = vcombine.high %v1256_v56, %v1263_v62  ;;  %v1368_v59 = vcombine.low %v1272_v50, %v1279_v52  ;;  %v8839_v60 = vcombine.high %v1272_v50, %v1279_v52 }
 0x4f9   :  { %v10092_v26 = vpop.eup %10091 }
 0x4fa   :  { %v1359_v57 = vrot.slane %v1352_v25, %v10674_v9  ;;  %v1367_v3 = vrot.slane %v8838_v58, %v10674_v9  ;;  %v1375_v28 = vrot.slane %v1368_v59, %v10674_v9  ;;  %v1383_v54 = vrot.slane %v8839_v60, %v10674_v9 }
 0x4fb   :  { %v1883_v20 = vmul.f32 %v10092_v26, %v10889_v18 }
 0x4fc   :  { %v1384_v5 = vcombine.low %v1359_v57, %v1367_v3  ;;  %v1400_v6 = vcombine.low %v1375_v28, %v1383_v54  ;;  %v1385_v8 = vcombine.high %v1359_v57, %v1367_v3  ;;  %v1401_v10 = vcombine.high %v1375_v28, %v1383_v54  ;;  %v9859_v3 = vld [vmem:[#allocation11 + $0x28] sm:$0xff]  }
 0x4fd   :  { %v1891_v30 = vpack.c.bf16 %v1883_v20, %v1883_v20 }
 0x4fe   :  { %v1392_v15 = vrot.slane %v1384_v5, %v10676_v16  ;;  %v1408_v17 = vrot.slane %v1400_v6, %v10676_v16  ;;  %v1399_v1 = vrot.slane %v1385_v8, %v10676_v16  ;;  %v1415_v12 = vrot.slane %v1401_v10, %v10676_v16 }
 0x500   :  { %v1416_v7 = vcombine.low %v1392_v15, %v1408_v17  ;;  %v1417_v61 = vcombine.high %v1392_v15, %v1408_v17  ;;  %v1418_v11 = vcombine.low %v1399_v1, %v1415_v12  ;;  %v1419_v41 = vcombine.high %v1399_v1, %v1415_v12  ;;  %v9860_v12 = vld [vmem:[#allocation11 + $0x20] sm:$0xff]  }
 0x502   :  { %v1424_v63 = vpack.c.bf16 %v1416_v7, %v1416_v7  ;;  %v1425_v13 = vpack.c.bf16 %v1417_v61, %v1417_v61  ;;  %v1426_v22 = vpack.c.bf16 %v1418_v11, %v1418_v11  ;;  %v1427_v23 = vpack.c.bf16 %v1419_v41, %v1419_v41  ;;  %v10094_v53 = vpop.eup %10093 }
 0x503   :  { %v1884_v31 = vmul.f32 %v10094_v53, %v10893_v2 }
 0x504   :  { %v2083_v21 = vsel %vm1897_vm4, %v1424_v63, 0  ;;  %v2129_v51 = vsel %vm1897_vm4, %v1425_v13, 0  ;;  %v2175_v49 = vsel %vm1897_vm4, %v1426_v22, 0  ;;  %v2221_v18 = vsel %vm1897_vm4, %v1427_v23, 0 }
 0x505   :  { %9437 = vmatpush3.bf16.msra.mxu1 %v2083_v21  ;;  %9443 = vmatpush3.bf16.msra.mxu0 %v2129_v51  ;;  %v1892_v32 = vpack.c.bf16 %v1884_v31, %v1884_v31  ;;  %v9861_v21 = vld [vmem:[#allocation11 + $0x18] sm:$0xff]   ;;  %v9862_v31 = vld [vmem:[#allocation11 + $0x10] sm:$0xff]  }
 0x506   :  { %9448 = vmatprep.subr.bf16.mxu1 %v10458_v0  ;;  %9454 = vmatprep.subr.bf16.mxu0 %v10458_v0 }
 0x508   :  { %9439 = vmatmul.mubr.msk.bf16.vlgmr.msra.gmra.mxu1 %vm1797_vm3, %v1890_v24  ;;  %9445 = vmatmul.mubr.msk.bf16.vlgmr.msra.gmra.mxu0 %vm1797_vm3, %v1891_v30 }
 0x509   :  { %9449 = vmatpush3.bf16.msra.mxu1 %v2175_v49  ;;  %9455 = vmatpush3.bf16.msra.mxu0 %v2221_v18 }
 0x50a   :  { %9450 = vmatprep.mubr.msk.bf16.mxu1 %vm10459_vm0, %v10458_v0  ;;  %9456 = vmatprep.mubr.msk.bf16.mxu0 %vm10459_vm0, %v10458_v0 }
 0x50b   :  { %9460 = vmatprep.subr.bf16.mxu1 %v10458_v0 }
 0x510   :  { %9451 = vmatmul.mubr.msk.bf16.vlgmr.msra.gmra.mxu1 %vm1797_vm3, %v1892_v32 }
 0x511   :  { %9476 = vmatprep.mubr.msk.bf16.mxu1 %vm10459_vm0, %v10458_v0  ;;  %9461 = vmatpush3.bf16.msra.mxu1 %v9857_v55 }
 0x512   :  { %9462 = vmatprep.subr.bf16.mxu1 %v10458_v0 }
 0x520   :  { %v1869_v33 = vpop.xlane.xlu1 %1868 }
 0x521   :  { %10095 = vrcp.f32 %v1869_v33 }
 0x52e   :  { %v10096_v34 = vpop.eup %10095 }
 0x52f   :  { %v1885_v35 = vmul.f32 %v10096_v34, %v10901_v4  ;;  %v9858_v4 = vld [vmem:[#allocation11 + $0x30] sm:$0xff]  }
 0x530   :  { %9463 = vmatpush3.bf16.msra.mxu1 %v9858_v4 }
 0x531   :  { %v1893_v36 = vpack.c.bf16 %v1885_v35, %v1885_v35  ;;  %9464 = vmatprep.subr.bf16.mxu1 %v10458_v0 }
 0x533   :  { %9457 = vmatmul.mubr.msk.bf16.vlgmr.msra.gmra.mxu0 %vm1797_vm3, %v1893_v36 }
 0x534   :  { %2864 = vmatprep.mubr.bf16.mxu0 %v10460_v29  ;;  %9465 = vmatpush3.bf16.msra.mxu1 %v9859_v3 }
 0x535   :  { %9466 = vmatprep.subr.bf16.mxu1 %v10458_v0 }
 0x538   :  { %9467 = vmatpush3.bf16.msra.mxu1 %v9860_v12 }
 0x539   :  { %9468 = vmatprep.subr.bf16.mxu1 %v10458_v0 }
 0x53c   :  { %9469 = vmatpush3.bf16.msra.mxu1 %v9861_v21 }
 0x53d   :  { %9470 = vmatprep.subr.bf16.mxu1 %v10458_v0 }
 0x540   :  { %9471 = vmatpush3.bf16.msra.mxu1 %v9862_v31 }
 0x541   :  { %9472 = vmatprep.subr.bf16.mxu1 %v10458_v0 }
 0x579   :  { %v1935_v2 = vpop.f32.mrf.mxu1 }
 0x57b   :  { %v9416_v27 = vpop.f32.mrf.mxu1 }
 0x57d   :  { %v1938_v37 = vpop.f32.mrf.mxu1 }
 0x57f   :  { %v9417_v40 = vpop.f32.mrf.mxu1 }
 0x585   :  { %v1981_v44 = vpop.f32.mrf.mxu0 }
 0x587   :  { %v9422_v47 = vpop.f32.mrf.mxu0 }
 0x589   :  { %v2027_v42 = vpop.f32.mrf.mxu1  ;;  %v1984_v48 = vpop.f32.mrf.mxu0 }
 0x58a   :  { %v2263_v56 = vcombine.low %v1935_v2, %v2027_v42  ;;  %v2264_v62 = vcombine.high %v1935_v2, %v2027_v42 }
 0x58b   :  { %v9428_v50 = vpop.f32.mrf.mxu1  ;;  %v9423_v52 = vpop.f32.mrf.mxu0 }
 0x58c   :  { %v2271_v54 = vrot.slane %v2263_v56, %v10674_v9  ;;  %v2278_v5 = vrot.slane %v2264_v62, %v10674_v9 }
 0x58d   :  { %v2030_v25 = vpop.f32.mrf.mxu1 }
 0x58f   :  { %v9429_v58 = vpop.f32.mrf.mxu1 }
 0x591   :  { %v2073_v59 = vpop.f32.mrf.mxu0 }
 0x592   :  { %v2279_v60 = vcombine.low %v1981_v44, %v2073_v59  ;;  %v2280_v57 = vcombine.high %v1981_v44, %v2073_v59 }
 0x593   :  { %v9434_v28 = vpop.f32.mrf.mxu0 }
 0x594   :  { %v2287_v6 = vrot.slane %v2279_v60, %v10674_v9  ;;  %v2294_v8 = vrot.slane %v2280_v57, %v10674_v9 }
 0x595   :  { %v2076_v10 = vpop.f32.mrf.mxu0 }
 0x596   :  { %v2295_v14 = vcombine.low %v2271_v54, %v2287_v6  ;;  %v2296_v15 = vcombine.high %v2271_v54, %v2287_v6  ;;  %v2311_v17 = vcombine.low %v2278_v5, %v2294_v8  ;;  %v2312_v1 = vcombine.high %v2278_v5, %v2294_v8 }
 0x597   :  { %v9435_v26 = vpop.f32.mrf.mxu0 }
 0x598   :  { %v2303_v7 = vrot.slane %v2295_v14, %v10676_v16  ;;  %v2310_v61 = vrot.slane %v2296_v15, %v10676_v16  ;;  %v2319_v11 = vrot.slane %v2311_v17, %v10676_v16  ;;  %v2326_v41 = vrot.slane %v2312_v1, %v10676_v16 }
 0x59a   :  { %v2399_v63 = vcombine.low %v2303_v7, %v2310_v61  ;;  %v8856_v13 = vcombine.high %v2303_v7, %v2310_v61  ;;  %v2415_v19 = vcombine.low %v2319_v11, %v2326_v41  ;;  %v8857_v20 = vcombine.high %v2319_v11, %v2326_v41 }
 0x59c   :  { %v2406_v51 = vrot.slane %v2399_v63, %v10674_v9  ;;  %v2414_v22 = vrot.slane %v8856_v13, %v10674_v9  ;;  %v2422_v23 = vrot.slane %v2415_v19, %v10674_v9  ;;  %v2430_v53 = vrot.slane %v8857_v20, %v10674_v9  ;;  %v9863_v20 = vld [vmem:[#allocation11 + $0x8] sm:$0xff]  }
 0x59d   :  { %9473 = vmatpush3.bf16.msra.mxu1 %v9863_v20  ;;  %v9870_v20 = vld [vmem:[#allocation17 + $0x64] ss:$8 sps:$4 sm:$0xff]  }
 0x59e   :  { %v2432_v24 = vcombine.high %v2406_v51, %v2414_v22  ;;  %v2448_v30 = vcombine.high %v2422_v23, %v2430_v53  ;;  %v2431_v49 = vcombine.low %v2406_v51, %v2414_v22  ;;  %v2447_v18 = vcombine.low %v2422_v23, %v2430_v53  ;;  %9474 = vmatprep.subr.bf16.mxu1 %v10458_v0 }
 0x5a0   :  { %v10983_v32 = vrot.slane %v2432_v24, %v10676_v16  ;;  %v10986_v33 = vrot.slane %v2448_v30, %v10676_v16  ;;  %v10989_v34 = vrot.slane %v2431_v49, %v10676_v16  ;;  %v10992_v35 = vrot.slane %v2447_v18, %v10676_v16  ;;  %v9864_v18 = vld [vmem:[#allocation11] sm:$0xff]  }
 0x5a1   :  { %9475 = vmatpush3.bf16.msra.mxu1 %v9864_v18  ;;  %v9885_v18 = vld [vmem:[#allocation17 + $0x14] ss:$8 sps:$4 sm:$0xff]  }
 0x5a2   :  { %v2465_v36 = vcombine.low %v10983_v32, %v10986_v33  ;;  %v2463_v2 = vcombine.low %v10989_v34, %v10992_v35  ;;  %v2464_v27 = vcombine.high %v10989_v34, %v10992_v35  ;;  %v2466_v37 = vcombine.high %v10983_v32, %v10986_v33  ;;  %v8860_v34 = vld [vmem:[#allocation13] ss:$0 sm:$0xff] }
 0x5c8   :  { %v2119_v40 = vpop.f32.mrf.mxu1  ;;  %v2165_v44 = vpop.f32.mrf.mxu0 }
 0x5ca   :  { %v9440_v47 = vpop.f32.mrf.mxu1  ;;  %v9446_v42 = vpop.f32.mrf.mxu0 }
 0x5cc   :  { %v2122_v48 = vpop.f32.mrf.mxu1  ;;  %v2168_v56 = vpop.f32.mrf.mxu0 }
 0x5ce   :  { %v9441_v62 = vpop.f32.mrf.mxu1  ;;  %v9447_v50 = vpop.f32.mrf.mxu0 }
 0x5d0   :  { %v2211_v52 = vpop.f32.mrf.mxu1 }
 0x5d1   :  { %v2331_v58 = vcombine.low %v2119_v40, %v2211_v52  ;;  %v2332_v59 = vcombine.high %v2119_v40, %v2211_v52 }
 0x5d2   :  { %v9452_v55 = vpop.f32.mrf.mxu1 }
 0x5d3   :  { %v2339_v54 = vrot.slane %v2331_v58, %v10674_v9  ;;  %v2346_v5 = vrot.slane %v2332_v59, %v10674_v9 }
 0x5d4   :  { %v2214_v25 = vpop.f32.mrf.mxu1 }
 0x5d6   :  { %v9453_v4 = vpop.f32.mrf.mxu1 }
 0x5f3   :  { %v2257_v60 = vpop.f32.mrf.mxu0 }
 0x5f4   :  { %v2347_v57 = vcombine.low %v2165_v44, %v2257_v60  ;;  %v2348_v3 = vcombine.high %v2165_v44, %v2257_v60 }
 0x5f5   :  { %v9458_v28 = vpop.f32.mrf.mxu0 }
 0x5f6   :  { %v2355_v6 = vrot.slane %v2347_v57, %v10674_v9  ;;  %v2362_v8 = vrot.slane %v2348_v3, %v10674_v9 }
 0x5f7   :  { %v2260_v10 = vpop.f32.mrf.mxu0 }
 0x5f8   :  { %v2363_v14 = vcombine.low %v2339_v54, %v2355_v6  ;;  %v2364_v15 = vcombine.high %v2339_v54, %v2355_v6  ;;  %v2379_v17 = vcombine.low %v2346_v5, %v2362_v8  ;;  %v2380_v1 = vcombine.high %v2346_v5, %v2362_v8 }
 0x5f9   :  { %v9459_v12 = vpop.f32.mrf.mxu0 }
 0x5fa   :  { %v2371_v26 = vrot.slane %v2363_v14, %v10676_v16  ;;  %v2378_v7 = vrot.slane %v2364_v15, %v10676_v16  ;;  %v2387_v61 = vrot.slane %v2379_v17, %v10676_v16  ;;  %v2394_v11 = vrot.slane %v2380_v1, %v10676_v16  ;;  %v9865_v12 = vld [vmem:[#allocation17 + $0x70] ss:$8 sps:$4 sm:$0xff]  }
 0x5fc   :  { %v2467_v41 = vcombine.low %v2371_v26, %v2378_v7  ;;  %v8858_v63 = vcombine.high %v2371_v26, %v2378_v7  ;;  %v2483_v13 = vcombine.low %v2387_v61, %v2394_v11  ;;  %v8859_v19 = vcombine.high %v2387_v61, %v2394_v11  ;;  %v9867_v26 = vld [vmem:[#allocation17 + $0x74] ss:$8 sps:$4 sm:$0xff]  }
 0x5fd   :  { %2832 = vmatprep.subr.bf16.mxu0 %v9867_v26 }
 0x5fe   :  { %v2474_v21 = vrot.slane %v2467_v41, %v10674_v9  ;;  %v2482_v51 = vrot.slane %v8858_v63, %v10674_v9  ;;  %v2490_v22 = vrot.slane %v2483_v13, %v10674_v9  ;;  %v2498_v23 = vrot.slane %v8859_v19, %v10674_v9  ;;  %2833 = vmatpush1.bf16.msra.mxu0 %v9865_v12  ;;  %v9868_v19 = vld [vmem:[#allocation17 + $0x60] ss:$8 sps:$4 sm:$0xff]   ;;  %v2740_v12 = vld [vmem:[%s11995_s11] sm:$0x3] }
 0x5ff   :  { %2834 = vmatprep.subr.bf16.mxu0 %v9870_v20 }
 0x600   :  { %v2500_v53 = vcombine.high %v2474_v21, %v2482_v51  ;;  %v2516_v24 = vcombine.high %v2490_v22, %v2498_v23  ;;  %v2499_v30 = vcombine.low %v2474_v21, %v2482_v51  ;;  %v2515_v49 = vcombine.low %v2490_v22, %v2498_v23  ;;  %v9871_v21 = vld [vmem:[#allocation17 + $0x50] ss:$8 sps:$4 sm:$0xff]   ;;  %v9873_v51 = vld [vmem:[#allocation17 + $0x54] ss:$8 sps:$4 sm:$0xff]   ;;  %v9876_v22 = vld [vmem:[#allocation17 + $0x44] ss:$8 sps:$4 sm:$0xff]  }
 0x601   :  { %v9874_v23 = vld [vmem:[#allocation17 + $0x40] ss:$8 sps:$4 sm:$0xff]  }
 0x602   :  { %v2514_v31 = vrot.slane %v2500_v53, %v10676_v16  ;;  %v2530_v40 = vrot.slane %v2516_v24, %v10676_v16  ;;  %v2507_v44 = vrot.slane %v2499_v30, %v10676_v16  ;;  %v2523_v47 = vrot.slane %v2515_v49, %v10676_v16  ;;  %2835 = vmatpush1.bf16.msra.mxu0 %v9868_v19  ;;  %v9879_v53 = vld [vmem:[#allocation17 + $0x34] ss:$8 sps:$4 sm:$0xff]   ;;  %v9877_v24 = vld [vmem:[#allocation17 + $0x30] ss:$8 sps:$4 sm:$0xff]   ;;  %v9882_v30 = vld [vmem:[#allocation17 + $0x24] ss:$8 sps:$4 sm:$0xff]  }
 0x603   :  { %2836 = vmatprep.subr.bf16.mxu0 %v9873_v51  ;;  %v9880_v49 = vld [vmem:[#allocation17 + $0x20] ss:$8 sps:$4 sm:$0xff]  }
 0x604   :  { %v2533_v42 = vcombine.low %v2514_v31, %v2530_v40  ;;  %v2532_v48 = vcombine.high %v2507_v44, %v2523_v47  ;;  %v2531_v56 = vcombine.low %v2507_v44, %v2523_v47  ;;  %v2534_v52 = vcombine.high %v2514_v31, %v2530_v40  ;;  %v9883_v31 = vld [vmem:[#allocation17 + $0x10] ss:$8 sps:$4 sm:$0xff]   ;;  %v9888_v40 = vld [vmem:[#allocation17 + $0x4] ss:$8 sps:$4 sm:$0xff]   ;;  %v9886_v44 = vld [vmem:[#allocation17] ss:$8 sps:$4 sm:$0xff]  }
 0x605   :  { %v9889_v47 = vld [vmem:[#allocation19 + $0x78] sm:$0xff]  }
 0x606   :  { %v9784_v62 = vpack.i.bf16 %v2533_v42, %v2465_v36  ;;  %v9779_v50 = vpack.i.bf16 %v2532_v48, %v2464_v27  ;;  %v9789_v55 = vpack.i.bf16 %v2534_v52, %v2466_v37  ;;  %2837 = vmatpush1.bf16.msra.mxu0 %v9871_v21  ;;  %v9890_v42 = vld [vmem:[#allocation19 + $0x38] sm:$0xff]   ;;  %v9891_v48 = vld [vmem:[#allocation19 + $0x70] sm:$0xff]   ;;  %9172 = vmatprep.subr.bf16.mxu1 %v9889_v47  ;;  %v9895_v52 = vld [vmem:[#allocation19 + $0x60] sm:$0xff]  }
 0x607   :  { %2838 = vmatprep.subr.bf16.mxu0 %v9876_v22 }
 0x608   :  { %9785 = vrot.lane.b32.xlu1 %v9784_v62, %s10442_s1  ;;  %9780 = vrot.lane.b32.xlu0 %v9779_v50, %s10461_s20  ;;  %v9893_v62 = vld [vmem:[#allocation19 + $0x68] sm:$0xff]  }
 0x609   :  { %v9894_v50 = vld [vmem:[#allocation19 + $0x28] sm:$0xff]  }
 0x60a   :  { %2839 = vmatpush1.bf16.msra.mxu0 %v9874_v23 }
 0x60b   :  { %2840 = vmatprep.subr.bf16.mxu0 %v9879_v53 }
 0x60c   :  { %9790 = vrot.lane.b32.xlu0 %v9789_v55, %s10462_s26  ;;  %v9896_v55 = vld [vmem:[#allocation19 + $0x20] sm:$0xff]  }
 0x60e   :  { %2841 = vmatpush1.bf16.msra.mxu0 %v9877_v24 }
 0x60f   :  { %2842 = vmatprep.subr.bf16.mxu0 %v9882_v30  ;;  %v8887_v30 = vld [vmem:[%s11997_s13] ss:$0 sm:$0xff] }
 0x612   :  { %2843 = vmatpush1.bf16.msra.mxu0 %v9880_v49 }
 0x613   :  { %2844 = vmatprep.subr.bf16.mxu0 %v9885_v18 }
 0x616   :  { %2845 = vmatpush1.bf16.msra.mxu0 %v9883_v31 }
 0x617   :  { %2846 = vmatprep.subr.bf16.mxu0 %v9888_v40 }
 0x61a   :  { %2847 = vmatpush1.bf16.msra.mxu0 %v9886_v44 }
 0x67a   :  { %v9786_v25 = vpop.permute.xlu1 %9785  ;;  %v9781_v4 = vpop.permute.xlu0 %9780 }
 0x67b   :  { %v9783_v58 = vunpack.i.h.bf16 %v9781_v4  ;;  %v9782_v59 = vunpack.i.l.bf16 %v9781_v4  ;;  %v9788_v60 = vunpack.i.h.bf16 %v9786_v25  ;;  %v9787_v57 = vunpack.i.l.bf16 %v9786_v25  ;;  %v9897_v25 = vld [vmem:[#allocation19 + $0x58] sm:$0xff]  }
 0x67c   :  { %v9898_v4 = vld [vmem:[#allocation19 + $0x18] sm:$0xff]  }
 0x67d   :  { %v2559_v36 = vsel %vm1428_vm2, %v2463_v2, %v9782_v59  ;;  %v2560_v27 = vsel %vm1428_vm2, %v2531_v56, %v9783_v58  ;;  %v9892_v56 = vld [vmem:[#allocation19 + $0x30] sm:$0xff]  }
 0x67e   :  { %v9791_v3 = vpop.permute.xlu0 %9790  ;;  %v2562_v37 = vsel %vm2561_vm5, %v2559_v36, %v9787_v57  ;;  %v2563_v28 = vsel %vm2561_vm5, %v2560_v27, %v9788_v60 }
 0x67f   :  { %v9793_v32 = vunpack.i.h.bf16 %v9791_v3  ;;  %v9792_v33 = vunpack.i.l.bf16 %v9791_v3 }
 0x681   :  { %v2565_v54 = vsel %vm2564_vm6, %v2562_v37, %v9792_v33  ;;  %v2566_v5 = vsel %vm2564_vm6, %v2563_v28, %v9793_v32  ;;  %v8869_v33 = vld [vmem:[#allocation14] ss:$0 sm:$0xff] }
 0x682   :  { %v2567_v6 = vpack.c.bf16 %v2566_v5, %v2565_v54  ;;  %v8870_v5 = vld [vmem:[#allocation16] ss:$0 sm:$0xff] }
 0x684   :  { %9477 = vmatmul.mubr.bf16.vlgmr.msra.gmra.mxu1 %v2567_v6 }
 0x685   :  { %9173 = vmatpush3.bf16.msra.mxu1 %v9890_v42 }
 0x686   :  { %9174 = vmatprep.subr.bf16.mxu1 %v9891_v48 }
 0x689   :  { %9175 = vmatpush3.bf16.msra.mxu1 %v9892_v56 }
 0x68a   :  { %9176 = vmatprep.subr.bf16.mxu1 %v9893_v62  ;;  %v9905_v62 = vld [vmem:[#allocation10 + $0x168] ss:$12 sps:$4 sm:$0xff]  }
 0x68d   :  { %9177 = vmatpush3.bf16.msra.mxu1 %v9894_v50  ;;  %v9907_v50 = vld [vmem:[#allocation10 + $0x16c] ss:$12 sps:$4 sm:$0xff]  }
 0x68e   :  { %9178 = vmatprep.subr.bf16.mxu1 %v9895_v52  ;;  %v9908_v52 = vld [vmem:[#allocation10 + $0x170] ss:$12 sps:$4 sm:$0xff]   ;;  %3279 = vmatprep.subr.bf16.mxu0 %v9907_v50 }
 0x691   :  { %9179 = vmatpush3.bf16.msra.mxu1 %v9896_v55 }
 0x692   :  { %9180 = vmatprep.subr.bf16.mxu1 %v9897_v25 }
 0x695   :  { %9181 = vmatpush3.bf16.msra.mxu1 %v9898_v4 }
 0x744   :  { %v2673_v35 = vpop.f32.mrf.mxu1 }
 0x745   :  { %v2674_v2 = vadd.f32 %v8860_v34, %v2673_v35 }
 0x746   :  { %v9478_v8 = vpop.f32.mrf.mxu1 }
 0x747   :  { %v2680_v10 = vadd.f32 %v2674_v2, %v10624_v38  ;;  %v9899_v8 = vld [vmem:[#allocation19 + $0x50] sm:$0xff]  }
 0x748   :  { %v2676_v14 = vpop.f32.mrf.mxu1  ;;  %9182 = vmatprep.subr.bf16.mxu1 %v9899_v8  ;;  %v9927_v8 = vld [vmem:[#allocation10 + $0xf4] ss:$12 sps:$4 sm:$0xff]  }
 0x749   :  { %v2677_v15 = vadd.f32 %v8860_v34, %v2676_v14  ;;  %2684 = vadd.xlane.f32.xlu1 %v2680_v10  ;;  %v9901_v14 = vld [vmem:[#allocation19 + $0x48] sm:$0xff]  }
 0x74a   :  { %v9479_v17 = vpop.f32.mrf.mxu1 }
 0x74b   :  { %v2681_v1 = vadd.f32 %v2677_v15, %v10626_v39  ;;  %v9902_v15 = vld [vmem:[#allocation19 + $0x8] sm:$0xff]   ;;  %v9903_v17 = vld [vmem:[#allocation19 + $0x40] sm:$0xff]  }
 0x74d   :  { %2686 = vadd.xlane.f32.xlu0 %v2681_v1 }
 0x7d2   :  { %v2685_v7 = vpop.xlane.xlu1 %2684 }
 0x7d3   :  { %v2689_v61 = vmul.f32 0.0078125, %v2685_v7  ;;  %v2749_v7 = vrot.slane %v2740_v12, %v10634_v43 }
 0x7d5   :  { %v11037_v11 = vsub.f32 %v2680_v10, %v2689_v61  ;;  %v9900_v10 = vld [vmem:[#allocation19 + $0x10] sm:$0xff]   ;;  %v2745_v61 = vrot.slane %v2740_v12, %v10639_v45  ;;  %v9935_v12 = vld [vmem:[#allocation10 + $0xc4] ss:$12 sps:$4 sm:$0xff]  }
 0x7d6   :  { %v2687_v41 = vpop.xlane.xlu0 %2686  ;;  %9183 = vmatpush3.bf16.msra.mxu1 %v9900_v10  ;;  %v9928_v10 = vld [vmem:[#allocation10 + $0xf8] ss:$12 sps:$4 sm:$0xff]  }
 0x7d7   :  { %v2690_v63 = vmul.f32 0.0078125, %v2687_v41  ;;  %v2693_v38 = vmul.f32 %v11037_v11, %v11037_v11  ;;  %9184 = vmatprep.subr.bf16.mxu1 %v9901_v14  ;;  %v9925_v14 = vld [vmem:[#allocation10 + $0xf0] ss:$12 sps:$4 sm:$0xff]  }
 0x7d9   :  { %v11041_v13 = vsub.f32 %v2681_v1, %v2690_v63  ;;  %2695 = vadd.xlane.f32.xlu0 %v2693_v38  ;;  %v9904_v1 = vld [vmem:[#allocation19] sm:$0xff]  }
 0x7da   :  { %9185 = vmatpush3.bf16.msra.mxu1 %v9902_v15  ;;  %v9931_v15 = vld [vmem:[#allocation10 + $0xdc] ss:$12 sps:$4 sm:$0xff]  }
 0x7db   :  { %v2694_v39 = vmul.f32 %v11041_v13, %v11041_v13  ;;  %9186 = vmatprep.subr.bf16.mxu1 %v9903_v17  ;;  %v9932_v17 = vld [vmem:[#allocation10 + $0xe0] ss:$12 sps:$4 sm:$0xff]  }
 0x7dd   :  { %2697 = vadd.xlane.f32.xlu1 %v2694_v39 }
 0x7de   :  { %9187 = vmatpush3.bf16.msra.mxu1 %v9904_v1  ;;  %v9929_v1 = vld [vmem:[#allocation10 + $0xd8] ss:$12 sps:$4 sm:$0xff]  }
 0x7df   :  { %9480 = vmatprep.subr.bf16.mxu1 %v10458_v0 }
 0x862   :  { %v2696_v58 = vpop.xlane.xlu0 %2695 }
 0x863   :  { %v2699_v59 = vmul.f32 0.0078125, %v2696_v58 }
 0x865   :  { %v2701_v60 = vadd.f32 1e-05, %v2699_v59 }
 0x866   :  { %v2698_v57 = vpop.xlane.xlu1 %2697 }
 0x867   :  { %10097 = vrsqrt.f32 %v2701_v60  ;;  %v2700_v36 = vmul.f32 0.0078125, %v2698_v57 }
 0x869   :  { %v2702_v27 = vadd.f32 1e-05, %v2700_v36 }
 0x86b   :  { %10099 = vrsqrt.f32 %v2702_v27  ;;  %v9909_v27 = vld [vmem:[#allocation10 + $0x150] ss:$12 sps:$4 sm:$0xff]  }
 0x874   :  { %v10098_v3 = vpop.eup %10097 }
 0x875   :  { %v2705_v32 = vmul.f32 %v10098_v3, %v11037_v11  ;;  %v9911_v3 = vld [vmem:[#allocation10 + $0x154] ss:$12 sps:$4 sm:$0xff]  }
 0x877   :  { %v2713_v54 = vmul.f32 %v8869_v33, %v2705_v32  ;;  %v9912_v32 = vld [vmem:[#allocation10 + $0x158] ss:$12 sps:$4 sm:$0xff]  }
 0x878   :  { %v10100_v37 = vpop.eup %10099 }
 0x879   :  { %v2706_v28 = vmul.f32 %v10100_v37, %v11041_v13  ;;  %v2721_v34 = vadd.f32 %v8870_v5, %v2713_v54  ;;  %v9915_v37 = vld [vmem:[#allocation10 + $0x13c] ss:$12 sps:$4 sm:$0xff]   ;;  %v9919_v54 = vld [vmem:[#allocation10 + $0x124] ss:$12 sps:$4 sm:$0xff]  }
 0x87b   :  { %v2714_v6 = vmul.f32 %v8869_v33, %v2706_v28  ;;  %v9913_v33 = vld [vmem:[#allocation10 + $0x138] ss:$12 sps:$4 sm:$0xff]   ;;  %v9916_v28 = vld [vmem:[#allocation10 + $0x140] ss:$12 sps:$4 sm:$0xff]  }
 0x87d   :  { %v2722_v35 = vadd.f32 %v8870_v5, %v2714_v6  ;;  %v9920_v5 = vld [vmem:[#allocation10 + $0x128] ss:$12 sps:$4 sm:$0xff]   ;;  %v9917_v6 = vld [vmem:[#allocation10 + $0x120] ss:$12 sps:$4 sm:$0xff]  }
 0x87f   :  { %v2723_v2 = vpack.c.bf16 %v2722_v35, %v2721_v34 }
 0x881   :  { %2865 = vmatmul.mubr.bf16.vlgmr.msra.gmra.mxu0 %v2723_v2  ;;  %v9921_v2 = vld [vmem:[#allocation10 + $0x108] ss:$12 sps:$4 sm:$0xff]  }
 0x882   :  { %3311 = vmatprep.mubr.bf16.mxu0 %v10460_v29  ;;  %3280 = vmatpush1.bf16.msra.mxu0 %v9905_v62 }
 0x883   :  { %3281 = vmatprep.subr.bf16.mxu0 %v9911_v3 }
 0x886   :  { %3282 = vmatpush1.bf16.msra.mxu0 %v9909_v27 }
 0x887   :  { %3283 = vmatprep.subr.bf16.mxu0 %v9915_v37 }
 0x88a   :  { %3284 = vmatpush1.bf16.msra.mxu0 %v9913_v33 }
 0x88b   :  { %3285 = vmatprep.subr.bf16.mxu0 %v9919_v54 }
 0x88e   :  { %3286 = vmatpush1.bf16.msra.mxu0 %v9917_v6 }
 0x941   :  { %v2866_v26 = vpop.f32.mrf.mxu0 }
 0x942   :  { %v2867_v13 = vadd.f32 %v2866_v26, %v2745_v61  ;;  %v9936_v26 = vld [vmem:[#allocation10 + $0xc8] ss:$12 sps:$4 sm:$0xff]  }
 0x943   :  { %v2868_v11 = vpop.f32.mrf.mxu0 }
 0x944   :  { %v2869_v63 = vadd.f32 %v2868_v11, %v2749_v7  ;;  %v2875_v22 = vmax.f32 %v2867_v13, 0.0 }
 0x945   :  { %v2870_v41 = vpop.f32.mrf.mxu0 }
 0x946   :  { %v2871_v38 = vadd.f32 %v2870_v41, %v2745_v61  ;;  %v2876_v21 = vmax.f32 %v2869_v63, 0.0 }
 0x947   :  { %v2872_v39 = vpop.f32.mrf.mxu0 }
 0x948   :  { %v2873_v19 = vadd.f32 %v2872_v39, %v2749_v7  ;;  %v2877_v20 = vmax.f32 %v2871_v38, 0.0  ;;  %v9933_v7 = vld [vmem:[#allocation10 + $0xc0] ss:$12 sps:$4 sm:$0xff]  }
 0x94a   :  { %v2878_v51 = vmax.f32 %v2873_v19, 0.0  ;;  %v2879_v53 = vpack.c.bf16 %v2877_v20, %v2875_v22  ;;  %v8904_v20 = vld [vmem:[%s11998_s14] ss:$0 sm:$0xff] }
 0x94c   :  { %v2880_v23 = vpack.c.bf16 %v2878_v51, %v2876_v21 }
 0x94e   :  { %3048 = vmatprep.mubr.bf16.mxu1 %v2880_v23  ;;  %v8905_v23 = vld [vmem:[%s11999_s15] ss:$0 sm:$0xff] }
 0x94f   :  { %3049 = vmatmul.mubr.bf16.vlgmr.msra.gmra.mxu1 %v2879_v53 }
 0x950   :  { %9496 = vmatprep.mubr.msk.bf16.mxu1 %vm10459_vm0, %v10458_v0  ;;  %9481 = vmatpush3.bf16.msra.mxu1 %v9908_v52 }
 0x951   :  { %9482 = vmatprep.subr.bf16.mxu1 %v10458_v0 }
 0x954   :  { %9483 = vmatpush3.bf16.msra.mxu1 %v9912_v32 }
 0x955   :  { %9484 = vmatprep.subr.bf16.mxu1 %v10458_v0 }
 0x958   :  { %9485 = vmatpush3.bf16.msra.mxu1 %v9916_v28 }
 0x959   :  { %9486 = vmatprep.subr.bf16.mxu1 %v10458_v0 }
 0x95c   :  { %9487 = vmatpush3.bf16.msra.mxu1 %v9920_v5 }
 0x95d   :  { %9488 = vmatprep.subr.bf16.mxu1 %v10458_v0 }
 0xa0f   :  { %v9188_v24 = vpop.f32.mrf.mxu1 }
 0xa11   :  { %v9189_v49 = vpop.f32.mrf.mxu1 }
 0xa12   :  { %v9190_v18 = vadd.f32 %v9189_v49, %v9188_v24 }
 0xa13   :  { %v9191_v31 = vpop.f32.mrf.mxu1 }
 0xa14   :  { %v3051_v40 = vadd.f32 %v9190_v18, %v8887_v30  ;;  %v8906_v18 = vld [vmem:[%s11989_s5 + $0x3] sm:$0x7] }
 0xa15   :  { %v9192_v44 = vpop.f32.mrf.mxu1 }
 0xa16   :  { %v9193_v47 = vadd.f32 %v9192_v44, %v9191_v31  ;;  %v3057_v42 = vadd.f32 %v3051_v40, %v2721_v34  ;;  %v9923_v34 = vld [vmem:[#allocation10 + $0x10c] ss:$12 sps:$4 sm:$0xff]   ;;  %v3143_v31 = vrot.slane %v8906_v18, %v10634_v43 }
 0xa17   :  { %3287 = vmatprep.subr.bf16.mxu0 %v9923_v34 }
 0xa18   :  { %v3054_v48 = vadd.f32 %v9193_v47, %v8887_v30  ;;  %3061 = vadd.xlane.f32.xlu0 %v3057_v42  ;;  %3288 = vmatpush1.bf16.msra.mxu0 %v9921_v2 }
 0xa19   :  { %3289 = vmatprep.subr.bf16.mxu0 %v9927_v8 }
 0xa1a   :  { %v3058_v56 = vadd.f32 %v3054_v48, %v2722_v35  ;;  %v9924_v35 = vld [vmem:[#allocation10 + $0x110] ss:$12 sps:$4 sm:$0xff]   ;;  %v3139_v48 = vrot.slane %v8906_v18, %v10639_v45 }
 0xa1b   :  { %9489 = vmatpush3.bf16.msra.mxu1 %v9924_v35 }
 0xa1c   :  { %3063 = vadd.xlane.f32.xlu1 %v3058_v56  ;;  %9490 = vmatprep.subr.bf16.mxu1 %v10458_v0 }
 0xa1d   :  { %3290 = vmatpush1.bf16.msra.mxu0 %v9925_v14 }
 0xa1e   :  { %3291 = vmatprep.subr.bf16.mxu0 %v9931_v15 }
 0xa1f   :  { %9491 = vmatpush3.bf16.msra.mxu1 %v9928_v10 }
 0xa20   :  { %9492 = vmatprep.subr.bf16.mxu1 %v10458_v0 }
 0xa21   :  { %3292 = vmatpush1.bf16.msra.mxu0 %v9929_v1 }
 0xa22   :  { %3293 = vmatprep.subr.bf16.mxu0 %v9935_v12 }
 0xa23   :  { %9493 = vmatpush3.bf16.msra.mxu1 %v9932_v17 }
 0xa24   :  { %9494 = vmatprep.subr.bf16.mxu1 %v10458_v0 }
 0xa25   :  { %3294 = vmatpush1.bf16.msra.mxu0 %v9933_v7 }
 0xa26   :  { %9500 = vmatprep.subr.bf16.mxu0 %v10458_v0 }
 0xa27   :  { %9495 = vmatpush3.bf16.msra.mxu1 %v9936_v26 }
 0xa28   :  { %9524 = vmatprep.subr.bf16.mxu1 %v10458_v0 }
 0xaa1   :  { %v3062_v55 = vpop.xlane.xlu0 %3061 }
 0xaa2   :  { %v3065_v25 = vmul.f32 0.0078125, %v3062_v55 }
 0xaa4   :  { %v11060_v4 = vsub.f32 %v3057_v42, %v3065_v25 }
 0xaa5   :  { %v3064_v58 = vpop.xlane.xlu1 %3063 }
 0xaa6   :  { %v3066_v59 = vmul.f32 0.0078125, %v3064_v58  ;;  %v3069_v60 = vmul.f32 %v11060_v4, %v11060_v4 }
 0xaa8   :  { %v11064_v57 = vsub.f32 %v3058_v56, %v3066_v59  ;;  %3071 = vadd.xlane.f32.xlu0 %v3069_v60  ;;  %v11102_v56 = vrot.slane %v8906_v18, %v10641_v46 }
 0xaaa   :  { %v3070_v36 = vmul.f32 %v11064_v57, %v11064_v57 }
 0xaac   :  { %3073 = vadd.xlane.f32.xlu1 %v3070_v36 }
 0xb31   :  { %v3072_v61 = vpop.xlane.xlu0 %3071 }
 0xb32   :  { %v3075_v11 = vmul.f32 0.0078125, %v3072_v61 }
 0xb34   :  { %v3077_v41 = vadd.f32 1e-05, %v3075_v11 }
 0xb35   :  { %v3074_v63 = vpop.xlane.xlu1 %3073 }
 0xb36   :  { %10101 = vrsqrt.f32 %v3077_v41  ;;  %v3076_v38 = vmul.f32 0.0078125, %v3074_v63 }
 0xb38   :  { %v3078_v13 = vadd.f32 1e-05, %v3076_v38 }
 0xb3a   :  { %10103 = vrsqrt.f32 %v3078_v13 }
 0xb43   :  { %v10102_v39 = vpop.eup %10101 }
 0xb44   :  { %v3081_v19 = vmul.f32 %v10102_v39, %v11060_v4 }
 0xb46   :  { %v3089_v22 = vmul.f32 %v8904_v20, %v3081_v19 }
 0xb47   :  { %v10104_v21 = vpop.eup %10103 }
 0xb48   :  { %v3082_v51 = vmul.f32 %v10104_v21, %v11064_v57  ;;  %v11084_v24 = vadd.f32 %v8905_v23, %v3089_v22 }
 0xb4a   :  { %v3090_v53 = vmul.f32 %v8904_v20, %v3082_v51 }
 0xb4c   :  { %v11086_v30 = vadd.f32 %v8905_v23, %v3090_v53 }
 0xb4e   :  { %v3099_v49 = vpack.c.bf16 %v11086_v30, %v11084_v24 }
 0xb50   :  { %3312 = vmatmul.mubr.bf16.vlgmr.msra.gmra.mxu0 %v3099_v49  ;;  %9497 = vmatmul.mubr.bf16.vlgmr.msra.gmra.mxu1 %v3099_v49 }
 0xb51   :  { %9502 = vmatprep.mubr.msk.bf16.mxu0 %vm10459_vm0, %v10458_v0  ;;  %9526 = vmatprep.mubr.msk.bf16.mxu1 %vm10459_vm0, %v10458_v0 }
 0xc10   :  { %v3313_v40 = vpop.f32.mrf.mxu0  ;;  %v11098_v44 = vpop.f32.mrf.mxu1 }
 0xc11   :  { %v3314_v25 = vadd.f32 %v3313_v40, %v3139_v48 }
 0xc12   :  { %v3315_v47 = vpop.f32.mrf.mxu0  ;;  %v9498_v42 = vpop.f32.mrf.mxu1 }
 0xc13   :  { %v3316_v62 = vadd.f32 %v3315_v47, %v3143_v31 }
 0xc14   :  { %v3359_v50 = vpop.f32.mrf.mxu1  ;;  %v3317_v4 = vpop.f32.mrf.mxu0 }
 0xc15   :  { %v11105_v52 = vadd.f32 %v3359_v50, %v11102_v56  ;;  %3671 = vrot.lane.b32.xlu1 %v3316_v62, %s10442_s1  ;;  %3665 = vrot.lane.b32.xlu0 %v3316_v62, %s10462_s26  ;;  %v11119_v60 = vadd.f32 %v3317_v4, %v3139_v48 }
 0xc16   :  { %v9499_v55 = vpop.f32.mrf.mxu1  ;;  %v3319_v58 = vpop.f32.mrf.mxu0 }
 0xc17   :  { %v11113_v59 = vadd.f32 %v3319_v58, %v3143_v31 }
 0xc19   :  { %3677 = vrot.lane.b32.xlu1 %v3316_v62, %s10461_s20  ;;  %3365 = vrot.lane.b32.xlu0 %v3314_v25, %s10462_s26 }
 0xc1d   :  { %3371 = vrot.lane.b32.xlu1 %v3314_v25, %s10442_s1  ;;  %3377 = vrot.lane.b32.xlu0 %v3314_v25, %s10461_s20 }
 0xc21   :  { %3667 = vrot.lane.b32.xlu1 %v11113_v59, %s10462_s26  ;;  %3673 = vrot.lane.b32.xlu0 %v11113_v59, %s10442_s1 }
 0xc25   :  { %3679 = vrot.lane.b32.xlu1 %v11113_v59, %s10461_s20  ;;  %3367 = vrot.lane.b32.xlu0 %v11119_v60, %s10462_s26 }
 0xc29   :  { %3373 = vrot.lane.b32.xlu1 %v11119_v60, %s10442_s1  ;;  %3379 = vrot.lane.b32.xlu0 %v11119_v60, %s10461_s20 }
 0xc87   :  { %v3672_v57 = vpop.permute.xlu1 %3671  ;;  %v3666_v36 = vpop.permute.xlu0 %3665 }
 0xc88   :  { %v3683_v27 = vcombine.low %v3316_v62, %v3672_v57  ;;  %v3684_v3 = vcombine.high %v3316_v62, %v3672_v57 }
 0xc8a   :  { %v3691_v54 = vrot.slane %v3683_v27, %v10674_v9  ;;  %v3698_v5 = vrot.slane %v3684_v3, %v10674_v9 }
 0xc8b   :  { %v3678_v32 = vpop.permute.xlu1 %3677  ;;  %v3366_v33 = vpop.permute.xlu0 %3365 }
 0xc8c   :  { %v3699_v37 = vcombine.low %v3666_v36, %v3678_v32  ;;  %v3700_v28 = vcombine.high %v3666_v36, %v3678_v32 }
 0xc8e   :  { %v3707_v6 = vrot.slane %v3699_v37, %v10674_v9  ;;  %v3714_v34 = vrot.slane %v3700_v28, %v10674_v9 }
 0xc8f   :  { %v3372_v35 = vpop.permute.xlu1 %3371  ;;  %v3378_v2 = vpop.permute.xlu0 %3377 }
 0xc90   :  { %v3715_v8 = vcombine.low %v3691_v54, %v3707_v6  ;;  %v3716_v10 = vcombine.high %v3691_v54, %v3707_v6  ;;  %v3731_v14 = vcombine.low %v3698_v5, %v3714_v34  ;;  %v3732_v15 = vcombine.high %v3698_v5, %v3714_v34 }
 0xc91   :  { %v3383_v17 = vcombine.low %v3314_v25, %v3372_v35  ;;  %v3384_v1 = vcombine.high %v3314_v25, %v3372_v35  ;;  %v3399_v12 = vcombine.low %v3366_v33, %v3378_v2  ;;  %v3400_v26 = vcombine.high %v3366_v33, %v3378_v2 }
 0xc92   :  { %v3723_v7 = vrot.slane %v3715_v8, %v10676_v16  ;;  %v3730_v61 = vrot.slane %v3716_v10, %v10676_v16  ;;  %v3739_v11 = vrot.slane %v3731_v14, %v10676_v16  ;;  %v3746_v41 = vrot.slane %v3732_v15, %v10676_v16 }
 0xc93   :  { %v3391_v63 = vrot.slane %v3383_v17, %v10674_v9  ;;  %v3398_v38 = vrot.slane %v3384_v1, %v10674_v9  ;;  %v3407_v13 = vrot.slane %v3399_v12, %v10674_v9  ;;  %v3414_v39 = vrot.slane %v3400_v26, %v10674_v9  ;;  %v3668_v19 = vpop.permute.xlu1 %3667  ;;  %v3674_v20 = vpop.permute.xlu0 %3673 }
 0xc94   :  { %v3819_v53 = vcombine.low %v3723_v7, %v3730_v61  ;;  %v8935_v49 = vcombine.high %v3723_v7, %v3730_v61  ;;  %v3835_v18 = vcombine.low %v3739_v11, %v3746_v41  ;;  %v3751_v50 = vcombine.low %v11113_v59, %v3674_v20 }
 0xc95   :  { %v3415_v21 = vcombine.low %v3391_v63, %v3407_v13  ;;  %v3416_v51 = vcombine.high %v3391_v63, %v3407_v13  ;;  %v3431_v22 = vcombine.low %v3398_v38, %v3414_v39  ;;  %v3432_v23 = vcombine.high %v3398_v38, %v3414_v39 }
 0xc96   :  { %v3752_v55 = vcombine.high %v11113_v59, %v3674_v20  ;;  %v8936_v58 = vcombine.high %v3739_v11, %v3746_v41  ;;  %v3759_v3 = vrot.slane %v3751_v50, %v10674_v9  ;;  %v11152_v28 = vrot.slane %v3819_v53, %v10674_v9 }
 0xc97   :  { %v3423_v31 = vrot.slane %v3415_v21, %v10676_v16  ;;  %v3430_v40 = vrot.slane %v3416_v51, %v10676_v16  ;;  %v3439_v47 = vrot.slane %v3431_v22, %v10676_v16  ;;  %v3446_v42 = vrot.slane %v3432_v23, %v10676_v16  ;;  %v3680_v48 = vpop.permute.xlu1 %3679  ;;  %v3368_v62 = vpop.permute.xlu0 %3367 }
 0xc98   :  { %v3767_v25 = vcombine.low %v3668_v19, %v3680_v48  ;;  %v3768_v4 = vcombine.high %v3668_v19, %v3680_v48  ;;  %v3766_v32 = vrot.slane %v3752_v55, %v10674_v9  ;;  %v11155_v54 = vrot.slane %v8935_v49, %v10674_v9 }
 0xc99   :  { %v3519_v57 = vcombine.low %v3423_v31, %v3430_v40  ;;  %v8931_v36 = vcombine.high %v3423_v31, %v3430_v40  ;;  %v3535_v27 = vcombine.low %v3439_v47, %v3446_v42  ;;  %v11158_v59 = vrot.slane %v3835_v18, %v10674_v9 }
 0xc9a   :  { %v3775_v33 = vrot.slane %v3767_v25, %v10674_v9  ;;  %v3782_v37 = vrot.slane %v3768_v4, %v10674_v9  ;;  %v8932_v5 = vcombine.high %v3439_v47, %v3446_v42  ;;  %v11161_v14 = vrot.slane %v8936_v58, %v10674_v9 }
 0xc9b   :  { %v3374_v8 = vpop.permute.xlu1 %3373  ;;  %v3380_v10 = vpop.permute.xlu0 %3379  ;;  %v11164_v15 = vrot.slane %v3519_v57, %v10674_v9  ;;  %v11167_v17 = vrot.slane %v8931_v36, %v10674_v9  ;;  %v11170_v1 = vrot.slane %v3535_v27, %v10674_v9  ;;  %v3851_v50 = vcombine.low %v11152_v28, %v11155_v54 }
 0xc9c   :  { %v3783_v6 = vcombine.low %v3759_v3, %v3775_v33  ;;  %v3784_v34 = vcombine.high %v3759_v3, %v3775_v33  ;;  %v3799_v35 = vcombine.low %v3766_v32, %v3782_v37  ;;  %v3800_v2 = vcombine.high %v3766_v32, %v3782_v37 }
 0xc9d   :  { %v3451_v11 = vcombine.low %v11119_v60, %v3374_v8  ;;  %v3452_v41 = vcombine.high %v11119_v60, %v3374_v8  ;;  %v3467_v63 = vcombine.low %v3368_v62, %v3380_v10  ;;  %v3468_v38 = vcombine.high %v3368_v62, %v3380_v10 }
 0xc9e   :  { %v3791_v12 = vrot.slane %v3783_v6, %v10676_v16  ;;  %v3798_v26 = vrot.slane %v3784_v34, %v10676_v16  ;;  %v3807_v7 = vrot.slane %v3799_v35, %v10676_v16  ;;  %v3814_v61 = vrot.slane %v3800_v2, %v10676_v16 }
 0xc9f   :  { %v11179_v13 = vrot.slane %v8932_v5, %v10674_v9  ;;  %v3459_v21 = vrot.slane %v3451_v11, %v10674_v9  ;;  %v3466_v51 = vrot.slane %v3452_v41, %v10674_v9  ;;  %v3475_v22 = vrot.slane %v3467_v63, %v10674_v9 }
 0xca0   :  { %v3887_v39 = vcombine.low %v3791_v12, %v3798_v26  ;;  %v8937_v19 = vcombine.high %v3791_v12, %v3798_v26  ;;  %v3903_v20 = vcombine.low %v3807_v7, %v3814_v61  ;;  %v3482_v23 = vrot.slane %v3468_v38, %v10674_v9 }
 0xca1   :  { %v3551_v53 = vcombine.low %v11164_v15, %v11167_v17  ;;  %v8938_v18 = vcombine.high %v3807_v7, %v3814_v61  ;;  %v3483_v31 = vcombine.low %v3459_v21, %v3475_v22  ;;  %v3484_v40 = vcombine.high %v3459_v21, %v3475_v22 }
 0xca2   :  { %v3894_v60 = vrot.slane %v3887_v39, %v10674_v9  ;;  %v3902_v49 = vrot.slane %v8937_v19, %v10674_v9  ;;  %v3499_v47 = vcombine.low %v3466_v51, %v3482_v23  ;;  %v3500_v42 = vcombine.high %v3466_v51, %v3482_v23 }
 0xca3   :  { %v3567_v48 = vcombine.low %v11170_v1, %v11179_v13  ;;  %v3910_v62 = vrot.slane %v3903_v20, %v10674_v9  ;;  %v3867_v55 = vcombine.low %v11158_v59, %v11161_v14  ;;  %v3491_v25 = vrot.slane %v3483_v31, %v10676_v16 }
 0xca4   :  { %v3498_v4 = vrot.slane %v3484_v40, %v10676_v16  ;;  %v3507_v58 = vrot.slane %v3499_v47, %v10676_v16  ;;  %v3514_v57 = vrot.slane %v3500_v42, %v10676_v16  ;;  %v3918_v36 = vrot.slane %v8938_v18, %v10674_v9 }
 0xca5   :  { %v3859_v27 = vrot.slane %v3851_v50, %v10676_v16  ;;  %v3875_v3 = vrot.slane %v3867_v55, %v10676_v16  ;;  %v3919_v32 = vcombine.low %v3894_v60, %v3902_v49  ;;  %v3559_v35 = vrot.slane %v3551_v53, %v10676_v16 }
 0xca6   :  { %v3587_v33 = vcombine.low %v3491_v25, %v3498_v4  ;;  %v8933_v37 = vcombine.high %v3491_v25, %v3498_v4  ;;  %v3603_v5 = vcombine.low %v3507_v58, %v3514_v57  ;;  %v8934_v6 = vcombine.high %v3507_v58, %v3514_v57 }
 0xca7   :  { %v3883_v34 = vcombine.low %v3859_v27, %v3875_v3  ;;  %v3575_v7 = vrot.slane %v3567_v48, %v10676_v16  ;;  %v11210_v61 = vrot.slane %v3919_v32, %v10676_v16  ;;  %v3935_v11 = vcombine.low %v3910_v62, %v3918_v36 }
 0xca8   :  { %v3594_v2 = vrot.slane %v3587_v33, %v10674_v9  ;;  %v3602_v8 = vrot.slane %v8933_v37, %v10674_v9  ;;  %v3610_v10 = vrot.slane %v3603_v5, %v10674_v9  ;;  %v3618_v12 = vrot.slane %v8934_v6, %v10674_v9 }
 0xca9   :  { %v3955_v26 = vpack.c.bf16 %v3883_v34, %v3883_v34  ;;  %v3884_v38 = vcombine.high %v3859_v27, %v3875_v3  ;;  %v3943_v19 = vrot.slane %v3935_v11, %v10676_v16  ;;  %v3852_v20 = vcombine.high %v11152_v28, %v11155_v54 }
 0xcaa   :  { %v3619_v41 = vcombine.low %v3594_v2, %v3602_v8  ;;  %v3635_v63 = vcombine.low %v3610_v10, %v3618_v12  ;;  %v3868_v21 = vcombine.high %v11158_v59, %v11161_v14  ;;  %v3583_v51 = vcombine.low %v3559_v35, %v3575_v7 }
 0xcab   :  { %v4267_v39 = vsel %vm1428_vm2, %v3955_v26, 0  ;;  %v3951_v22 = vcombine.low %v11210_v61, %v3943_v19  ;;  %v3920_v23 = vcombine.high %v3894_v60, %v3902_v49  ;;  %v3936_v53 = vcombine.high %v3910_v62, %v3918_v36 }
 0xcac   :  { %9501 = vmatpush3.bf16.xpose.msra.mxu0 %v4267_v39  ;;  %v3956_v18 = vpack.c.bf16 %v3884_v38, %v3884_v38  ;;  %v3866_v31 = vrot.slane %v3852_v20, %v10676_v16  ;;  %v11222_v40 = vrot.slane %v3619_v41, %v10676_v16  ;;  %v3643_v47 = vrot.slane %v3635_v63, %v10676_v16 }
 0xcad   :  { %9506 = vmatprep.subr.bf16.mxu0 %v10458_v0  ;;  %v3959_v42 = vpack.c.bf16 %v3951_v22, %v3951_v22  ;;  %v3882_v28 = vrot.slane %v3868_v21, %v10676_v16  ;;  %v3934_v54 = vrot.slane %v3920_v23, %v10676_v16  ;;  %v3950_v59 = vrot.slane %v3936_v53, %v10676_v16 }
 0xcae   :  { %v3655_v14 = vpack.c.bf16 %v3583_v51, %v3583_v51  ;;  %v3620_v49 = vcombine.high %v3594_v2, %v3602_v8  ;;  %v3636_v62 = vcombine.high %v3610_v10, %v3618_v12  ;;  %v4313_v50 = vsel %vm1428_vm2, %v3956_v18, 0 }
 0xcaf   :  { %v4451_v48 = vsel %vm1428_vm2, %v3959_v42, 0  ;;  %v3953_v60 = vcombine.low %v3934_v54, %v3950_v59  ;;  %v3885_v55 = vcombine.low %v3866_v31, %v3882_v28  ;;  %v3651_v25 = vcombine.low %v11222_v40, %v3643_v47 }
 0xcb0   :  { %9525 = vmatpush3.bf16.xpose.msra.mxu1 %v4451_v48  ;;  %v3552_v4 = vcombine.high %v11164_v15, %v11167_v17  ;;  %v3568_v58 = vcombine.high %v11170_v1, %v11179_v13  ;;  %v3584_v57 = vcombine.high %v3559_v35, %v3575_v7  ;;  %v3634_v32 = vrot.slane %v3620_v49, %v10676_v16 }
 0xcb1   :  { %9536 = vmatprep.subr.bf16.mxu1 %v10458_v0  ;;  %v3961_v36 = vpack.c.bf16 %v3953_v60, %v3953_v60  ;;  %v3957_v27 = vpack.c.bf16 %v3885_v55, %v3885_v55  ;;  %v3659_v3 = vpack.c.bf16 %v3651_v25, %v3651_v25  ;;  %v3650_v33 = vrot.slane %v3636_v62, %v10676_v16 }
 0xcb2   :  { %v3656_v37 = vpack.c.bf16 %v3584_v57, %v3584_v57  ;;  %v3566_v15 = vrot.slane %v3552_v4, %v10676_v16  ;;  %v3582_v17 = vrot.slane %v3568_v58, %v10676_v16  ;;  %v3886_v13 = vcombine.high %v3866_v31, %v3882_v28 }
 0xcb3   :  { %9503 = vmatmul.mubr.msk.bf16.vlgmr.msra.gmra.mxu0 %vm1428_vm2, %v3655_v14  ;;  %v4543_v5 = vsel %vm1428_vm2, %v3961_v36, 0  ;;  %v4359_v1 = vsel %vm1428_vm2, %v3957_v27, 0  ;;  %v3653_v6 = vcombine.low %v3634_v32, %v3650_v33  ;;  %v3952_v12 = vcombine.high %v11210_v61, %v3943_v19 }
 0xcb4   :  { %9507 = vmatpush3.bf16.xpose.msra.mxu0 %v4313_v50  ;;  %9508 = vmatprep.mubr.msk.bf16.mxu0 %vm10459_vm0, %v10458_v0  ;;  %v3585_v34 = vcombine.low %v3566_v15, %v3582_v17  ;;  %v3958_v35 = vpack.c.bf16 %v3886_v13, %v3886_v13  ;;  %v3586_v26 = vcombine.high %v3566_v15, %v3582_v17 }
 0xcb5   :  { %9512 = vmatprep.subr.bf16.mxu0 %v10458_v0  ;;  %v3661_v2 = vpack.c.bf16 %v3653_v6, %v3653_v6  ;;  %v3960_v7 = vpack.c.bf16 %v3952_v12, %v3952_v12  ;;  %v3954_v63 = vcombine.high %v3934_v54, %v3950_v59  ;;  %v3652_v61 = vcombine.high %v11222_v40, %v3643_v47 }
 0xcb6   :  { %v3657_v8 = vpack.c.bf16 %v3585_v34, %v3585_v34  ;;  %v4405_v10 = vsel %vm1428_vm2, %v3958_v35, 0  ;;  %v3658_v11 = vpack.c.bf16 %v3586_v26, %v3586_v26  ;;  %v3654_v20 = vcombine.high %v3634_v32, %v3650_v33 }
 0xcb7   :  { %9527 = vmatmul.mubr.msk.bf16.vlgmr.msra.gmra.mxu1 %vm1428_vm2, %v3659_v3  ;;  %v4497_v41 = vsel %vm1428_vm2, %v3960_v7, 0  ;;  %v3962_v38 = vpack.c.bf16 %v3954_v63, %v3954_v63  ;;  %v3660_v39 = vpack.c.bf16 %v3652_v61, %v3652_v61  ;;  %v3357_v25 = vadd.f32 %v11098_v44, %v11102_v56 }
 0xcb8   :  { %9537 = vmatpush3.bf16.xpose.msra.mxu1 %v4543_v5  ;;  %9538 = vmatprep.mubr.msk.bf16.mxu1 %vm10459_vm0, %v10458_v0  ;;  %v3662_v21 = vpack.c.bf16 %v3654_v20, %v3654_v20 }
 0xcb9   :  { %9548 = vmatprep.subr.bf16.mxu1 %v10458_v0  ;;  %v4589_v19 = vsel %vm1428_vm2, %v3962_v38, 0 }
 0xcbb   :  { %9509 = vmatmul.mubr.msk.bf16.vlgmr.msra.gmra.mxu0 %vm1428_vm2, %v3656_v37 }
 0xcbc   :  { %9513 = vmatpush3.bf16.xpose.msra.mxu0 %v4359_v1  ;;  %9514 = vmatprep.mubr.msk.bf16.mxu0 %vm10459_vm0, %v10458_v0 }
 0xcbd   :  { %9518 = vmatprep.subr.bf16.mxu0 %v10458_v0 }
 0xcbf   :  { %9539 = vmatmul.mubr.msk.bf16.vlgmr.msra.gmra.mxu1 %vm1428_vm2, %v3661_v2 }
 0xcc0   :  { %9550 = vmatprep.mubr.msk.bf16.mxu1 %vm10459_vm0, %v10458_v0 }
 0xcc3   :  { %9515 = vmatmul.mubr.msk.bf16.vlgmr.msra.gmra.mxu0 %vm1428_vm2, %v3657_v8 }
 0xcc4   :  { %9519 = vmatpush3.bf16.xpose.msra.mxu0 %v4405_v10  ;;  %9520 = vmatprep.mubr.msk.bf16.mxu0 %vm10459_vm0, %v10458_v0 }
 0xcc5   :  { %9530 = vmatprep.subr.bf16.mxu0 %v10458_v0 }
 0xccb   :  { %9521 = vmatmul.mubr.msk.bf16.vlgmr.msra.gmra.mxu0 %vm1428_vm2, %v3658_v11 }
 0xccc   :  { %9531 = vmatpush3.bf16.xpose.msra.mxu0 %v4497_v41  ;;  %9532 = vmatprep.mubr.msk.bf16.mxu0 %vm10459_vm0, %v10458_v0 }
 0xccd   :  { %9542 = vmatprep.subr.bf16.mxu0 %v10458_v0 }
 0xcd3   :  { %9533 = vmatmul.mubr.msk.bf16.vlgmr.msra.gmra.mxu0 %vm1428_vm2, %v3660_v39 }
 0xcd4   :  { %9543 = vmatpush3.bf16.xpose.msra.mxu0 %v4589_v19  ;;  %9544 = vmatprep.mubr.msk.bf16.mxu0 %vm10459_vm0, %v10458_v0 }
 0xcd5   :  { %9554 = vmatprep.subr.bf16.mxu0 %v10458_v0 }
 0xcdb   :  { %9545 = vmatmul.mubr.msk.bf16.vlgmr.msra.gmra.mxu0 %vm1428_vm2, %v3662_v21 }
 0xcdc   :  { %9556 = vmatprep.mubr.msk.bf16.mxu0 %vm10459_vm0, %v10458_v0 }
 0xd73   :  { %v4303_v51 = vpop.f32.mrf.mxu0 }
 0xd74   :  { %v4631_v22 = vsel %vm1797_vm3, %v4303_v51, -inf }
 0xd75   :  { %4632 = vmax.xlane.f32.xlu1 %v4631_v22  ;;  %v9504_v23 = vpop.f32.mrf.mxu0 }
 0xd77   :  { %v4306_v53 = vpop.f32.mrf.mxu0  ;;  %v4487_v31 = vpop.f32.mrf.mxu1 }
 0xd78   :  { %v4643_v40 = vsel %vm1797_vm3, %v4487_v31, -inf }
 0xd79   :  { %v9505_v18 = vpop.f32.mrf.mxu0  ;;  %4644 = vmax.xlane.f32.xlu0 %v4643_v40  ;;  %v9528_v42 = vpop.f32.mrf.mxu1 }
 0xd7b   :  { %v4349_v47 = vpop.f32.mrf.mxu0  ;;  %v4490_v54 = vpop.f32.mrf.mxu1 }
 0xd7c   :  { %v4634_v59 = vsel %vm1797_vm3, %v4349_v47, -inf }
 0xd7d   :  { %v9510_v28 = vpop.f32.mrf.mxu0  ;;  %4635 = vmax.xlane.f32.xlu0 %v4634_v59  ;;  %v9529_v48 = vpop.f32.mrf.mxu1 }
 0xd7f   :  { %v4352_v14 = vpop.f32.mrf.mxu0  ;;  %v11280_v49 = vpop.f32.mrf.mxu1 }
 0xd80   :  { %v4649_v62 = vsel %vm1797_vm3, %v11280_v49, -inf }
 0xd81   :  { %v9511_v60 = vpop.f32.mrf.mxu0  ;;  %4650 = vmax.xlane.f32.xlu0 %v4649_v62  ;;  %v9540_v55 = vpop.f32.mrf.mxu1 }
 0xd83   :  { %v4395_v50 = vpop.f32.mrf.mxu0  ;;  %v4582_v58 = vpop.f32.mrf.mxu1 }
 0xd84   :  { %v4637_v57 = vsel %vm1797_vm3, %v4395_v50, -inf }
 0xd85   :  { %v9516_v4 = vpop.f32.mrf.mxu0  ;;  %4638 = vmax.xlane.f32.xlu0 %v4637_v57  ;;  %v9541_v27 = vpop.f32.mrf.mxu1 }
 0xd86   :  { %3971 = vrot.lane.b32.xlu1 %v3357_v25, %s10442_s1 }
 0xd87   :  { %v4398_v36 = vpop.f32.mrf.mxu0 }
 0xd89   :  { %v9517_v3 = vpop.f32.mrf.mxu0 }
 0xd8a   :  { %3977 = vrot.lane.b32.xlu1 %v3357_v25, %s10461_s20 }
 0xd8b   :  { %v11289_v32 = vpop.f32.mrf.mxu0 }
 0xd8c   :  { %v4640_v35 = vsel %vm1797_vm3, %v11289_v32, -inf }
 0xd8d   :  { %v9522_v33 = vpop.f32.mrf.mxu0 }
 0xd8f   :  { %v4444_v37 = vpop.f32.mrf.mxu0 }
 0xd91   :  { %v9523_v5 = vpop.f32.mrf.mxu0 }
 0xd93   :  { %v11291_v15 = vpop.f32.mrf.mxu0 }
 0xd94   :  { %v4646_v2 = vsel %vm1797_vm3, %v11291_v15, -inf }
 0xd95   :  { %v9534_v44 = vpop.f32.mrf.mxu0 }
 0xd97   :  { %v4536_v56 = vpop.f32.mrf.mxu0 }
 0xd99   :  { %v9535_v17 = vpop.f32.mrf.mxu0 }
 0xd9b   :  { %v11293_v1 = vpop.f32.mrf.mxu0  ;;  %3965 = vrot.lane.b32.xlu0 %v3357_v25, %s10462_s26 }
 0xd9c   :  { %v4652_v8 = vsel %vm1797_vm3, %v11293_v1, -inf }
 0xd9d   :  { %v9546_v13 = vpop.f32.mrf.mxu0 }
 0xd9f   :  { %v4628_v6 = vpop.f32.mrf.mxu0 }
 0xda1   :  { %v9547_v34 = vpop.f32.mrf.mxu0 }
 0xdae   :  { %4641 = vmax.xlane.f32.xlu1 %v4640_v35 }
 0xdb2   :  { %4647 = vmax.xlane.f32.xlu1 %v4646_v2 }
 0xdb6   :  { %4653 = vmax.xlane.f32.xlu1 %v4652_v8 }
 0xdc7   :  { %3967 = vrot.lane.b32.xlu1 %v11105_v52, %s10462_s26 }
 0xdfe   :  { %v4633_v10 = vpop.xlane.xlu1 %4632 }
 0xdff   :  { %v4655_v12 = vsub.f32 %v4303_v51, %v4633_v10 }
 0xe01   :  { %v4663_v26 = vmul.f32 1.442695, %v4655_v12 }
 0xe02   :  { %v4645_v7 = vpop.xlane.xlu0 %4644  ;;  %v3972_v19 = vpop.permute.xlu1 %3971 }
 0xe03   :  { %10105 = vpow2.f32 %v4663_v26  ;;  %v4659_v11 = vsub.f32 %v4487_v31, %v4645_v7  ;;  %v3983_v23 = vcombine.low %v3357_v25, %v3972_v19  ;;  %v3984_v53 = vcombine.high %v3357_v25, %v3972_v19 }
 0xe05   :  { %v4671_v41 = vmul.f32 1.442695, %v4659_v11  ;;  %v3991_v54 = vrot.slane %v3983_v23, %v10674_v9  ;;  %v3998_v59 = vrot.slane %v3984_v53, %v10674_v9 }
 0xe06   :  { %v4636_v63 = vpop.xlane.xlu0 %4635  ;;  %v3978_v31 = vpop.permute.xlu1 %3977 }
 0xe07   :  { %10107 = vpow2.f32 %v4671_v41  ;;  %v4656_v61 = vsub.f32 %v4349_v47, %v4636_v63 }
 0xe09   :  { %v4665_v38 = vmul.f32 1.442695, %v4656_v61 }
 0xe0a   :  { %v11304_v39 = vpop.xlane.xlu0 %4650 }
 0xe0b   :  { %10109 = vpow2.f32 %v4665_v38 }
 0xe0e   :  { %v4639_v21 = vpop.xlane.xlu0 %4638 }
 0xe0f   :  { %v4657_v51 = vsub.f32 %v4395_v50, %v4639_v21 }
 0xe10   :  { %v11306_v20 = vpop.eup %10105 }
 0xe11   :  { %v4679_v22 = vsel %vm1797_vm3, %v11306_v20, 0.0  ;;  %v4667_v18 = vmul.f32 1.442695, %v4657_v51 }
 0xe12   :  { %4680 = vadd.xlane.f32.xlu0 %v4679_v22  ;;  %v3966_v40 = vpop.permute.xlu0 %3965 }
 0xe13   :  { %10111 = vpow2.f32 %v4667_v18  ;;  %v3999_v47 = vcombine.low %v3966_v40, %v3978_v31  ;;  %v4000_v42 = vcombine.high %v3966_v40, %v3978_v31 }
 0xe14   :  { %v11310_v28 = vpop.eup %10107 }
 0xe15   :  { %v4007_v14 = vrot.slane %v3999_v47, %v10674_v9  ;;  %v4014_v48 = vrot.slane %v4000_v42, %v10674_v9  ;;  %v4691_v60 = vsel %vm1797_vm3, %v11310_v28, 0.0 }
 0xe16   :  { %4692 = vadd.xlane.f32.xlu0 %v4691_v60 }
 0xe17   :  { %v4015_v62 = vcombine.low %v3991_v54, %v4007_v14  ;;  %v4016_v50 = vcombine.high %v3991_v54, %v4007_v14  ;;  %v4031_v55 = vcombine.low %v3998_v59, %v4014_v48  ;;  %v4032_v25 = vcombine.high %v3998_v59, %v4014_v48 }
 0xe18   :  { %v11318_v4 = vpop.eup %10109 }
 0xe19   :  { %v4023_v58 = vrot.slane %v4015_v62, %v10676_v16  ;;  %v4030_v57 = vrot.slane %v4016_v50, %v10676_v16  ;;  %v4039_v36 = vrot.slane %v4031_v55, %v10676_v16  ;;  %v4046_v27 = vrot.slane %v4032_v25, %v10676_v16 }
 0xe1a   :  { %v4682_v3 = vsel %vm1797_vm3, %v11318_v4, 0.0 }
 0xe1b   :  { %v4119_v33 = vcombine.low %v4023_v58, %v4030_v57  ;;  %v8939_v37 = vcombine.high %v4023_v58, %v4030_v57  ;;  %v4135_v5 = vcombine.low %v4039_v36, %v4046_v27  ;;  %v8940_v44 = vcombine.high %v4039_v36, %v4046_v27  ;;  %4683 = vadd.xlane.f32.xlu1 %v4682_v3 }
 0xe1d   :  { %v4126_v56 = vrot.slane %v4119_v33, %v10674_v9  ;;  %v4134_v17 = vrot.slane %v8939_v37, %v10674_v9  ;;  %v4142_v13 = vrot.slane %v4135_v5, %v10674_v9  ;;  %v4150_v6 = vrot.slane %v8940_v44, %v10674_v9 }
 0xe1f   :  { %v4151_v34 = vcombine.low %v4126_v56, %v4134_v17  ;;  %v4167_v35 = vcombine.low %v4142_v13, %v4150_v6  ;;  %v4152_v2 = vcombine.high %v4126_v56, %v4134_v17  ;;  %v4168_v8 = vcombine.high %v4142_v13, %v4150_v6 }
 0xe20   :  { %v11330_v10 = vpop.eup %10111 }
 0xe21   :  { %v4685_v12 = vsel %vm1797_vm3, %v11330_v10, 0.0  ;;  %v4159_v26 = vrot.slane %v4151_v34, %v10676_v16  ;;  %v4175_v7 = vrot.slane %v4167_v35, %v10676_v16  ;;  %v4166_v11 = vrot.slane %v4152_v2, %v10676_v16 }
 0xe22   :  { %4686 = vadd.xlane.f32.xlu0 %v4685_v12  ;;  %v4182_v41 = vrot.slane %v4168_v8, %v10676_v16 }
 0xe23   :  { %v4183_v63 = vcombine.low %v4159_v26, %v4175_v7  ;;  %v4184_v61 = vcombine.high %v4159_v26, %v4175_v7 }
 0xe24   :  { %v4185_v38 = vcombine.low %v4166_v11, %v4182_v41  ;;  %v4186_v19 = vcombine.high %v4166_v11, %v4182_v41 }
 0xe25   :  { %v4255_v21 = vpack.c.bf16 %v4183_v63, %v4183_v63  ;;  %v4256_v22 = vpack.c.bf16 %v4184_v61, %v4184_v61 }
 0xe26   :  { %v4257_v33 = vpack.c.bf16 %v4185_v38, %v4185_v38  ;;  %v4258_v13 = vpack.c.bf16 %v4186_v19, %v4186_v19 }
 0xe27   :  { %v4731_v51 = vsel %vm1897_vm4, %v4255_v21, 0  ;;  %v4777_v23 = vsel %vm1897_vm4, %v4256_v22, 0 }
 0xe28   :  { %9549 = vmatpush3.bf16.msra.mxu1 %v4731_v51  ;;  %9555 = vmatpush3.bf16.msra.mxu0 %v4777_v23  ;;  %v4823_v44 = vsel %vm1897_vm4, %v4257_v33, 0 }
 0xe29   :  { %9560 = vmatprep.subr.bf16.mxu1 %v10458_v0  ;;  %9566 = vmatprep.subr.bf16.mxu0 %v10458_v0 }
 0xe37   :  { %v4642_v53 = vpop.xlane.xlu1 %4641 }
 0xe38   :  { %v4658_v18 = vsub.f32 %v11289_v32, %v4642_v53  ;;  %v4661_v32 = vsub.f32 %v11280_v49, %v11304_v39 }
 0xe3a   :  { %v4669_v31 = vmul.f32 1.442695, %v4658_v18  ;;  %v4675_v60 = vmul.f32 1.442695, %v4661_v32 }
 0xe3b   :  { %v4648_v40 = vpop.xlane.xlu1 %4647 }
 0xe3c   :  { %10113 = vpow2.f32 %v4669_v31  ;;  %v4660_v47 = vsub.f32 %v11291_v15, %v4648_v40 }
 0xe3e   :  { %v4673_v42 = vmul.f32 1.442695, %v4660_v47 }
 0xe3f   :  { %v4654_v15 = vpop.xlane.xlu1 %4653 }
 0xe40   :  { %10115 = vpow2.f32 %v4673_v42  ;;  %v4662_v62 = vsub.f32 %v11293_v1, %v4654_v15 }
 0xe41   :  { %10117 = vpow2.f32 %v4675_v60 }
 0xe42   :  { %v4677_v50 = vmul.f32 1.442695, %v4662_v62 }
 0xe43   :  { %v3968_v39 = vpop.permute.xlu1 %3967 }
 0xe44   :  { %10119 = vpow2.f32 %v4677_v50 }
 0xe49   :  { %v11344_v54 = vpop.eup %10113 }
 0xe4a   :  { %v4688_v59 = vsel %vm1797_vm3, %v11344_v54, 0.0 }
 0xe4b   :  { %4689 = vadd.xlane.f32.xlu1 %v4688_v59 }
 0xe4d   :  { %v11348_v14 = vpop.eup %10115 }
 0xe4e   :  { %v4694_v48 = vsel %vm1797_vm3, %v11348_v14, 0.0  ;;  %v11359_v55 = vpop.eup %10117 }
 0xe4f   :  { %4695 = vadd.xlane.f32.xlu0 %v4694_v48  ;;  %v4697_v25 = vsel %vm1797_vm3, %v11359_v55, 0.0 }
 0xe51   :  { %v11363_v58 = vpop.eup %10119 }
 0xe52   :  { %v4700_v57 = vsel %vm1797_vm3, %v11363_v58, 0.0 }
 0xe5c   :  { %3979 = vrot.lane.b32.xlu1 %v11105_v52, %s10461_s20 }
 0xe65   :  { %3973 = vrot.lane.b32.xlu0 %v11105_v52, %s10442_s1 }
 0xe80   :  { %4698 = vadd.xlane.f32.xlu1 %v4697_v25 }
 0xe84   :  { %4701 = vadd.xlane.f32.xlu0 %v4700_v57 }
 0xe9b   :  { %v4681_v49 = vpop.xlane.xlu0 %4680 }
 0xe9c   :  { %10121 = vrcp.f32 %v4681_v49 }
 0xe9f   :  { %v4693_v27 = vpop.xlane.xlu0 %4692 }
 0xea4   :  { %v4684_v36 = vpop.xlane.xlu1 %4683 }
 0xea5   :  { %10123 = vrcp.f32 %v4684_v36 }
 0xea9   :  { %v10122_v1 = vpop.eup %10121 }
 0xeaa   :  { %v4711_v3 = vmul.f32 %v10122_v1, %v11306_v20  ;;  %v4869_v20 = vsel %vm1897_vm4, %v4258_v13, 0 }
 0xeab   :  { %v4687_v5 = vpop.xlane.xlu0 %4686 }
 0xeac   :  { %v4719_v37 = vpack.c.bf16 %v4711_v3, %v4711_v3  ;;  %10125 = vrcp.f32 %v4687_v5 }
 0xeae   :  { %9551 = vmatmul.mubr.msk.bf16.vlgmr.msra.gmra.mxu1 %vm1797_vm3, %v4719_v37 }
 0xeaf   :  { %9561 = vmatpush3.bf16.msra.mxu1 %v4823_v44  ;;  %9562 = vmatprep.mubr.msk.bf16.mxu1 %vm10459_vm0, %v10458_v0 }
 0xeb0   :  { %9572 = vmatprep.subr.bf16.mxu1 %v10458_v0 }
 0xeb2   :  { %v10124_v56 = vpop.eup %10123 }
 0xeb3   :  { %v4712_v17 = vmul.f32 %v10124_v56, %v11318_v4 }
 0xeb5   :  { %v4720_v6 = vpack.c.bf16 %v4712_v17, %v4712_v17 }
 0xeb7   :  { %9557 = vmatmul.mubr.msk.bf16.vlgmr.msra.gmra.mxu0 %vm1797_vm3, %v4720_v6 }
 0xeb8   :  { %9567 = vmatpush3.bf16.msra.mxu0 %v4869_v20  ;;  %9568 = vmatprep.mubr.msk.bf16.mxu0 %vm10459_vm0, %v10458_v0 }
 0xeb9   :  { %v10126_v34 = vpop.eup %10125  ;;  %9578 = vmatprep.subr.bf16.mxu0 %v10458_v0 }
 0xeba   :  { %v4713_v35 = vmul.f32 %v10126_v34, %v11330_v10 }
 0xebc   :  { %v4721_v2 = vpack.c.bf16 %v4713_v35, %v4713_v35 }
 0xebe   :  { %9563 = vmatmul.mubr.msk.bf16.vlgmr.msra.gmra.mxu1 %vm1797_vm3, %v4721_v2 }
 0xebf   :  { %9574 = vmatprep.mubr.msk.bf16.mxu1 %vm10459_vm0, %v10458_v0 }
 0xed4   :  { %v4690_v4 = vpop.xlane.xlu1 %4689 }
 0xed5   :  { %10127 = vrcp.f32 %v4690_v4 }
 0xed6   :  { %10129 = vrcp.f32 %v4693_v27 }
 0xed8   :  { %v3980_v8 = vpop.permute.xlu1 %3979  ;;  %v4696_v12 = vpop.xlane.xlu0 %4695 }
 0xed9   :  { %v4067_v26 = vcombine.low %v3968_v39, %v3980_v8  ;;  %v4068_v7 = vcombine.high %v3968_v39, %v3980_v8  ;;  %10131 = vrcp.f32 %v4696_v12 }
 0xedb   :  { %v4075_v10 = vrot.slane %v4067_v26, %v10674_v9  ;;  %v4082_v61 = vrot.slane %v4068_v7, %v10674_v9 }
 0xedc   :  { %v3974_v11 = vpop.permute.xlu0 %3973 }
 0xedd   :  { %v4051_v41 = vcombine.low %v11105_v52, %v3974_v11  ;;  %v4052_v63 = vcombine.high %v11105_v52, %v3974_v11 }
 0xedf   :  { %v4059_v38 = vrot.slane %v4051_v41, %v10674_v9  ;;  %v4066_v19 = vrot.slane %v4052_v63, %v10674_v9 }
 0xee1   :  { %v4083_v21 = vcombine.low %v4059_v38, %v4075_v10  ;;  %v4084_v22 = vcombine.high %v4059_v38, %v4075_v10  ;;  %v4099_v51 = vcombine.low %v4066_v19, %v4082_v61  ;;  %v4100_v23 = vcombine.high %v4066_v19, %v4082_v61 }
 0xee2   :  { %v10128_v53 = vpop.eup %10127 }
 0xee3   :  { %v4091_v18 = vrot.slane %v4083_v21, %v10676_v16  ;;  %v4098_v31 = vrot.slane %v4084_v22, %v10676_v16  ;;  %v4107_v52 = vrot.slane %v4099_v51, %v10676_v16  ;;  %v4114_v40 = vrot.slane %v4100_v23, %v10676_v16  ;;  %v10130_v36 = vpop.eup %10129 }
 0xee4   :  { %v4714_v47 = vmul.f32 %v10128_v53, %v11344_v54  ;;  %v4715_v20 = vmul.f32 %v10130_v36, %v11310_v28 }
 0xee5   :  { %v4187_v42 = vcombine.low %v4091_v18, %v4098_v31  ;;  %v8941_v59 = vcombine.high %v4091_v18, %v4098_v31  ;;  %v4203_v48 = vcombine.low %v4107_v52, %v4114_v40  ;;  %v8942_v32 = vcombine.high %v4107_v52, %v4114_v40  ;;  %v9938_v31 = vld [vmem:[#allocation11 + $0x70] sm:$0xff]   ;;  %v9939_v40 = vld [vmem:[#allocation11 + $0x68] sm:$0xff]  }
 0xee6   :  { %v4722_v15 = vpack.c.bf16 %v4714_v47, %v4714_v47  ;;  %v10132_v1 = vpop.eup %10131  ;;  %v4723_v12 = vpack.c.bf16 %v4715_v20, %v4715_v20 }
 0xee7   :  { %v4194_v60 = vrot.slane %v4187_v42, %v10674_v9  ;;  %v4202_v62 = vrot.slane %v8941_v59, %v10674_v9  ;;  %v4210_v50 = vrot.slane %v4203_v48, %v10674_v9  ;;  %v4218_v25 = vrot.slane %v8942_v32, %v10674_v9  ;;  %v9940_v32 = vld [vmem:[#allocation11 + $0x60] sm:$0xff]  }
 0xee8   :  { %9569 = vmatmul.mubr.msk.bf16.vlgmr.msra.gmra.mxu0 %vm1797_vm3, %v4722_v15  ;;  %v4716_v34 = vmul.f32 %v10132_v1, %v11348_v14 }
 0xee9   :  { %v4219_v57 = vcombine.low %v4194_v60, %v4202_v62  ;;  %v4235_v49 = vcombine.low %v4210_v50, %v4218_v25  ;;  %9580 = vmatprep.mubr.msk.bf16.mxu0 %vm10459_vm0, %v10458_v0  ;;  %v4220_v54 = vcombine.high %v4194_v60, %v4202_v62  ;;  %v4236_v39 = vcombine.high %v4210_v50, %v4218_v25  ;;  %v9941_v62 = vld [vmem:[#allocation11 + $0x58] sm:$0xff]   ;;  %v9942_v50 = vld [vmem:[#allocation11 + $0x50] sm:$0xff]  }
 0xeea   :  { %v4724_v26 = vpack.c.bf16 %v4716_v34, %v4716_v34 }
 0xeeb   :  { %v4227_v27 = vrot.slane %v4219_v57, %v10676_v16  ;;  %v4243_v3 = vrot.slane %v4235_v49, %v10676_v16  ;;  %v4234_v33 = vrot.slane %v4220_v54, %v10676_v16  ;;  %v4250_v37 = vrot.slane %v4236_v39, %v10676_v16 }
 0xeed   :  { %v4251_v5 = vcombine.low %v4227_v27, %v4243_v3  ;;  %v4252_v44 = vcombine.high %v4227_v27, %v4243_v3  ;;  %v4253_v56 = vcombine.low %v4234_v33, %v4250_v37  ;;  %v4254_v17 = vcombine.high %v4234_v33, %v4250_v37 }
 0xeef   :  { %v4259_v13 = vpack.c.bf16 %v4251_v5, %v4251_v5  ;;  %v4260_v6 = vpack.c.bf16 %v4252_v44, %v4252_v44  ;;  %v4261_v4 = vpack.c.bf16 %v4253_v56, %v4253_v56  ;;  %v4262_v8 = vpack.c.bf16 %v4254_v17, %v4254_v17 }
 0xef1   :  { %v4915_v35 = vsel %vm1897_vm4, %v4259_v13, 0  ;;  %v4961_v2 = vsel %vm1897_vm4, %v4260_v6, 0  ;;  %v5007_v28 = vsel %vm1897_vm4, %v4261_v4, 0  ;;  %v5053_v14 = vsel %vm1897_vm4, %v4262_v8, 0 }
 0xef2   :  { %9573 = vmatpush3.bf16.msra.mxu1 %v4915_v35  ;;  %9579 = vmatpush3.bf16.msra.mxu0 %v4961_v2 }
 0xef3   :  { %9584 = vmatprep.subr.bf16.mxu1 %v10458_v0  ;;  %9590 = vmatprep.subr.bf16.mxu0 %v10458_v0 }
 0xef5   :  { %9575 = vmatmul.mubr.msk.bf16.vlgmr.msra.gmra.mxu1 %vm1797_vm3, %v4723_v12  ;;  %9581 = vmatmul.mubr.msk.bf16.vlgmr.msra.gmra.mxu0 %vm1797_vm3, %v4724_v26 }
 0xef6   :  { %9585 = vmatpush3.bf16.msra.mxu1 %v5007_v28  ;;  %9591 = vmatpush3.bf16.msra.mxu0 %v5053_v14 }
 0xef7   :  { %9586 = vmatprep.mubr.msk.bf16.mxu1 %vm10459_vm0, %v10458_v0  ;;  %9592 = vmatprep.mubr.msk.bf16.mxu0 %vm10459_vm0, %v10458_v0 }
 0xef8   :  { %9596 = vmatprep.subr.bf16.mxu1 %v10458_v0 }
 0xf09   :  { %v4699_v7 = vpop.xlane.xlu1 %4698 }
 0xf0a   :  { %10133 = vrcp.f32 %v4699_v7 }
 0xf0d   :  { %v4702_v11 = vpop.xlane.xlu0 %4701 }
 0xf0e   :  { %10135 = vrcp.f32 %v4702_v11 }
 0xf17   :  { %v10134_v41 = vpop.eup %10133 }
 0xf18   :  { %v4717_v63 = vmul.f32 %v10134_v41, %v11359_v55  ;;  %v9937_v55 = vld [vmem:[#allocation11 + $0x78] sm:$0xff]  }
 0xf1a   :  { %v4725_v10 = vpack.c.bf16 %v4717_v63, %v4717_v63 }
 0xf1b   :  { %v10136_v61 = vpop.eup %10135 }
 0xf1c   :  { %9587 = vmatmul.mubr.msk.bf16.vlgmr.msra.gmra.mxu1 %vm1797_vm3, %v4725_v10  ;;  %v4718_v38 = vmul.f32 %v10136_v61, %v11363_v58 }
 0xf1d   :  { %9612 = vmatprep.mubr.msk.bf16.mxu1 %vm10459_vm0, %v10458_v0  ;;  %9597 = vmatpush3.bf16.msra.mxu1 %v9937_v55 }
 0xf1e   :  { %v4726_v19 = vpack.c.bf16 %v4718_v38, %v4718_v38  ;;  %9598 = vmatprep.subr.bf16.mxu1 %v10458_v0 }
 0xf20   :  { %9593 = vmatmul.mubr.msk.bf16.vlgmr.msra.gmra.mxu0 %vm1797_vm3, %v4726_v19 }
 0xf21   :  { %5699 = vmatprep.mubr.bf16.mxu0 %v10460_v29  ;;  %9599 = vmatpush3.bf16.msra.mxu1 %v9938_v31 }
 0xf22   :  { %9600 = vmatprep.subr.bf16.mxu1 %v10458_v0 }
 0xf25   :  { %9601 = vmatpush3.bf16.msra.mxu1 %v9939_v40 }
 0xf26   :  { %9602 = vmatprep.subr.bf16.mxu1 %v10458_v0 }
 0xf29   :  { %9603 = vmatpush3.bf16.msra.mxu1 %v9940_v32 }
 0xf2a   :  { %9604 = vmatprep.subr.bf16.mxu1 %v10458_v0 }
 0xf2d   :  { %9605 = vmatpush3.bf16.msra.mxu1 %v9941_v62 }
 0xf2e   :  { %9606 = vmatprep.subr.bf16.mxu1 %v10458_v0 }
 0xf31   :  { %9607 = vmatpush3.bf16.msra.mxu1 %v9942_v50 }
 0xf32   :  { %9608 = vmatprep.subr.bf16.mxu1 %v10458_v0 }
 0xf6e   :  { %v4767_v21 = vpop.f32.mrf.mxu1 }
 0xf70   :  { %v9552_v22 = vpop.f32.mrf.mxu1 }
 0xf72   :  { %v4770_v51 = vpop.f32.mrf.mxu1 }
 0xf74   :  { %v9553_v23 = vpop.f32.mrf.mxu1 }
 0xf77   :  { %v4813_v53 = vpop.f32.mrf.mxu0 }
 0xf79   :  { %v9558_v18 = vpop.f32.mrf.mxu0 }
 0xf7b   :  { %v4816_v58 = vpop.f32.mrf.mxu0 }
 0xf7d   :  { %v9559_v52 = vpop.f32.mrf.mxu0 }
 0xf7e   :  { %v4859_v47 = vpop.f32.mrf.mxu1 }
 0xf7f   :  { %v5095_v42 = vcombine.low %v4767_v21, %v4859_v47  ;;  %v5096_v59 = vcombine.high %v4767_v21, %v4859_v47 }
 0xf80   :  { %v9564_v48 = vpop.f32.mrf.mxu1 }
 0xf81   :  { %v5103_v39 = vrot.slane %v5095_v42, %v10674_v9  ;;  %v5110_v36 = vrot.slane %v5096_v59, %v10674_v9 }
 0xf82   :  { %v4862_v15 = vpop.f32.mrf.mxu1 }
 0xf84   :  { %v9565_v60 = vpop.f32.mrf.mxu1 }
 0xfa8   :  { %v4905_v25 = vpop.f32.mrf.mxu0 }
 0xfa9   :  { %v5111_v57 = vcombine.low %v4813_v53, %v4905_v25  ;;  %v5112_v49 = vcombine.high %v4813_v53, %v4905_v25 }
 0xfaa   :  { %v9570_v54 = vpop.f32.mrf.mxu0 }
 0xfab   :  { %v5119_v1 = vrot.slane %v5111_v57, %v10674_v9  ;;  %v5126_v27 = vrot.slane %v5112_v49, %v10674_v9 }
 0xfac   :  { %v4908_v3 = vpop.f32.mrf.mxu0 }
 0xfad   :  { %v5127_v33 = vcombine.low %v5103_v39, %v5119_v1  ;;  %v5128_v37 = vcombine.high %v5103_v39, %v5119_v1  ;;  %v5143_v5 = vcombine.low %v5110_v36, %v5126_v27  ;;  %v5144_v44 = vcombine.high %v5110_v36, %v5126_v27 }
 0xfae   :  { %v9571_v56 = vpop.f32.mrf.mxu0 }
 0xfaf   :  { %v5135_v17 = vrot.slane %v5127_v33, %v10676_v16  ;;  %v5142_v13 = vrot.slane %v5128_v37, %v10676_v16  ;;  %v5151_v6 = vrot.slane %v5143_v5, %v10676_v16  ;;  %v5158_v20 = vrot.slane %v5144_v44, %v10676_v16 }
 0xfb1   :  { %v5231_v34 = vcombine.low %v5135_v17, %v5142_v13  ;;  %v8959_v35 = vcombine.high %v5135_v17, %v5142_v13  ;;  %v5247_v2 = vcombine.low %v5151_v6, %v5158_v20  ;;  %v8960_v4 = vcombine.high %v5151_v6, %v5158_v20 }
 0xfb3   :  { %v5238_v8 = vrot.slane %v5231_v34, %v10674_v9  ;;  %v5246_v12 = vrot.slane %v8959_v35, %v10674_v9  ;;  %v5254_v26 = vrot.slane %v5247_v2, %v10674_v9  ;;  %v5262_v28 = vrot.slane %v8960_v4, %v10674_v9  ;;  %v9943_v35 = vld [vmem:[#allocation11 + $0x48] sm:$0xff]  }
 0xfb4   :  { %9609 = vmatpush3.bf16.msra.mxu1 %v9943_v35  ;;  %v9950_v35 = vld [vmem:[#allocation17 + $0xe4] ss:$8 sps:$4 sm:$0xff]  }
 0xfb5   :  { %v4951_v14 = vpop.f32.mrf.mxu1  ;;  %v4997_v7 = vpop.f32.mrf.mxu0  ;;  %v5264_v11 = vcombine.high %v5238_v8, %v5246_v12  ;;  %v5280_v41 = vcombine.high %v5254_v26, %v5262_v28  ;;  %v5263_v63 = vcombine.low %v5238_v8, %v5246_v12  ;;  %v5279_v10 = vcombine.low %v5254_v26, %v5262_v28  ;;  %9610 = vmatprep.subr.bf16.mxu1 %v10458_v0 }
 0xfb7   :  { %v9576_v61 = vpop.f32.mrf.mxu1  ;;  %v9582_v38 = vpop.f32.mrf.mxu0  ;;  %v11446_v19 = vrot.slane %v5264_v11, %v10676_v16  ;;  %v11449_v21 = vrot.slane %v5280_v41, %v10676_v16  ;;  %v11452_v22 = vrot.slane %v5263_v63, %v10676_v16  ;;  %v11455_v51 = vrot.slane %v5279_v10, %v10676_v16 }
 0xfb8   :  { %v9944_v61 = vld [vmem:[#allocation11 + $0x40] sm:$0xff]  }
 0xfb9   :  { %v4954_v23 = vpop.f32.mrf.mxu1  ;;  %v5000_v53 = vpop.f32.mrf.mxu0  ;;  %v5297_v55 = vcombine.low %v11446_v19, %v11449_v21  ;;  %v5295_v18 = vcombine.low %v11452_v22, %v11455_v51  ;;  %v5296_v31 = vcombine.high %v11452_v22, %v11455_v51  ;;  %v5298_v58 = vcombine.high %v11446_v19, %v11449_v21  ;;  %9611 = vmatpush3.bf16.msra.mxu1 %v9944_v61  ;;  %v9969_v61 = vld [vmem:[#allocation19 + $0xf8] sm:$0xff]  }
 0xfba   :  { %9244 = vmatprep.subr.bf16.mxu1 %v9969_v61 }
 0xfbb   :  { %v9577_v52 = vpop.f32.mrf.mxu1  ;;  %v9583_v40 = vpop.f32.mrf.mxu0 }
 0xfdc   :  { %v5043_v47 = vpop.f32.mrf.mxu1 }
 0xfdd   :  { %v5163_v59 = vcombine.low %v4951_v14, %v5043_v47  ;;  %v5164_v48 = vcombine.high %v4951_v14, %v5043_v47 }
 0xfde   :  { %v9588_v42 = vpop.f32.mrf.mxu1 }
 0xfdf   :  { %v5171_v57 = vrot.slane %v5163_v59, %v10674_v9  ;;  %v5178_v49 = vrot.slane %v5164_v48, %v10674_v9 }
 0xfe0   :  { %v5046_v32 = vpop.f32.mrf.mxu1  ;;  %v5089_v15 = vpop.f32.mrf.mxu0 }
 0xfe1   :  { %v5179_v60 = vcombine.low %v4997_v7, %v5089_v15  ;;  %v5180_v62 = vcombine.high %v4997_v7, %v5089_v15 }
 0xfe2   :  { %v9589_v50 = vpop.f32.mrf.mxu1  ;;  %v9594_v25 = vpop.f32.mrf.mxu0 }
 0xfe3   :  { %v5187_v54 = vrot.slane %v5179_v60, %v10674_v9  ;;  %v5194_v39 = vrot.slane %v5180_v62, %v10674_v9 }
 0xfe4   :  { %v5092_v36 = vpop.f32.mrf.mxu0 }
 0xfe5   :  { %v5195_v1 = vcombine.low %v5171_v57, %v5187_v54  ;;  %v5196_v27 = vcombine.high %v5171_v57, %v5187_v54  ;;  %v5211_v3 = vcombine.low %v5178_v49, %v5194_v39  ;;  %v5212_v33 = vcombine.high %v5178_v49, %v5194_v39  ;;  %v8963_v39 = vld [vmem:[#allocation13 + $0x1] ss:$0 sm:$0xff] }
 0xfe6   :  { %v9595_v37 = vpop.f32.mrf.mxu0 }
 0xfe7   :  { %v5203_v5 = vrot.slane %v5195_v1, %v10676_v16  ;;  %v5210_v44 = vrot.slane %v5196_v27, %v10676_v16  ;;  %v5219_v56 = vrot.slane %v5211_v3, %v10676_v16  ;;  %v5226_v17 = vrot.slane %v5212_v33, %v10676_v16  ;;  %v9945_v37 = vld [vmem:[#allocation17 + $0xf0] ss:$8 sps:$4 sm:$0xff]  }
 0xfe9   :  { %v5299_v13 = vcombine.low %v5203_v5, %v5210_v44  ;;  %v8961_v6 = vcombine.high %v5203_v5, %v5210_v44  ;;  %v5315_v20 = vcombine.low %v5219_v56, %v5226_v17  ;;  %v8962_v34 = vcombine.high %v5219_v56, %v5226_v17  ;;  %v9947_v5 = vld [vmem:[#allocation17 + $0xf4] ss:$8 sps:$4 sm:$0xff]  }
 0xfea   :  { %5667 = vmatprep.subr.bf16.mxu0 %v9947_v5 }
 0xfeb   :  { %v5306_v2 = vrot.slane %v5299_v13, %v10674_v9  ;;  %v5314_v4 = vrot.slane %v8961_v6, %v10674_v9  ;;  %v5322_v8 = vrot.slane %v5315_v20, %v10674_v9  ;;  %v5330_v12 = vrot.slane %v8962_v34, %v10674_v9  ;;  %5668 = vmatpush1.bf16.msra.mxu0 %v9945_v37  ;;  %v9948_v34 = vld [vmem:[#allocation17 + $0xe0] ss:$8 sps:$4 sm:$0xff]   ;;  %v8974_v37 = vld [vmem:[%s11995_s11 + $0x2] sm:$0x3] }
 0xfec   :  { %5669 = vmatprep.subr.bf16.mxu0 %v9950_v35 }
 0xfed   :  { %v5332_v26 = vcombine.high %v5306_v2, %v5314_v4  ;;  %v5348_v28 = vcombine.high %v5322_v8, %v5330_v12  ;;  %v5331_v14 = vcombine.low %v5306_v2, %v5314_v4  ;;  %v5347_v7 = vcombine.low %v5322_v8, %v5330_v12  ;;  %v9951_v2 = vld [vmem:[#allocation17 + $0xd0] ss:$8 sps:$4 sm:$0xff]   ;;  %v9953_v4 = vld [vmem:[#allocation17 + $0xd4] ss:$8 sps:$4 sm:$0xff]   ;;  %v9956_v8 = vld [vmem:[#allocation17 + $0xc4] ss:$8 sps:$4 sm:$0xff]  }
 0xfee   :  { %v9954_v12 = vld [vmem:[#allocation17 + $0xc0] ss:$8 sps:$4 sm:$0xff]  }
 0xfef   :  { %v5346_v11 = vrot.slane %v5332_v26, %v10676_v16  ;;  %v5362_v41 = vrot.slane %v5348_v28, %v10676_v16  ;;  %v5339_v63 = vrot.slane %v5331_v14, %v10676_v16  ;;  %v5355_v10 = vrot.slane %v5347_v7, %v10676_v16  ;;  %5670 = vmatpush1.bf16.msra.mxu0 %v9948_v34  ;;  %v9959_v26 = vld [vmem:[#allocation17 + $0xb4] ss:$8 sps:$4 sm:$0xff]   ;;  %v9957_v28 = vld [vmem:[#allocation17 + $0xb0] ss:$8 sps:$4 sm:$0xff]   ;;  %v9962_v14 = vld [vmem:[#allocation17 + $0xa4] ss:$8 sps:$4 sm:$0xff]  }
 0xff0   :  { %5671 = vmatprep.subr.bf16.mxu0 %v9953_v4  ;;  %v9960_v7 = vld [vmem:[#allocation17 + $0xa0] ss:$8 sps:$4 sm:$0xff]  }
 0xff1   :  { %v5365_v38 = vcombine.low %v5346_v11, %v5362_v41  ;;  %v5364_v19 = vcombine.high %v5339_v63, %v5355_v10  ;;  %v5363_v21 = vcombine.low %v5339_v63, %v5355_v10  ;;  %v5366_v52 = vcombine.high %v5346_v11, %v5362_v41  ;;  %v9965_v11 = vld [vmem:[#allocation17 + $0x94] ss:$8 sps:$4 sm:$0xff]   ;;  %v9963_v41 = vld [vmem:[#allocation17 + $0x90] ss:$8 sps:$4 sm:$0xff]   ;;  %v9968_v63 = vld [vmem:[#allocation17 + $0x84] ss:$8 sps:$4 sm:$0xff]  }
 0xff2   :  { %v9966_v10 = vld [vmem:[#allocation17 + $0x80] ss:$8 sps:$4 sm:$0xff]  }
 0xff3   :  { %v9799_v23 = vpack.i.bf16 %v5365_v38, %v5297_v55  ;;  %v9794_v53 = vpack.i.bf16 %v5364_v19, %v5296_v31  ;;  %v9804_v40 = vpack.i.bf16 %v5366_v52, %v5298_v58  ;;  %5672 = vmatpush1.bf16.msra.mxu0 %v9951_v2  ;;  %v9970_v38 = vld [vmem:[#allocation19 + $0xb8] sm:$0xff]   ;;  %v9971_v19 = vld [vmem:[#allocation19 + $0xf0] sm:$0xff]   ;;  %v9975_v52 = vld [vmem:[#allocation19 + $0xe0] sm:$0xff]  }
 0xff4   :  { %5673 = vmatprep.subr.bf16.mxu0 %v9956_v8 }
 0xff5   :  { %9800 = vrot.lane.b32.xlu1 %v9799_v23, %s10442_s1  ;;  %9795 = vrot.lane.b32.xlu0 %v9794_v53, %s10461_s20  ;;  %v9973_v23 = vld [vmem:[#allocation19 + $0xe8] sm:$0xff]  }
 0xff6   :  { %v9974_v53 = vld [vmem:[#allocation19 + $0xa8] sm:$0xff]  }
 0xff7   :  { %5674 = vmatpush1.bf16.msra.mxu0 %v9954_v12 }
 0xff8   :  { %5675 = vmatprep.subr.bf16.mxu0 %v9959_v26 }
 0xff9   :  { %9805 = vrot.lane.b32.xlu1 %v9804_v40, %s10462_s26  ;;  %v9976_v40 = vld [vmem:[#allocation19 + $0xa0] sm:$0xff]  }
 0xffb   :  { %5676 = vmatpush1.bf16.msra.mxu0 %v9957_v28 }
 0xffc   :  { %5677 = vmatprep.subr.bf16.mxu0 %v9962_v14  ;;  %v8992_v14 = vld [vmem:[%s11997_s13 + $0x1] ss:$0 sm:$0xff] }
 0xfff   :  { %5678 = vmatpush1.bf16.msra.mxu0 %v9960_v7 }
0x1000   :  { %5679 = vmatprep.subr.bf16.mxu0 %v9965_v11 }
0x1003   :  { %5680 = vmatpush1.bf16.msra.mxu0 %v9963_v41 }
0x1004   :  { %5681 = vmatprep.subr.bf16.mxu0 %v9968_v63 }
0x1007   :  { %5682 = vmatpush1.bf16.msra.mxu0 %v9966_v10 }
0x1067   :  { %v9801_v47 = vpop.permute.xlu1 %9800  ;;  %v9796_v42 = vpop.permute.xlu0 %9795 }
0x1068   :  { %v9798_v59 = vunpack.i.h.bf16 %v9796_v42  ;;  %v9797_v48 = vunpack.i.l.bf16 %v9796_v42  ;;  %v9803_v32 = vunpack.i.h.bf16 %v9801_v47  ;;  %v9802_v15 = vunpack.i.l.bf16 %v9801_v47  ;;  %v9977_v47 = vld [vmem:[#allocation19 + $0xd8] sm:$0xff]  }
0x1069   :  { %v9978_v42 = vld [vmem:[#allocation19 + $0x98] sm:$0xff]  }
0x106a   :  { %v5391_v55 = vsel %vm1428_vm2, %v5295_v18, %v9797_v48  ;;  %v5392_v31 = vsel %vm1428_vm2, %v5363_v21, %v9798_v59  ;;  %v9972_v21 = vld [vmem:[#allocation19 + $0xb0] sm:$0xff]  }
0x106b   :  { %v9806_v60 = vpop.permute.xlu1 %9805  ;;  %v5393_v58 = vsel %vm2561_vm5, %v5391_v55, %v9802_v15  ;;  %v5394_v25 = vsel %vm2561_vm5, %v5392_v31, %v9803_v32 }
0x106c   :  { %v9808_v62 = vunpack.i.h.bf16 %v9806_v60  ;;  %v9807_v50 = vunpack.i.l.bf16 %v9806_v60 }
0x106e   :  { %v5395_v57 = vsel %vm2564_vm6, %v5393_v58, %v9807_v50  ;;  %v5396_v49 = vsel %vm2564_vm6, %v5394_v25, %v9808_v62  ;;  %v8972_v50 = vld [vmem:[#allocation14 + $0x1] ss:$0 sm:$0xff] }
0x106f   :  { %v5397_v54 = vpack.c.bf16 %v5396_v49, %v5395_v57  ;;  %v8973_v49 = vld [vmem:[#allocation16 + $0x1] ss:$0 sm:$0xff] }
0x1071   :  { %9613 = vmatmul.mubr.bf16.vlgmr.msra.gmra.mxu1 %v5397_v54 }
0x1072   :  { %9245 = vmatpush3.bf16.msra.mxu1 %v9970_v38 }
0x1073   :  { %9246 = vmatprep.subr.bf16.mxu1 %v9971_v19 }
0x1076   :  { %9247 = vmatpush3.bf16.msra.mxu1 %v9972_v21 }
0x1077   :  { %9248 = vmatprep.subr.bf16.mxu1 %v9973_v23  ;;  %v9985_v23 = vld [vmem:[#allocation10 + $0x228] ss:$12 sps:$4 sm:$0xff]  }
0x107a   :  { %9249 = vmatpush3.bf16.msra.mxu1 %v9974_v53  ;;  %v9987_v53 = vld [vmem:[#allocation10 + $0x22c] ss:$12 sps:$4 sm:$0xff]  }
0x107b   :  { %9250 = vmatprep.subr.bf16.mxu1 %v9975_v52  ;;  %v9988_v52 = vld [vmem:[#allocation10 + $0x230] ss:$12 sps:$4 sm:$0xff]   ;;  %6118 = vmatprep.subr.bf16.mxu0 %v9987_v53 }
0x107e   :  { %9251 = vmatpush3.bf16.msra.mxu1 %v9976_v40 }
0x107f   :  { %9252 = vmatprep.subr.bf16.mxu1 %v9977_v47 }
0x1082   :  { %9253 = vmatpush3.bf16.msra.mxu1 %v9978_v42 }
0x1131   :  { %v5505_v36 = vpop.f32.mrf.mxu1 }
0x1132   :  { %v5506_v22 = vadd.f32 %v8963_v39, %v5505_v36 }
0x1133   :  { %v9614_v51 = vpop.f32.mrf.mxu1 }
0x1134   :  { %v5512_v18 = vadd.f32 %v5506_v22, %v11084_v24  ;;  %v9979_v51 = vld [vmem:[#allocation19 + $0xd0] sm:$0xff]  }
0x1135   :  { %v5508_v1 = vpop.f32.mrf.mxu1  ;;  %9254 = vmatprep.subr.bf16.mxu1 %v9979_v51  ;;  %v10007_v51 = vld [vmem:[#allocation10 + $0x1b4] ss:$12 sps:$4 sm:$0xff]  }
0x1136   :  { %v5509_v27 = vadd.f32 %v8963_v39, %v5508_v1  ;;  %5518 = vadd.xlane.f32.xlu0 %v5512_v18  ;;  %v9981_v1 = vld [vmem:[#allocation19 + $0xc8] sm:$0xff]  }
0x1137   :  { %v9615_v3 = vpop.f32.mrf.mxu1 }
0x1138   :  { %v5513_v33 = vadd.f32 %v5509_v27, %v11086_v30  ;;  %v9982_v27 = vld [vmem:[#allocation19 + $0x88] sm:$0xff]   ;;  %v9983_v3 = vld [vmem:[#allocation19 + $0xc0] sm:$0xff]  }
0x113a   :  { %5520 = vadd.xlane.f32.xlu1 %v5513_v33 }
0x11bf   :  { %v5519_v44 = vpop.xlane.xlu0 %5518 }
0x11c0   :  { %v5522_v56 = vmul.f32 0.0078125, %v5519_v44  ;;  %v5584_v44 = vrot.slane %v8974_v37, %v10634_v43 }
0x11c2   :  { %v11496_v17 = vsub.f32 %v5512_v18, %v5522_v56  ;;  %v9980_v18 = vld [vmem:[#allocation19 + $0x90] sm:$0xff]   ;;  %v5580_v56 = vrot.slane %v8974_v37, %v10639_v45  ;;  %v10015_v37 = vld [vmem:[#allocation10 + $0x184] ss:$12 sps:$4 sm:$0xff]  }
0x11c3   :  { %v5521_v13 = vpop.xlane.xlu1 %5520  ;;  %9255 = vmatpush3.bf16.msra.mxu1 %v9980_v18  ;;  %v10008_v18 = vld [vmem:[#allocation10 + $0x1b8] ss:$12 sps:$4 sm:$0xff]  }
0x11c4   :  { %v5523_v6 = vmul.f32 0.0078125, %v5521_v13  ;;  %v5526_v24 = vmul.f32 %v11496_v17, %v11496_v17  ;;  %9256 = vmatprep.subr.bf16.mxu1 %v9981_v1  ;;  %v10005_v1 = vld [vmem:[#allocation10 + $0x1b0] ss:$12 sps:$4 sm:$0xff]  }
0x11c6   :  { %v11500_v20 = vsub.f32 %v5513_v33, %v5523_v6  ;;  %5528 = vadd.xlane.f32.xlu0 %v5526_v24  ;;  %v9984_v33 = vld [vmem:[#allocation19 + $0x80] sm:$0xff]  }
0x11c7   :  { %9257 = vmatpush3.bf16.msra.mxu1 %v9982_v27  ;;  %v10011_v27 = vld [vmem:[#allocation10 + $0x19c] ss:$12 sps:$4 sm:$0xff]  }
0x11c8   :  { %v5527_v30 = vmul.f32 %v11500_v20, %v11500_v20  ;;  %9258 = vmatprep.subr.bf16.mxu1 %v9983_v3  ;;  %v10012_v3 = vld [vmem:[#allocation10 + $0x1a0] ss:$12 sps:$4 sm:$0xff]  }
0x11ca   :  { %5530 = vadd.xlane.f32.xlu0 %v5527_v30 }
0x11cb   :  { %9259 = vmatpush3.bf16.msra.mxu1 %v9984_v33  ;;  %v10009_v33 = vld [vmem:[#allocation10 + $0x198] ss:$12 sps:$4 sm:$0xff]  }
0x11cc   :  { %9616 = vmatprep.subr.bf16.mxu1 %v10458_v0 }
0x124f   :  { %v5529_v59 = vpop.xlane.xlu0 %5528 }
0x1250   :  { %v5532_v48 = vmul.f32 0.0078125, %v5529_v59 }
0x1252   :  { %v5534_v32 = vadd.f32 1e-05, %v5532_v48 }
0x1253   :  { %v5531_v15 = vpop.xlane.xlu0 %5530 }
0x1254   :  { %10137 = vrsqrt.f32 %v5534_v32  ;;  %v5533_v55 = vmul.f32 0.0078125, %v5531_v15 }
0x1256   :  { %v5535_v31 = vadd.f32 1e-05, %v5533_v55 }
0x1258   :  { %10139 = vrsqrt.f32 %v5535_v31  ;;  %v9989_v31 = vld [vmem:[#allocation10 + $0x210] ss:$12 sps:$4 sm:$0xff]  }
0x1261   :  { %v10138_v60 = vpop.eup %10137 }
0x1262   :  { %v5538_v62 = vmul.f32 %v10138_v60, %v11496_v17  ;;  %v9991_v60 = vld [vmem:[#allocation10 + $0x214] ss:$12 sps:$4 sm:$0xff]  }
0x1264   :  { %v5546_v57 = vmul.f32 %v8972_v50, %v5538_v62  ;;  %v9992_v62 = vld [vmem:[#allocation10 + $0x218] ss:$12 sps:$4 sm:$0xff]  }
0x1265   :  { %v10140_v58 = vpop.eup %10139 }
0x1266   :  { %v5539_v25 = vmul.f32 %v10140_v58, %v11500_v20  ;;  %v5554_v39 = vadd.f32 %v8973_v49, %v5546_v57  ;;  %v9995_v58 = vld [vmem:[#allocation10 + $0x1fc] ss:$12 sps:$4 sm:$0xff]   ;;  %v9999_v57 = vld [vmem:[#allocation10 + $0x1e4] ss:$12 sps:$4 sm:$0xff]  }
0x1268   :  { %v5547_v54 = vmul.f32 %v8972_v50, %v5539_v25  ;;  %v9993_v50 = vld [vmem:[#allocation10 + $0x1f8] ss:$12 sps:$4 sm:$0xff]   ;;  %v9996_v25 = vld [vmem:[#allocation10 + $0x200] ss:$12 sps:$4 sm:$0xff]  }
0x126a   :  { %v5555_v36 = vadd.f32 %v8973_v49, %v5547_v54  ;;  %v10000_v49 = vld [vmem:[#allocation10 + $0x1e8] ss:$12 sps:$4 sm:$0xff]   ;;  %v9997_v54 = vld [vmem:[#allocation10 + $0x1e0] ss:$12 sps:$4 sm:$0xff]  }
0x126c   :  { %v5556_v22 = vpack.c.bf16 %v5555_v36, %v5554_v39 }
0x126e   :  { %5700 = vmatmul.mubr.bf16.vlgmr.msra.gmra.mxu0 %v5556_v22  ;;  %v10001_v22 = vld [vmem:[#allocation10 + $0x1c8] ss:$12 sps:$4 sm:$0xff]  }
0x126f   :  { %6150 = vmatprep.mubr.bf16.mxu0 %v10460_v29  ;;  %6119 = vmatpush1.bf16.msra.mxu0 %v9985_v23 }
0x1270   :  { %6120 = vmatprep.subr.bf16.mxu0 %v9991_v60 }
0x1273   :  { %6121 = vmatpush1.bf16.msra.mxu0 %v9989_v31 }
0x1274   :  { %6122 = vmatprep.subr.bf16.mxu0 %v9995_v58 }
0x1277   :  { %6123 = vmatpush1.bf16.msra.mxu0 %v9993_v50 }
0x1278   :  { %6124 = vmatprep.subr.bf16.mxu0 %v9999_v57 }
0x127b   :  { %6125 = vmatpush1.bf16.msra.mxu0 %v9997_v54 }
0x132e   :  { %v5701_v5 = vpop.f32.mrf.mxu0 }
0x132f   :  { %v5702_v20 = vadd.f32 %v5701_v5, %v5580_v56  ;;  %v10016_v5 = vld [vmem:[#allocation10 + $0x188] ss:$12 sps:$4 sm:$0xff]  }
0x1330   :  { %v5703_v17 = vpop.f32.mrf.mxu0 }
0x1331   :  { %v5704_v6 = vadd.f32 %v5703_v17, %v5584_v44  ;;  %v5710_v8 = vmax.f32 %v5702_v20, 0.0 }
0x1332   :  { %v5705_v13 = vpop.f32.mrf.mxu0 }
0x1333   :  { %v5706_v24 = vadd.f32 %v5705_v13, %v5580_v56  ;;  %v5711_v2 = vmax.f32 %v5704_v6, 0.0 }
0x1334   :  { %v5707_v30 = vpop.f32.mrf.mxu0 }
0x1335   :  { %v5708_v34 = vadd.f32 %v5707_v30, %v5584_v44  ;;  %v5712_v35 = vmax.f32 %v5706_v24, 0.0  ;;  %v10013_v44 = vld [vmem:[#allocation10 + $0x180] ss:$12 sps:$4 sm:$0xff]  }
0x1337   :  { %v5713_v4 = vmax.f32 %v5708_v34, 0.0  ;;  %v5714_v26 = vpack.c.bf16 %v5712_v35, %v5710_v8  ;;  %v9011_v35 = vld [vmem:[%s11998_s14 + $0x1] ss:$0 sm:$0xff] }
0x1339   :  { %v5715_v12 = vpack.c.bf16 %v5713_v4, %v5711_v2 }
0x133b   :  { %5885 = vmatprep.mubr.bf16.mxu1 %v5715_v12  ;;  %v9012_v12 = vld [vmem:[%s11999_s15 + $0x1] ss:$0 sm:$0xff] }
0x133c   :  { %5886 = vmatmul.mubr.bf16.vlgmr.msra.gmra.mxu1 %v5714_v26 }
0x133d   :  { %9632 = vmatprep.mubr.msk.bf16.mxu1 %vm10459_vm0, %v10458_v0  ;;  %9617 = vmatpush3.bf16.msra.mxu1 %v9988_v52 }
0x133e   :  { %9618 = vmatprep.subr.bf16.mxu1 %v10458_v0 }
0x1341   :  { %9619 = vmatpush3.bf16.msra.mxu1 %v9992_v62 }
0x1342   :  { %9620 = vmatprep.subr.bf16.mxu1 %v10458_v0 }
0x1345   :  { %9621 = vmatpush3.bf16.msra.mxu1 %v9996_v25 }
0x1346   :  { %9622 = vmatprep.subr.bf16.mxu1 %v10458_v0 }
0x1349   :  { %9623 = vmatpush3.bf16.msra.mxu1 %v10000_v49 }
0x134a   :  { %9624 = vmatprep.subr.bf16.mxu1 %v10458_v0 }
0x13fc   :  { %v9260_v28 = vpop.f32.mrf.mxu1 }
0x13fe   :  { %v9261_v7 = vpop.f32.mrf.mxu1 }
0x13ff   :  { %v9262_v11 = vadd.f32 %v9261_v7, %v9260_v28 }
0x1400   :  { %v9263_v41 = vpop.f32.mrf.mxu1 }
0x1401   :  { %v5888_v63 = vadd.f32 %v9262_v11, %v8992_v14  ;;  %v9013_v11 = vld [vmem:[%s11989_s5 + $0x6] sm:$0x7] }
0x1402   :  { %v9264_v10 = vpop.f32.mrf.mxu1 }
0x1403   :  { %v9265_v61 = vadd.f32 %v9264_v10, %v9263_v41  ;;  %v5894_v38 = vadd.f32 %v5888_v63, %v5554_v39  ;;  %v10003_v39 = vld [vmem:[#allocation10 + $0x1cc] ss:$12 sps:$4 sm:$0xff]   ;;  %v5982_v41 = vrot.slane %v9013_v11, %v10634_v43 }
0x1404   :  { %6126 = vmatprep.subr.bf16.mxu0 %v10003_v39 }
0x1405   :  { %v5891_v19 = vadd.f32 %v9265_v61, %v8992_v14  ;;  %5900 = vadd.xlane.f32.xlu1 %v5894_v38  ;;  %6127 = vmatpush1.bf16.msra.mxu0 %v10001_v22 }
0x1406   :  { %6128 = vmatprep.subr.bf16.mxu0 %v10007_v51 }
0x1407   :  { %v5895_v21 = vadd.f32 %v5891_v19, %v5555_v36  ;;  %v10004_v36 = vld [vmem:[#allocation10 + $0x1d0] ss:$12 sps:$4 sm:$0xff]   ;;  %v5978_v19 = vrot.slane %v9013_v11, %v10639_v45 }
0x1408   :  { %9625 = vmatpush3.bf16.msra.mxu1 %v10004_v36 }
0x1409   :  { %5902 = vadd.xlane.f32.xlu0 %v5895_v21  ;;  %9626 = vmatprep.subr.bf16.mxu1 %v10458_v0 }
0x140a   :  { %6129 = vmatpush1.bf16.msra.mxu0 %v10005_v1 }
0x140b   :  { %6130 = vmatprep.subr.bf16.mxu0 %v10011_v27 }
0x140c   :  { %9627 = vmatpush3.bf16.msra.mxu1 %v10008_v18 }
0x140d   :  { %9628 = vmatprep.subr.bf16.mxu1 %v10458_v0 }
0x140e   :  { %6131 = vmatpush1.bf16.msra.mxu0 %v10009_v33 }
0x140f   :  { %6132 = vmatprep.subr.bf16.mxu0 %v10015_v37 }
0x1410   :  { %9629 = vmatpush3.bf16.msra.mxu1 %v10012_v3 }
0x1411   :  { %9630 = vmatprep.subr.bf16.mxu1 %v10458_v0 }
0x1412   :  { %6133 = vmatpush1.bf16.msra.mxu0 %v10013_v44 }
0x1413   :  { %9636 = vmatprep.subr.bf16.mxu0 %v10458_v0 }
0x1414   :  { %9631 = vmatpush3.bf16.msra.mxu1 %v10016_v5 }
0x1415   :  { %9660 = vmatprep.subr.bf16.mxu1 %v10458_v0 }
0x148e   :  { %v5901_v40 = vpop.xlane.xlu1 %5900 }
0x148f   :  { %v5904_v47 = vmul.f32 0.0078125, %v5901_v40 }
0x1491   :  { %v11519_v42 = vsub.f32 %v5894_v38, %v5904_v47 }
0x1492   :  { %v5903_v59 = vpop.xlane.xlu0 %5902 }
0x1493   :  { %v5905_v48 = vmul.f32 0.0078125, %v5903_v59  ;;  %v5908_v32 = vmul.f32 %v11519_v42, %v11519_v42 }
0x1495   :  { %v11523_v15 = vsub.f32 %v5895_v21, %v5905_v48  ;;  %5910 = vadd.xlane.f32.xlu1 %v5908_v32  ;;  %v5986_v21 = vrot.slane %v9013_v11, %v10641_v46 }
0x1497   :  { %v5909_v55 = vmul.f32 %v11523_v15, %v11523_v15 }
0x1499   :  { %5912 = vadd.xlane.f32.xlu0 %v5909_v55 }
0x151e   :  { %v5911_v56 = vpop.xlane.xlu1 %5910 }
0x151f   :  { %v5914_v17 = vmul.f32 0.0078125, %v5911_v56 }
0x1521   :  { %v5916_v13 = vadd.f32 1e-05, %v5914_v17 }
0x1522   :  { %v5913_v6 = vpop.xlane.xlu0 %5912 }
0x1523   :  { %10141 = vrsqrt.f32 %v5916_v13  ;;  %v5915_v24 = vmul.f32 0.0078125, %v5913_v6 }
0x1525   :  { %v5917_v20 = vadd.f32 1e-05, %v5915_v24 }
0x1527   :  { %10143 = vrsqrt.f32 %v5917_v20 }
0x1530   :  { %v10142_v30 = vpop.eup %10141 }
0x1531   :  { %v5920_v34 = vmul.f32 %v10142_v30, %v11519_v42 }
0x1533   :  { %v5928_v8 = vmul.f32 %v9011_v35, %v5920_v34 }
0x1534   :  { %v10144_v2 = vpop.eup %10143 }
0x1535   :  { %v5921_v4 = vmul.f32 %v10144_v2, %v11523_v15  ;;  %v11543_v28 = vadd.f32 %v9012_v12, %v5928_v8 }
0x1537   :  { %v5929_v26 = vmul.f32 %v9011_v35, %v5921_v4 }
0x1539   :  { %v11545_v14 = vadd.f32 %v9012_v12, %v5929_v26 }
0x153b   :  { %v5938_v7 = vpack.c.bf16 %v11545_v14, %v11543_v28 }
0x153d   :  { %6151 = vmatmul.mubr.bf16.vlgmr.msra.gmra.mxu0 %v5938_v7  ;;  %9633 = vmatmul.mubr.bf16.vlgmr.msra.gmra.mxu1 %v5938_v7 }
0x153e   :  { %9638 = vmatprep.mubr.msk.bf16.mxu0 %vm10459_vm0, %v10458_v0  ;;  %9662 = vmatprep.mubr.msk.bf16.mxu1 %vm10459_vm0, %v10458_v0 }
0x15fd   :  { %v6152_v63 = vpop.f32.mrf.mxu0  ;;  %v6195_v10 = vpop.f32.mrf.mxu1 }
0x15fe   :  { %v6153_v42 = vadd.f32 %v6152_v63, %v5978_v19  ;;  %v11583_v32 = vadd.f32 %v6195_v10, %v5986_v21 }
0x15ff   :  { %v6154_v61 = vpop.f32.mrf.mxu0  ;;  %v9634_v38 = vpop.f32.mrf.mxu1 }
0x1600   :  { %v6155_v23 = vadd.f32 %v6154_v61, %v5982_v41 }
0x1601   :  { %v6156_v53 = vpop.f32.mrf.mxu0  ;;  %v6198_v52 = vpop.f32.mrf.mxu1 }
0x1602   :  { %v11559_v40 = vadd.f32 %v6198_v52, %v5986_v21  ;;  %6510 = vrot.lane.b32.xlu0 %v6155_v23, %s10442_s1  ;;  %6504 = vrot.lane.b32.xlu1 %v6155_v23, %s10462_s26  ;;  %v11573_v46 = vadd.f32 %v6156_v53, %v5978_v19 }
0x1603   :  { %v9635_v47 = vpop.f32.mrf.mxu1  ;;  %v6158_v59 = vpop.f32.mrf.mxu0 }
0x1604   :  { %v11565_v48 = vadd.f32 %v6158_v59, %v5982_v41 }
0x1606   :  { %6516 = vrot.lane.b32.xlu1 %v6155_v23, %s10461_s20  ;;  %6210 = vrot.lane.b32.xlu0 %v6153_v42, %s10442_s1 }
0x160a   :  { %6506 = vrot.lane.b32.xlu0 %v11565_v48, %s10462_s26  ;;  %6204 = vrot.lane.b32.xlu1 %v6153_v42, %s10462_s26 }
0x160e   :  { %6518 = vrot.lane.b32.xlu0 %v11565_v48, %s10461_s20  ;;  %6216 = vrot.lane.b32.xlu1 %v6153_v42, %s10461_s20 }
0x1612   :  { %6212 = vrot.lane.b32.xlu0 %v11573_v46, %s10442_s1  ;;  %6512 = vrot.lane.b32.xlu1 %v11565_v48, %s10442_s1 }
0x1616   :  { %6206 = vrot.lane.b32.xlu1 %v11573_v46, %s10462_s26 }
0x161a   :  { %6218 = vrot.lane.b32.xlu1 %v11573_v46, %s10461_s20 }
0x161e   :  { %6804 = vrot.lane.b32.xlu1 %v11583_v32, %s10462_s26 }
0x1674   :  { %v6511_v15 = vpop.permute.xlu0 %6510  ;;  %v6505_v55 = vpop.permute.xlu1 %6504 }
0x1675   :  { %v6522_v31 = vcombine.low %v6155_v23, %v6511_v15  ;;  %v6523_v60 = vcombine.high %v6155_v23, %v6511_v15 }
0x1677   :  { %v6530_v57 = vrot.slane %v6522_v31, %v10674_v9  ;;  %v6537_v49 = vrot.slane %v6523_v60, %v10674_v9 }
0x1678   :  { %v6517_v62 = vpop.permute.xlu1 %6516  ;;  %v6211_v50 = vpop.permute.xlu0 %6210 }
0x1679   :  { %v6538_v58 = vcombine.low %v6505_v55, %v6517_v62  ;;  %v6539_v25 = vcombine.high %v6505_v55, %v6517_v62  ;;  %v6222_v3 = vcombine.low %v6153_v42, %v6211_v50  ;;  %v6223_v33 = vcombine.high %v6153_v42, %v6211_v50 }
0x167b   :  { %v6546_v54 = vrot.slane %v6538_v58, %v10674_v9  ;;  %v6553_v39 = vrot.slane %v6539_v25, %v10674_v9  ;;  %v6230_v8 = vrot.slane %v6222_v3, %v10674_v9  ;;  %v6237_v12 = vrot.slane %v6223_v33, %v10674_v9 }
0x167c   :  { %v6507_v36 = vpop.permute.xlu0 %6506  ;;  %v6205_v22 = vpop.permute.xlu1 %6204 }
0x167d   :  { %v6554_v51 = vcombine.low %v6530_v57, %v6546_v54  ;;  %v6555_v18 = vcombine.high %v6530_v57, %v6546_v54  ;;  %v6570_v1 = vcombine.low %v6537_v49, %v6553_v39  ;;  %v6571_v27 = vcombine.high %v6537_v49, %v6553_v39 }
0x167f   :  { %v6562_v37 = vrot.slane %v6554_v51, %v10676_v16  ;;  %v6569_v5 = vrot.slane %v6555_v18, %v10676_v16  ;;  %v6578_v44 = vrot.slane %v6570_v1, %v10676_v16  ;;  %v6585_v56 = vrot.slane %v6571_v27, %v10676_v16 }
0x1680   :  { %v6519_v17 = vpop.permute.xlu0 %6518  ;;  %v6217_v13 = vpop.permute.xlu1 %6216 }
0x1681   :  { %v6658_v6 = vcombine.low %v6562_v37, %v6569_v5  ;;  %v9042_v24 = vcombine.high %v6562_v37, %v6569_v5  ;;  %v6674_v20 = vcombine.low %v6578_v44, %v6585_v56  ;;  %v9043_v30 = vcombine.high %v6578_v44, %v6585_v56 }
0x1682   :  { %v6606_v34 = vcombine.low %v6507_v36, %v6519_v17  ;;  %v6238_v35 = vcombine.low %v6205_v22, %v6217_v13  ;;  %v6239_v2 = vcombine.high %v6205_v22, %v6217_v13  ;;  %v6607_v26 = vcombine.high %v6507_v36, %v6519_v17 }
0x1683   :  { %v11596_v4 = vrot.slane %v6658_v6, %v10674_v9  ;;  %v11601_v7 = vrot.slane %v9042_v24, %v10674_v9  ;;  %v11604_v11 = vrot.slane %v6674_v20, %v10674_v9  ;;  %v11609_v38 = vrot.slane %v9043_v30, %v10674_v9 }
0x1684   :  { %v6246_v41 = vrot.slane %v6238_v35, %v10674_v9  ;;  %v6253_v63 = vrot.slane %v6239_v2, %v10674_v9  ;;  %v6213_v10 = vpop.permute.xlu0 %6212  ;;  %v6513_v61 = vpop.permute.xlu1 %6512  ;;  %v6614_v19 = vrot.slane %v6606_v34, %v10674_v9  ;;  %v6621_v59 = vrot.slane %v6607_v26, %v10674_v9 }
0x1685   :  { %v6590_v21 = vcombine.low %v11565_v48, %v6513_v61  ;;  %v6591_v23 = vcombine.high %v11565_v48, %v6513_v61  ;;  %v6290_v15 = vcombine.low %v11573_v46, %v6213_v10  ;;  %v6291_v56 = vcombine.high %v11573_v46, %v6213_v10 }
0x1686   :  { %v6254_v53 = vcombine.low %v6230_v8, %v6246_v41  ;;  %v6255_v52 = vcombine.high %v6230_v8, %v6246_v41  ;;  %v6270_v47 = vcombine.low %v6237_v12, %v6253_v63  ;;  %v6271_v42 = vcombine.high %v6237_v12, %v6253_v63 }
0x1687   :  { %v6598_v55 = vrot.slane %v6590_v21, %v10674_v9  ;;  %v6605_v31 = vrot.slane %v6591_v23, %v10674_v9  ;;  %v6298_v8 = vrot.slane %v6290_v15, %v10674_v9  ;;  %v6305_v46 = vrot.slane %v6291_v56, %v10674_v9 }
0x1688   :  { %v6262_v60 = vrot.slane %v6254_v53, %v10676_v16  ;;  %v6269_v62 = vrot.slane %v6255_v52, %v10676_v16  ;;  %v6278_v50 = vrot.slane %v6270_v47, %v10676_v16  ;;  %v6285_v48 = vrot.slane %v6271_v42, %v10676_v16  ;;  %v6207_v58 = vpop.permute.xlu1 %6206 }
0x1689   :  { %v6622_v25 = vcombine.low %v6598_v55, %v6614_v19  ;;  %v6623_v57 = vcombine.high %v6598_v55, %v6614_v19  ;;  %v6638_v49 = vcombine.low %v6605_v31, %v6621_v59  ;;  %v6639_v54 = vcombine.high %v6605_v31, %v6621_v59 }
0x168a   :  { %v6358_v39 = vcombine.low %v6262_v60, %v6269_v62  ;;  %v9038_v36 = vcombine.high %v6262_v60, %v6269_v62  ;;  %v6374_v22 = vcombine.low %v6278_v50, %v6285_v48  ;;  %v9039_v51 = vcombine.high %v6278_v50, %v6285_v48 }
0x168b   :  { %v6630_v18 = vrot.slane %v6622_v25, %v10676_v16  ;;  %v6637_v1 = vrot.slane %v6623_v57, %v10676_v16  ;;  %v6646_v27 = vrot.slane %v6638_v49, %v10676_v16  ;;  %v6653_v3 = vrot.slane %v6639_v54, %v10676_v16 }
0x168c   :  { %v11627_v33 = vrot.slane %v6358_v39, %v10674_v9  ;;  %v11630_v37 = vrot.slane %v9038_v36, %v10674_v9  ;;  %v11633_v5 = vrot.slane %v6374_v22, %v10674_v9  ;;  %v11636_v44 = vrot.slane %v9039_v51, %v10674_v9  ;;  %v6219_v24 = vpop.permute.xlu1 %6218 }
0x168d   :  { %v6726_v17 = vcombine.low %v6630_v18, %v6637_v1  ;;  %v9044_v13 = vcombine.high %v6630_v18, %v6637_v1  ;;  %v6742_v6 = vcombine.low %v6646_v27, %v6653_v3  ;;  %v9045_v30 = vcombine.high %v6646_v27, %v6653_v3 }
0x168e   :  { %v6390_v20 = vcombine.low %v11627_v33, %v11630_v37  ;;  %v6406_v34 = vcombine.low %v11633_v5, %v11636_v44  ;;  %v6306_v12 = vcombine.low %v6207_v58, %v6219_v24  ;;  %v6307_v26 = vcombine.high %v6207_v58, %v6219_v24 }
0x168f   :  { %v6733_v35 = vrot.slane %v6726_v17, %v10674_v9  ;;  %v6741_v2 = vrot.slane %v9044_v13, %v10674_v9  ;;  %v6749_v41 = vrot.slane %v6742_v6, %v10674_v9  ;;  %v6690_v63 = vcombine.low %v11596_v4, %v11601_v7 }
0x1690   :  { %v6706_v10 = vcombine.low %v11604_v11, %v11609_v38  ;;  %v6757_v61 = vrot.slane %v9045_v30, %v10674_v9  ;;  %v6314_v19 = vrot.slane %v6306_v12, %v10674_v9  ;;  %v6321_v21 = vrot.slane %v6307_v26, %v10674_v9 }
0x1691   :  { %v6398_v23 = vrot.slane %v6390_v20, %v10676_v16  ;;  %v6698_v53 = vrot.slane %v6690_v63, %v10676_v16  ;;  %v6414_v47 = vrot.slane %v6406_v34, %v10676_v16  ;;  %v6758_v42 = vcombine.low %v6733_v35, %v6741_v2 }
0x1692   :  { %v6714_v52 = vrot.slane %v6706_v10, %v10676_v16  ;;  %v6322_v59 = vcombine.low %v6298_v8, %v6314_v19  ;;  %v6323_v15 = vcombine.high %v6298_v8, %v6314_v19  ;;  %v6338_v55 = vcombine.low %v6305_v46, %v6321_v21 }
0x1693   :  { %v6339_v31 = vcombine.high %v6305_v46, %v6321_v21  ;;  %v6422_v57 = vcombine.low %v6398_v23, %v6414_v47  ;;  %v11664_v49 = vrot.slane %v6758_v42, %v10676_v16  ;;  %v6774_v54 = vcombine.low %v6749_v41, %v6757_v61 }
0x1694   :  { %v6722_v60 = vcombine.low %v6698_v53, %v6714_v52  ;;  %v6330_v62 = vrot.slane %v6322_v59, %v10676_v16  ;;  %v6337_v50 = vrot.slane %v6323_v15, %v10676_v16  ;;  %v6346_v48 = vrot.slane %v6338_v55, %v10676_v16 }
0x1695   :  { %v6353_v58 = vrot.slane %v6339_v31, %v10676_v16  ;;  %v6723_v1 = vcombine.high %v6698_v53, %v6714_v52  ;;  %v11668_v27 = vrot.slane %v6774_v54, %v10676_v16  ;;  %v6691_v24 = vcombine.high %v11596_v4, %v11601_v7 }
0x1696   :  { %v6794_v25 = vpack.c.bf16 %v6722_v60, %v6722_v60  ;;  %v6426_v39 = vcombine.low %v6330_v62, %v6337_v50  ;;  %v9040_v36 = vcombine.high %v6330_v62, %v6337_v50  ;;  %v6707_v20 = vcombine.high %v11604_v11, %v11609_v38 }
0x1697   :  { %v6442_v22 = vcombine.low %v6346_v48, %v6353_v58  ;;  %v9041_v51 = vcombine.high %v6346_v48, %v6353_v58  ;;  %v6790_v6 = vcombine.low %v11664_v49, %v11668_v27  ;;  %v6759_v30 = vcombine.high %v6733_v35, %v6741_v2 }
0x1698   :  { %v7106_v18 = vsel %vm1428_vm2, %v6794_v25, 0  ;;  %v6433_v3 = vrot.slane %v6426_v39, %v10674_v9  ;;  %v6441_v56 = vrot.slane %v9040_v36, %v10674_v9  ;;  %v6494_v12 = vpack.c.bf16 %v6422_v57, %v6422_v57 }
0x1699   :  { %v6449_v17 = vrot.slane %v6442_v22, %v10674_v9  ;;  %v6457_v13 = vrot.slane %v9041_v51, %v10674_v9  ;;  %9637 = vmatpush3.bf16.xpose.msra.mxu0 %v7106_v18  ;;  %v6795_v26 = vpack.c.bf16 %v6723_v1, %v6723_v1  ;;  %v6798_v46 = vpack.c.bf16 %v6790_v6, %v6790_v6 }
0x169a   :  { %9642 = vmatprep.subr.bf16.mxu0 %v10458_v0  ;;  %v6458_v34 = vcombine.low %v6433_v3, %v6441_v56  ;;  %v6705_v63 = vrot.slane %v6691_v24, %v10676_v16  ;;  %v6721_v10 = vrot.slane %v6707_v20, %v10676_v16  ;;  %v6773_v53 = vrot.slane %v6759_v30, %v10676_v16 }
0x169b   :  { %v6474_v8 = vcombine.low %v6449_v17, %v6457_v13  ;;  %v6775_v4 = vcombine.high %v6749_v41, %v6757_v61  ;;  %v7290_v7 = vsel %vm1428_vm2, %v6798_v46, 0  ;;  %v6459_v35 = vcombine.high %v6433_v3, %v6441_v56 }
0x169c   :  { %v6466_v19 = vrot.slane %v6458_v34, %v10676_v16  ;;  %9661 = vmatpush3.bf16.xpose.msra.mxu1 %v7290_v7  ;;  %v6475_v2 = vcombine.high %v6449_v17, %v6457_v13  ;;  %v7152_v52 = vsel %vm1428_vm2, %v6795_v26, 0  ;;  %v6724_v42 = vcombine.low %v6705_v63, %v6721_v10 }
0x169d   :  { %v6482_v21 = vrot.slane %v6474_v8, %v10676_v16  ;;  %v6789_v38 = vrot.slane %v6775_v4, %v10676_v16  ;;  %9672 = vmatprep.subr.bf16.mxu1 %v10458_v0  ;;  %v6391_v61 = vcombine.high %v11627_v33, %v11630_v37  ;;  %v6407_v59 = vcombine.high %v11633_v5, %v11636_v44 }
0x169e   :  { %v6423_v15 = vcombine.high %v6398_v23, %v6414_v47  ;;  %v6796_v60 = vpack.c.bf16 %v6724_v42, %v6724_v42  ;;  %v6473_v62 = vrot.slane %v6459_v35, %v10676_v16  ;;  %v6489_v50 = vrot.slane %v6475_v2, %v10676_v16 }
0x169f   :  { %v6490_v11 = vcombine.low %v6466_v19, %v6482_v21  ;;  %v6792_v41 = vcombine.low %v6773_v53, %v6789_v38  ;;  %v6405_v48 = vrot.slane %v6391_v61, %v10676_v16  ;;  %v6421_v58 = vrot.slane %v6407_v59, %v10676_v16 }
0x16a0   :  { %9639 = vmatmul.mubr.msk.bf16.vlgmr.msra.gmra.mxu0 %vm1428_vm2, %v6494_v12  ;;  %v6495_v25 = vpack.c.bf16 %v6423_v15, %v6423_v15  ;;  %v7198_v37 = vsel %vm1428_vm2, %v6796_v60, 0  ;;  %v6725_v5 = vcombine.high %v6705_v63, %v6721_v10  ;;  %v6492_v44 = vcombine.low %v6473_v62, %v6489_v50 }
0x16a1   :  { %9643 = vmatpush3.bf16.xpose.msra.mxu0 %v7152_v52  ;;  %9644 = vmatprep.mubr.msk.bf16.mxu0 %vm10459_vm0, %v10458_v0  ;;  %v6498_v55 = vpack.c.bf16 %v6490_v11, %v6490_v11  ;;  %v6800_v31 = vpack.c.bf16 %v6792_v41, %v6792_v41  ;;  %v6424_v23 = vcombine.low %v6405_v48, %v6421_v58 }
0x16a2   :  { %9648 = vmatprep.subr.bf16.mxu0 %v10458_v0  ;;  %v6797_v47 = vpack.c.bf16 %v6725_v5, %v6725_v5  ;;  %v6500_v57 = vpack.c.bf16 %v6492_v44, %v6492_v44  ;;  %v6791_v36 = vcombine.high %v11664_v49, %v11668_v27  ;;  %v6425_v22 = vcombine.high %v6405_v48, %v6421_v58 }
0x16a3   :  { %9663 = vmatmul.mubr.msk.bf16.vlgmr.msra.gmra.mxu1 %vm1428_vm2, %v6498_v55  ;;  %v7382_v33 = vsel %vm1428_vm2, %v6800_v31, 0  ;;  %v6496_v54 = vpack.c.bf16 %v6424_v23, %v6424_v23  ;;  %v6793_v3 = vcombine.high %v6773_v53, %v6789_v38  ;;  %v6491_v56 = vcombine.high %v6466_v19, %v6482_v21 }
0x16a4   :  { %9673 = vmatpush3.bf16.xpose.msra.mxu1 %v7382_v33  ;;  %9674 = vmatprep.mubr.msk.bf16.mxu1 %vm10459_vm0, %v10458_v0  ;;  %v7244_v39 = vsel %vm1428_vm2, %v6797_v47, 0  ;;  %v6799_v51 = vpack.c.bf16 %v6791_v36, %v6791_v36  ;;  %v6497_v18 = vpack.c.bf16 %v6425_v22, %v6425_v22  ;;  %v6493_v13 = vcombine.high %v6473_v62, %v6489_v50  ;;  %v6805_v36 = vpop.permute.xlu1 %6804 }
0x16a5   :  { %9684 = vmatprep.subr.bf16.mxu1 %v10458_v0  ;;  %v6801_v49 = vpack.c.bf16 %v6793_v3, %v6793_v3  ;;  %v6499_v27 = vpack.c.bf16 %v6491_v56, %v6491_v56 }
0x16a6   :  { %v7336_v1 = vsel %vm1428_vm2, %v6799_v51, 0  ;;  %v6501_v6 = vpack.c.bf16 %v6493_v13, %v6493_v13 }
0x16a7   :  { %v7428_v17 = vsel %vm1428_vm2, %v6801_v49, 0 }
0x16a8   :  { %9645 = vmatmul.mubr.msk.bf16.vlgmr.msra.gmra.mxu0 %vm1428_vm2, %v6495_v25 }
0x16a9   :  { %9649 = vmatpush3.bf16.xpose.msra.mxu0 %v7198_v37  ;;  %9650 = vmatprep.mubr.msk.bf16.mxu0 %vm10459_vm0, %v10458_v0 }
0x16aa   :  { %9654 = vmatprep.subr.bf16.mxu0 %v10458_v0 }
0x16ab   :  { %9675 = vmatmul.mubr.msk.bf16.vlgmr.msra.gmra.mxu1 %vm1428_vm2, %v6500_v57 }
0x16ac   :  { %9686 = vmatprep.mubr.msk.bf16.mxu1 %vm10459_vm0, %v10458_v0 }
0x16b0   :  { %9651 = vmatmul.mubr.msk.bf16.vlgmr.msra.gmra.mxu0 %vm1428_vm2, %v6496_v54 }
0x16b1   :  { %9655 = vmatpush3.bf16.xpose.msra.mxu0 %v7244_v39  ;;  %9656 = vmatprep.mubr.msk.bf16.mxu0 %vm10459_vm0, %v10458_v0 }
0x16b2   :  { %9666 = vmatprep.subr.bf16.mxu0 %v10458_v0 }
0x16b8   :  { %9657 = vmatmul.mubr.msk.bf16.vlgmr.msra.gmra.mxu0 %vm1428_vm2, %v6497_v18 }
0x16b9   :  { %9667 = vmatpush3.bf16.xpose.msra.mxu0 %v7336_v1  ;;  %9668 = vmatprep.mubr.msk.bf16.mxu0 %vm10459_vm0, %v10458_v0 }
0x16ba   :  { %9678 = vmatprep.subr.bf16.mxu0 %v10458_v0 }
0x16c0   :  { %9669 = vmatmul.mubr.msk.bf16.vlgmr.msra.gmra.mxu0 %vm1428_vm2, %v6499_v27 }
0x16c1   :  { %9679 = vmatpush3.bf16.xpose.msra.mxu0 %v7428_v17  ;;  %9680 = vmatprep.mubr.msk.bf16.mxu0 %vm10459_vm0, %v10458_v0 }
0x16c2   :  { %9690 = vmatprep.subr.bf16.mxu0 %v10458_v0 }
0x16c8   :  { %9681 = vmatmul.mubr.msk.bf16.vlgmr.msra.gmra.mxu0 %vm1428_vm2, %v6501_v6 }
0x16c9   :  { %9692 = vmatprep.mubr.msk.bf16.mxu0 %vm10459_vm0, %v10458_v0 }
0x1760   :  { %v7142_v24 = vpop.f32.mrf.mxu0 }
0x1761   :  { %v7470_v20 = vsel %vm1797_vm3, %v7142_v24, -inf }
0x1762   :  { %7471 = vmax.xlane.f32.xlu0 %v7470_v20  ;;  %v9640_v30 = vpop.f32.mrf.mxu0 }
0x1763   :  { %v7326_v12 = vpop.f32.mrf.mxu1 }
0x1764   :  { %v7145_v34 = vpop.f32.mrf.mxu0  ;;  %v7482_v26 = vsel %vm1797_vm3, %v7326_v12, -inf }
0x1765   :  { %7483 = vmax.xlane.f32.xlu1 %v7482_v26  ;;  %v9664_v63 = vpop.f32.mrf.mxu1 }
0x1766   :  { %v9641_v8 = vpop.f32.mrf.mxu0 }
0x1767   :  { %v7329_v19 = vpop.f32.mrf.mxu1 }
0x1768   :  { %v7188_v46 = vpop.f32.mrf.mxu0 }
0x1769   :  { %v7473_v21 = vsel %vm1797_vm3, %v7188_v46, -inf  ;;  %v9665_v4 = vpop.f32.mrf.mxu1 }
0x176a   :  { %v9646_v10 = vpop.f32.mrf.mxu0  ;;  %7474 = vmax.xlane.f32.xlu1 %v7473_v21 }
0x176b   :  { %v11738_v11 = vpop.f32.mrf.mxu1 }
0x176c   :  { %v7191_v53 = vpop.f32.mrf.mxu0  ;;  %v7488_v38 = vsel %vm1797_vm3, %v11738_v11, -inf }
0x176d   :  { %v9676_v2 = vpop.f32.mrf.mxu1 }
0x176e   :  { %v9647_v7 = vpop.f32.mrf.mxu0  ;;  %7489 = vmax.xlane.f32.xlu1 %v7488_v38 }
0x176f   :  { %v7421_v41 = vpop.f32.mrf.mxu1 }
0x1770   :  { %v7234_v35 = vpop.f32.mrf.mxu0 }
0x1771   :  { %v7476_v52 = vsel %vm1797_vm3, %v7234_v35, -inf  ;;  %v9677_v59 = vpop.f32.mrf.mxu1 }
0x1772   :  { %7477 = vmax.xlane.f32.xlu0 %v7476_v52  ;;  %v9652_v42 = vpop.f32.mrf.mxu0 }
0x1774   :  { %v7237_v61 = vpop.f32.mrf.mxu0 }
0x1776   :  { %v9653_v15 = vpop.f32.mrf.mxu0 }
0x1778   :  { %v7280_v55 = vpop.f32.mrf.mxu0 }
0x1779   :  { %v7479_v31 = vsel %vm1797_vm3, %v7280_v55, -inf }
0x177a   :  { %7480 = vmax.xlane.f32.xlu0 %v7479_v31  ;;  %v9658_v60 = vpop.f32.mrf.mxu0 }
0x177c   :  { %v7283_v62 = vpop.f32.mrf.mxu0 }
0x177e   :  { %v9659_v50 = vpop.f32.mrf.mxu0 }
0x177f   :  { %6816 = vrot.lane.b32.xlu1 %v11583_v32, %s10461_s20 }
0x1780   :  { %v11744_v48 = vpop.f32.mrf.mxu0 }
0x1781   :  { %v7485_v58 = vsel %vm1797_vm3, %v11744_v48, -inf }
0x1782   :  { %7486 = vmax.xlane.f32.xlu0 %v7485_v58  ;;  %v9670_v25 = vpop.f32.mrf.mxu0 }
0x1784   :  { %v7375_v33 = vpop.f32.mrf.mxu0 }
0x1786   :  { %v9671_v37 = vpop.f32.mrf.mxu0 }
0x1788   :  { %v11750_v5 = vpop.f32.mrf.mxu0 }
0x1789   :  { %v7491_v44 = vsel %vm1797_vm3, %v11750_v5, -inf }
0x178a   :  { %7492 = vmax.xlane.f32.xlu0 %v7491_v44  ;;  %v9682_v23 = vpop.f32.mrf.mxu0 }
0x178c   :  { %v7467_v47 = vpop.f32.mrf.mxu0 }
0x178e   :  { %v9683_v57 = vpop.f32.mrf.mxu0 }
0x17a0   :  { %6810 = vrot.lane.b32.xlu0 %v11583_v32, %s10442_s1 }
0x17eb   :  { %v7472_v54 = vpop.xlane.xlu0 %7471 }
0x17ec   :  { %v7494_v39 = vsub.f32 %v7142_v24, %v7472_v54 }
0x17ee   :  { %v7502_v22 = vmul.f32 1.442695, %v7494_v39  ;;  %v7484_v51 = vpop.xlane.xlu1 %7483 }
0x17ef   :  { %v7498_v18 = vsub.f32 %v7326_v12, %v7484_v51 }
0x17f0   :  { %10145 = vpow2.f32 %v7502_v22 }
0x17f1   :  { %v7510_v1 = vmul.f32 1.442695, %v7498_v18 }
0x17f3   :  { %v7475_v3 = vpop.xlane.xlu1 %7474  ;;  %10147 = vpow2.f32 %v7510_v1 }
0x17f4   :  { %v7495_v56 = vsub.f32 %v7188_v46, %v7475_v3 }
0x17f6   :  { %v7504_v49 = vmul.f32 1.442695, %v7495_v56 }
0x17f7   :  { %v7490_v10 = vpop.xlane.xlu1 %7489 }
0x17f8   :  { %10149 = vpow2.f32 %v7504_v49 }
0x17fb   :  { %v7478_v27 = vpop.xlane.xlu0 %7477  ;;  %v6817_v53 = vpop.permute.xlu1 %6816 }
0x17fc   :  { %v7496_v17 = vsub.f32 %v7234_v35, %v7478_v27  ;;  %v6838_v38 = vcombine.low %v6805_v36, %v6817_v53  ;;  %v6839_v35 = vcombine.high %v6805_v36, %v6817_v53 }
0x17fd   :  { %v11756_v13 = vpop.eup %10145 }
0x17fe   :  { %v7506_v6 = vmul.f32 1.442695, %v7496_v17  ;;  %v7518_v20 = vsel %vm1797_vm3, %v11756_v13, 0.0  ;;  %v6846_v61 = vrot.slane %v6838_v38, %v10674_v9  ;;  %v6853_v59 = vrot.slane %v6839_v35, %v10674_v9 }
0x17ff   :  { %7519 = vadd.xlane.f32.xlu1 %v7518_v20  ;;  %v7500_v38 = vsub.f32 %v11738_v11, %v7490_v10 }
0x1800   :  { %10151 = vpow2.f32 %v7506_v6  ;;  %v11760_v24 = vpop.eup %10147 }
0x1801   :  { %v7530_v8 = vsel %vm1797_vm3, %v11760_v24, 0.0  ;;  %v7514_v35 = vmul.f32 1.442695, %v7500_v38 }
0x1802   :  { %7531 = vadd.xlane.f32.xlu0 %v7530_v8 }
0x1803   :  { %v7481_v30 = vpop.xlane.xlu0 %7480 }
0x1804   :  { %v7497_v34 = vsub.f32 %v7280_v55, %v7481_v30 }
0x1805   :  { %v11764_v26 = vpop.eup %10149 }
0x1806   :  { %v7508_v12 = vmul.f32 1.442695, %v7497_v34  ;;  %v7521_v46 = vsel %vm1797_vm3, %v11764_v26, 0.0 }
0x1807   :  { %7522 = vadd.xlane.f32.xlu0 %v7521_v46 }
0x1808   :  { %10153 = vpow2.f32 %v7508_v12 }
0x180b   :  { %v7487_v21 = vpop.xlane.xlu0 %7486 }
0x180c   :  { %v7499_v12 = vsub.f32 %v11744_v48, %v7487_v21 }
0x180d   :  { %v11768_v63 = vpop.eup %10151 }
0x180e   :  { %v7524_v19 = vsel %vm1797_vm3, %v11768_v63, 0.0  ;;  %v7512_v53 = vmul.f32 1.442695, %v7499_v12 }
0x180f   :  { %7525 = vadd.xlane.f32.xlu1 %v7524_v19 }
0x1810   :  { %10155 = vpow2.f32 %v7512_v53 }
0x1811   :  { %10157 = vpow2.f32 %v7514_v35 }
0x1813   :  { %v11772_v4 = vpop.xlane.xlu0 %7492 }
0x1814   :  { %v7501_v11 = vsub.f32 %v11750_v5, %v11772_v4 }
0x1815   :  { %v11774_v7 = vpop.eup %10153 }
0x1816   :  { %v7527_v2 = vsel %vm1797_vm3, %v11774_v7, 0.0  ;;  %v7516_v10 = vmul.f32 1.442695, %v7501_v11 }
0x1817   :  { %v6811_v52 = vpop.permute.xlu0 %6810  ;;  %7528 = vadd.xlane.f32.xlu0 %v7527_v2 }
0x1818   :  { %v6822_v42 = vcombine.low %v11583_v32, %v6811_v52  ;;  %v6823_v41 = vcombine.high %v11583_v32, %v6811_v52  ;;  %10159 = vpow2.f32 %v7516_v10 }
0x181a   :  { %v6830_v15 = vrot.slane %v6822_v42, %v10674_v9  ;;  %v6837_v55 = vrot.slane %v6823_v41, %v10674_v9 }
0x181c   :  { %v6854_v31 = vcombine.low %v6830_v15, %v6846_v61  ;;  %v6855_v60 = vcombine.high %v6830_v15, %v6846_v61  ;;  %v6870_v62 = vcombine.low %v6837_v55, %v6853_v59  ;;  %v6871_v50 = vcombine.high %v6837_v55, %v6853_v59 }
0x181d   :  { %v11806_v48 = vpop.eup %10155 }
0x181e   :  { %v6862_v58 = vrot.slane %v6854_v31, %v10676_v16  ;;  %v6869_v25 = vrot.slane %v6855_v60, %v10676_v16  ;;  %v6878_v33 = vrot.slane %v6870_v62, %v10676_v16  ;;  %v6885_v32 = vrot.slane %v6871_v50, %v10676_v16  ;;  %v11810_v2 = vpop.eup %10157 }
0x181f   :  { %v7533_v21 = vsel %vm1797_vm3, %v11806_v48, 0.0  ;;  %v7536_v52 = vsel %vm1797_vm3, %v11810_v2, 0.0 }
0x1820   :  { %v6958_v37 = vcombine.low %v6862_v58, %v6869_v25  ;;  %v9046_v44 = vcombine.high %v6862_v58, %v6869_v25  ;;  %v6974_v23 = vcombine.low %v6878_v33, %v6885_v32  ;;  %v9047_v47 = vcombine.high %v6878_v33, %v6885_v32  ;;  %6812 = vrot.lane.b32.xlu1 %v11559_v40, %s10442_s1 }
0x1822   :  { %v6965_v57 = vrot.slane %v6958_v37, %v10674_v9  ;;  %v6973_v54 = vrot.slane %v9046_v44, %v10674_v9  ;;  %v6981_v39 = vrot.slane %v6974_v23, %v10674_v9  ;;  %v6989_v36 = vrot.slane %v9047_v47, %v10674_v9 }
0x1824   :  { %v6990_v22 = vcombine.low %v6965_v57, %v6973_v54  ;;  %v7006_v51 = vcombine.low %v6981_v39, %v6989_v36  ;;  %v6991_v18 = vcombine.high %v6965_v57, %v6973_v54  ;;  %v7007_v1 = vcombine.high %v6981_v39, %v6989_v36 }
0x1825   :  { %v11818_v42 = vpop.eup %10159 }
0x1826   :  { %v6998_v3 = vrot.slane %v6990_v22, %v10676_v16  ;;  %v7014_v56 = vrot.slane %v7006_v51, %v10676_v16  ;;  %v7005_v49 = vrot.slane %v6991_v18, %v10676_v16  ;;  %v7021_v27 = vrot.slane %v7007_v1, %v10676_v16 }
0x1827   :  { %v7539_v41 = vsel %vm1797_vm3, %v11818_v42, 0.0 }
0x1828   :  { %v7022_v17 = vcombine.low %v6998_v3, %v7014_v56  ;;  %v7023_v6 = vcombine.high %v6998_v3, %v7014_v56  ;;  %v7024_v20 = vcombine.low %v7005_v49, %v7021_v27  ;;  %v7025_v30 = vcombine.high %v7005_v49, %v7021_v27 }
0x182a   :  { %v7094_v34 = vpack.c.bf16 %v7022_v17, %v7022_v17  ;;  %v7095_v8 = vpack.c.bf16 %v7023_v6, %v7023_v6  ;;  %v7096_v60 = vpack.c.bf16 %v7024_v20, %v7024_v20 }
0x182c   :  { %v7570_v46 = vsel %vm1897_vm4, %v7094_v34, 0  ;;  %v7616_v19 = vsel %vm1897_vm4, %v7095_v8, 0  ;;  %v7662_v4 = vsel %vm1897_vm4, %v7096_v60, 0 }
0x182d   :  { %6806 = vrot.lane.b32.xlu0 %v11559_v40, %s10462_s26  ;;  %9685 = vmatpush3.bf16.msra.mxu1 %v7570_v46 }
0x182e   :  { %9691 = vmatpush3.bf16.msra.mxu0 %v7616_v19  ;;  %9696 = vmatprep.subr.bf16.mxu1 %v10458_v0 }
0x182f   :  { %9702 = vmatprep.subr.bf16.mxu0 %v10458_v0 }
0x1844   :  { %7534 = vadd.xlane.f32.xlu1 %v7533_v21 }
0x184c   :  { %7537 = vadd.xlane.f32.xlu0 %v7536_v52 }
0x1855   :  { %6818 = vrot.lane.b32.xlu1 %v11559_v40, %s10461_s20 }
0x1879   :  { %7540 = vadd.xlane.f32.xlu1 %v7539_v41 }
0x1888   :  { %v7520_v61 = vpop.xlane.xlu1 %7519 }
0x1889   :  { %10161 = vrcp.f32 %v7520_v61 }
0x188b   :  { %v7532_v59 = vpop.xlane.xlu0 %7531 }
0x1890   :  { %v7523_v15 = vpop.xlane.xlu0 %7522 }
0x1891   :  { %10163 = vrcp.f32 %v7523_v15 }
0x1896   :  { %v10162_v55 = vpop.eup %10161 }
0x1897   :  { %v7550_v31 = vmul.f32 %v10162_v55, %v11756_v13  ;;  %v7097_v13 = vpack.c.bf16 %v7025_v30, %v7025_v30 }
0x1898   :  { %v7526_v62 = vpop.xlane.xlu1 %7525 }
0x1899   :  { %10165 = vrcp.f32 %v7526_v62  ;;  %v7558_v5 = vpack.c.bf16 %v7550_v31, %v7550_v31  ;;  %v7708_v32 = vsel %vm1897_vm4, %v7097_v13, 0 }
0x189b   :  { %9687 = vmatmul.mubr.msk.bf16.vlgmr.msra.gmra.mxu1 %vm1797_vm3, %v7558_v5 }
0x189c   :  { %9697 = vmatpush3.bf16.msra.mxu1 %v7662_v4  ;;  %9698 = vmatprep.mubr.msk.bf16.mxu1 %vm10459_vm0, %v10458_v0  ;;  %v6813_v54 = vpop.permute.xlu1 %6812 }
0x189d   :  { %9708 = vmatprep.subr.bf16.mxu1 %v10458_v0  ;;  %v6891_v36 = vcombine.high %v11559_v40, %v6813_v54 }
0x189e   :  { %v10164_v50 = vpop.eup %10163 }
0x189f   :  { %v7551_v25 = vmul.f32 %v10164_v50, %v11764_v26 }
0x18a0   :  { %v7529_v58 = vpop.xlane.xlu0 %7528 }
0x18a1   :  { %10167 = vrcp.f32 %v7529_v58  ;;  %v7559_v33 = vpack.c.bf16 %v7551_v25, %v7551_v25 }
0x18a2   :  { %10169 = vrcp.f32 %v7532_v59 }
0x18a3   :  { %9693 = vmatmul.mubr.msk.bf16.vlgmr.msra.gmra.mxu0 %vm1797_vm3, %v7559_v33 }
0x18a4   :  { %9703 = vmatpush3.bf16.msra.mxu0 %v7708_v32  ;;  %9704 = vmatprep.mubr.msk.bf16.mxu0 %vm10459_vm0, %v10458_v0  ;;  %v6807_v22 = vpop.permute.xlu0 %6806 }
0x18a5   :  { %9714 = vmatprep.subr.bf16.mxu0 %v10458_v0 }
0x18a6   :  { %v10166_v37 = vpop.eup %10165 }
0x18a7   :  { %v7552_v44 = vmul.f32 %v10166_v37, %v11768_v63  ;;  %v6890_v63 = vcombine.low %v11559_v40, %v6813_v54 }
0x18a9   :  { %v7560_v23 = vpack.c.bf16 %v7552_v44, %v7552_v44  ;;  %v6898_v3 = vrot.slane %v6890_v63, %v10674_v9 }
0x18ab   :  { %9699 = vmatmul.mubr.msk.bf16.vlgmr.msra.gmra.mxu1 %vm1797_vm3, %v7560_v23 }
0x18ac   :  { %9710 = vmatprep.mubr.msk.bf16.mxu1 %vm10459_vm0, %v10458_v0 }
0x18ae   :  { %v10168_v26 = vpop.eup %10167 }
0x18af   :  { %v7553_v47 = vmul.f32 %v10168_v26, %v11774_v7  ;;  %v6905_v7 = vrot.slane %v6891_v36, %v10674_v9  ;;  %v10170_v15 = vpop.eup %10169 }
0x18b0   :  { %v7554_v37 = vmul.f32 %v10170_v15, %v11760_v24 }
0x18b1   :  { %v7561_v57 = vpack.c.bf16 %v7553_v47, %v7553_v47 }
0x18b2   :  { %v7562_v54 = vpack.c.bf16 %v7554_v37, %v7554_v37 }
0x18b3   :  { %9705 = vmatmul.mubr.msk.bf16.vlgmr.msra.gmra.mxu0 %vm1797_vm3, %v7561_v57 }
0x18b4   :  { %9716 = vmatprep.mubr.msk.bf16.mxu0 %vm10459_vm0, %v10458_v0 }
0x18cd   :  { %v7535_v39 = vpop.xlane.xlu1 %7534 }
0x18ce   :  { %10171 = vrcp.f32 %v7535_v39 }
0x18d1   :  { %v6819_v51 = vpop.permute.xlu1 %6818 }
0x18d2   :  { %v6906_v18 = vcombine.low %v6807_v22, %v6819_v51  ;;  %v6907_v1 = vcombine.high %v6807_v22, %v6819_v51 }
0x18d4   :  { %v6914_v56 = vrot.slane %v6906_v18, %v10674_v9  ;;  %v6921_v49 = vrot.slane %v6907_v1, %v10674_v9 }
0x18d5   :  { %v7538_v38 = vpop.xlane.xlu0 %7537 }
0x18d6   :  { %v6922_v27 = vcombine.low %v6898_v3, %v6914_v56  ;;  %v6923_v17 = vcombine.high %v6898_v3, %v6914_v56  ;;  %v6938_v6 = vcombine.low %v6905_v7, %v6921_v49  ;;  %v6939_v20 = vcombine.high %v6905_v7, %v6921_v49 }
0x18d7   :  { %10173 = vrcp.f32 %v7538_v38  ;;  %v10019_v38 = vld [vmem:[#allocation11 + $0xa8] sm:$0xff]  }
0x18d8   :  { %v6930_v40 = vrot.slane %v6922_v27, %v10676_v16  ;;  %v6937_v30 = vrot.slane %v6923_v17, %v10676_v16  ;;  %v6946_v34 = vrot.slane %v6938_v6, %v10676_v16  ;;  %v6953_v8 = vrot.slane %v6939_v20, %v10676_v16 }
0x18da   :  { %v7026_v12 = vcombine.low %v6930_v40, %v6937_v30  ;;  %v9048_v46 = vcombine.high %v6930_v40, %v6937_v30  ;;  %v7042_v19 = vcombine.low %v6946_v34, %v6953_v8  ;;  %v9049_v53 = vcombine.high %v6946_v34, %v6953_v8  ;;  %v10017_v8 = vld [vmem:[#allocation11 + $0xb8] sm:$0xff]  }
0x18db   :  { %v10172_v5 = vpop.eup %10171 }
0x18dc   :  { %v7033_v35 = vrot.slane %v7026_v12, %v10674_v9  ;;  %v7041_v21 = vrot.slane %v9048_v46, %v10674_v9  ;;  %v7049_v52 = vrot.slane %v7042_v19, %v10674_v9  ;;  %v7057_v11 = vrot.slane %v9049_v53, %v10674_v9 }
0x18dd   :  { %v7555_v13 = vmul.f32 %v10172_v5, %v11806_v48 }
0x18de   :  { %v7058_v10 = vcombine.low %v7033_v35, %v7041_v21  ;;  %v7059_v41 = vcombine.high %v7033_v35, %v7041_v21  ;;  %v7074_v61 = vcombine.low %v7049_v52, %v7057_v11  ;;  %v7075_v59 = vcombine.high %v7049_v52, %v7057_v11 }
0x18df   :  { %v7563_v57 = vpack.c.bf16 %v7555_v13, %v7555_v13 }
0x18e0   :  { %v7066_v55 = vrot.slane %v7058_v10, %v10676_v16  ;;  %v7073_v31 = vrot.slane %v7059_v41, %v10676_v16  ;;  %v7082_v60 = vrot.slane %v7074_v61, %v10676_v16  ;;  %v7089_v62 = vrot.slane %v7075_v59, %v10676_v16 }
0x18e2   :  { %v7090_v4 = vcombine.low %v7066_v55, %v7082_v60  ;;  %v7091_v50 = vcombine.high %v7066_v55, %v7082_v60  ;;  %v7092_v58 = vcombine.low %v7073_v31, %v7089_v62  ;;  %v7093_v25 = vcombine.high %v7073_v31, %v7089_v62  ;;  %v10020_v31 = vld [vmem:[#allocation11 + $0xa0] sm:$0xff]  }
0x18e4   :  { %v7098_v33 = vpack.c.bf16 %v7090_v4, %v7090_v4  ;;  %v7099_v32 = vpack.c.bf16 %v7091_v50, %v7091_v50  ;;  %v7100_v26 = vpack.c.bf16 %v7092_v58, %v7092_v58  ;;  %v7101_v47 = vpack.c.bf16 %v7093_v25, %v7093_v25  ;;  %v10174_v39 = vpop.eup %10173 }
0x18e5   :  { %v7556_v63 = vmul.f32 %v10174_v39, %v11810_v2 }
0x18e6   :  { %v7754_v44 = vsel %vm1897_vm4, %v7098_v33, 0  ;;  %v7800_v23 = vsel %vm1897_vm4, %v7099_v32, 0  ;;  %v7846_v24 = vsel %vm1897_vm4, %v7100_v26, 0  ;;  %v7892_v48 = vsel %vm1897_vm4, %v7101_v47, 0  ;;  %v10021_v32 = vld [vmem:[#allocation11 + $0x98] sm:$0xff]  }
0x18e7   :  { %9709 = vmatpush3.bf16.msra.mxu1 %v7754_v44  ;;  %9715 = vmatpush3.bf16.msra.mxu0 %v7800_v23  ;;  %v7564_v36 = vpack.c.bf16 %v7556_v63, %v7556_v63 }
0x18e8   :  { %9720 = vmatprep.subr.bf16.mxu1 %v10458_v0  ;;  %9726 = vmatprep.subr.bf16.mxu0 %v10458_v0 }
0x18ea   :  { %9711 = vmatmul.mubr.msk.bf16.vlgmr.msra.gmra.mxu1 %vm1797_vm3, %v7562_v54  ;;  %9717 = vmatmul.mubr.msk.bf16.vlgmr.msra.gmra.mxu0 %vm1797_vm3, %v7563_v57 }
0x18eb   :  { %9721 = vmatpush3.bf16.msra.mxu1 %v7846_v24  ;;  %9727 = vmatpush3.bf16.msra.mxu0 %v7892_v48  ;;  %v10022_v24 = vld [vmem:[#allocation11 + $0x90] sm:$0xff]  }
0x18ec   :  { %9722 = vmatprep.mubr.msk.bf16.mxu1 %vm10459_vm0, %v10458_v0  ;;  %9728 = vmatprep.mubr.msk.bf16.mxu0 %vm10459_vm0, %v10458_v0 }
0x18ed   :  { %9732 = vmatprep.subr.bf16.mxu1 %v10458_v0 }
0x18f2   :  { %9723 = vmatmul.mubr.msk.bf16.vlgmr.msra.gmra.mxu1 %vm1797_vm3, %v7564_v36 }
0x18f3   :  { %9748 = vmatprep.mubr.msk.bf16.mxu1 %vm10459_vm0, %v10458_v0  ;;  %9733 = vmatpush3.bf16.msra.mxu1 %v10017_v8 }
0x18f4   :  { %9734 = vmatprep.subr.bf16.mxu1 %v10458_v0 }
0x1902   :  { %v7541_v22 = vpop.xlane.xlu1 %7540 }
0x1903   :  { %10175 = vrcp.f32 %v7541_v22 }
0x1910   :  { %v10176_v51 = vpop.eup %10175 }
0x1911   :  { %v7557_v18 = vmul.f32 %v10176_v51, %v11818_v42  ;;  %v10018_v42 = vld [vmem:[#allocation11 + $0xb0] sm:$0xff]  }
0x1912   :  { %9735 = vmatpush3.bf16.msra.mxu1 %v10018_v42 }
0x1913   :  { %v7565_v1 = vpack.c.bf16 %v7557_v18, %v7557_v18  ;;  %9736 = vmatprep.subr.bf16.mxu1 %v10458_v0 }
0x1915   :  { %9729 = vmatmul.mubr.msk.bf16.vlgmr.msra.gmra.mxu0 %vm1797_vm3, %v7565_v1 }
0x1916   :  { %8538 = vmatprep.mubr.bf16.mxu0 %v10460_v29  ;;  %9737 = vmatpush3.bf16.msra.mxu1 %v10019_v38 }
0x1917   :  { %9738 = vmatprep.subr.bf16.mxu1 %v10458_v0 }
0x191a   :  { %9739 = vmatpush3.bf16.msra.mxu1 %v10020_v31 }
0x191b   :  { %9740 = vmatprep.subr.bf16.mxu1 %v10458_v0 }
0x191e   :  { %9741 = vmatpush3.bf16.msra.mxu1 %v10021_v32 }
0x191f   :  { %9742 = vmatprep.subr.bf16.mxu1 %v10458_v0 }
0x1922   :  { %9743 = vmatpush3.bf16.msra.mxu1 %v10022_v24 }
0x1923   :  { %9744 = vmatprep.subr.bf16.mxu1 %v10458_v0 }
0x195b   :  { %v7606_v2 = vpop.f32.mrf.mxu1 }
0x195d   :  { %v9688_v3 = vpop.f32.mrf.mxu1 }
0x195f   :  { %v7609_v7 = vpop.f32.mrf.mxu1 }
0x1961   :  { %v9689_v56 = vpop.f32.mrf.mxu1 }
0x1963   :  { %v7652_v49 = vpop.f32.mrf.mxu0 }
0x1965   :  { %v9694_v27 = vpop.f32.mrf.mxu0 }
0x1967   :  { %v7655_v17 = vpop.f32.mrf.mxu0 }
0x1969   :  { %v9695_v20 = vpop.f32.mrf.mxu0 }
0x196b   :  { %v7698_v6 = vpop.f32.mrf.mxu1 }
0x196c   :  { %v7934_v40 = vcombine.low %v7606_v2, %v7698_v6  ;;  %v7935_v30 = vcombine.high %v7606_v2, %v7698_v6 }
0x196d   :  { %v9700_v34 = vpop.f32.mrf.mxu1 }
0x196e   :  { %v7942_v21 = vrot.slane %v7934_v40, %v10674_v9  ;;  %v7949_v52 = vrot.slane %v7935_v30, %v10674_v9 }
0x196f   :  { %v7701_v12 = vpop.f32.mrf.mxu1 }
0x1971   :  { %v9701_v46 = vpop.f32.mrf.mxu1 }
0x1973   :  { %v7744_v29 = vpop.f32.mrf.mxu0 }
0x1974   :  { %v7950_v19 = vcombine.low %v7652_v49, %v7744_v29  ;;  %v7951_v53 = vcombine.high %v7652_v49, %v7744_v29 }
0x1975   :  { %v9706_v35 = vpop.f32.mrf.mxu0 }
0x1976   :  { %v7958_v11 = vrot.slane %v7950_v19, %v10674_v9  ;;  %v7965_v10 = vrot.slane %v7951_v53, %v10674_v9 }
0x1977   :  { %v7747_v41 = vpop.f32.mrf.mxu0 }
0x1978   :  { %v7966_v61 = vcombine.low %v7942_v21, %v7958_v11  ;;  %v7967_v59 = vcombine.high %v7942_v21, %v7958_v11  ;;  %v7982_v15 = vcombine.low %v7949_v52, %v7965_v10  ;;  %v7983_v55 = vcombine.high %v7949_v52, %v7965_v10 }
0x1979   :  { %v9707_v60 = vpop.f32.mrf.mxu0 }
0x197a   :  { %v7974_v62 = vrot.slane %v7966_v61, %v10676_v16  ;;  %v7981_v5 = vrot.slane %v7967_v59, %v10676_v16  ;;  %v7990_v4 = vrot.slane %v7982_v15, %v10676_v16  ;;  %v7997_v50 = vrot.slane %v7983_v55, %v10676_v16 }
0x197c   :  { %v8070_v58 = vcombine.low %v7974_v62, %v7981_v5  ;;  %v9066_v25 = vcombine.high %v7974_v62, %v7981_v5  ;;  %v8086_v13 = vcombine.low %v7990_v4, %v7997_v50  ;;  %v9067_v33 = vcombine.high %v7990_v4, %v7997_v50 }
0x197e   :  { %v8077_v37 = vrot.slane %v8070_v58, %v10674_v9  ;;  %v8085_v44 = vrot.slane %v9066_v25, %v10674_v9  ;;  %v8093_v23 = vrot.slane %v8086_v13, %v10674_v9  ;;  %v8101_v26 = vrot.slane %v9067_v33, %v10674_v9  ;;  %v10023_v25 = vld [vmem:[#allocation11 + $0x88] sm:$0xff]  }
0x197f   :  { %9745 = vmatpush3.bf16.msra.mxu1 %v10023_v25  ;;  %v10037_v25 = vld [vmem:[#allocation17 + $0x130] ss:$8 sps:$4 sm:$0xff]  }
0x1980   :  { %v8103_v47 = vcombine.high %v8077_v37, %v8085_v44  ;;  %v8119_v57 = vcombine.high %v8093_v23, %v8101_v26  ;;  %v8102_v54 = vcombine.low %v8077_v37, %v8085_v44  ;;  %v8118_v39 = vcombine.low %v8093_v23, %v8101_v26  ;;  %9746 = vmatprep.subr.bf16.mxu1 %v10458_v0 }
0x1982   :  { %v11900_v48 = vrot.slane %v8103_v47, %v10676_v16  ;;  %v11903_v63 = vrot.slane %v8119_v57, %v10676_v16  ;;  %v11906_v36 = vrot.slane %v8102_v54, %v10676_v16  ;;  %v11909_v22 = vrot.slane %v8118_v39, %v10676_v16 }
0x1984   :  { %v8136_v51 = vcombine.low %v11900_v48, %v11903_v63  ;;  %v8135_v18 = vcombine.high %v11906_v36, %v11909_v22  ;;  %v8137_v1 = vcombine.high %v11900_v48, %v11903_v63  ;;  %v8134_v2 = vcombine.low %v11906_v36, %v11909_v22 }
0x19aa   :  { %v7790_v3 = vpop.f32.mrf.mxu1  ;;  %v7836_v7 = vpop.f32.mrf.mxu0 }
0x19ac   :  { %v9712_v56 = vpop.f32.mrf.mxu1  ;;  %v9718_v49 = vpop.f32.mrf.mxu0 }
0x19ae   :  { %v7793_v27 = vpop.f32.mrf.mxu1  ;;  %v7839_v17 = vpop.f32.mrf.mxu0 }
0x19b0   :  { %v9713_v6 = vpop.f32.mrf.mxu1  ;;  %v9719_v20 = vpop.f32.mrf.mxu0 }
0x19b2   :  { %v7882_v40 = vpop.f32.mrf.mxu1 }
0x19b3   :  { %v8002_v12 = vcombine.low %v7790_v3, %v7882_v40  ;;  %v8003_v42 = vcombine.high %v7790_v3, %v7882_v40  ;;  %v10024_v3 = vld [vmem:[#allocation11 + $0x80] sm:$0xff]  }
0x19b4   :  { %v9724_v30 = vpop.f32.mrf.mxu1  ;;  %9747 = vmatpush3.bf16.msra.mxu1 %v10024_v3  ;;  %v10054_v3 = vld [vmem:[#allocation19 + $0x128] sm:$0xff]  }
0x19b5   :  { %v8010_v38 = vrot.slane %v8002_v12, %v10674_v9  ;;  %v8017_v35 = vrot.slane %v8003_v42, %v10674_v9 }
0x19b6   :  { %v7885_v34 = vpop.f32.mrf.mxu1 }
0x19b8   :  { %v9725_v8 = vpop.f32.mrf.mxu1 }
0x19d5   :  { %v7928_v46 = vpop.f32.mrf.mxu0 }
0x19d6   :  { %v8018_v29 = vcombine.low %v7836_v7, %v7928_v46  ;;  %v8019_v19 = vcombine.high %v7836_v7, %v7928_v46 }
0x19d7   :  { %v9730_v53 = vpop.f32.mrf.mxu0 }
0x19d8   :  { %v8026_v21 = vrot.slane %v8018_v29, %v10674_v9  ;;  %v8033_v52 = vrot.slane %v8019_v19, %v10674_v9  ;;  %v9070_v19 = vld [vmem:[#allocation13 + $0x2] ss:$0 sm:$0xff] }
0x19d9   :  { %v7931_v11 = vpop.f32.mrf.mxu0 }
0x19da   :  { %v8034_v10 = vcombine.low %v8010_v38, %v8026_v21  ;;  %v8035_v41 = vcombine.high %v8010_v38, %v8026_v21  ;;  %v8050_v61 = vcombine.low %v8017_v35, %v8033_v52  ;;  %v8051_v59 = vcombine.high %v8017_v35, %v8033_v52  ;;  %v10025_v11 = vld [vmem:[#allocation17 + $0x170] ss:$8 sps:$4 sm:$0xff]  }
0x19db   :  { %v9731_v15 = vpop.f32.mrf.mxu0 }
0x19dc   :  { %v8042_v55 = vrot.slane %v8034_v10, %v10676_v16  ;;  %v8049_v31 = vrot.slane %v8035_v41, %v10676_v16  ;;  %v8058_v60 = vrot.slane %v8050_v61, %v10676_v16  ;;  %v8065_v62 = vrot.slane %v8051_v59, %v10676_v16  ;;  %v10027_v10 = vld [vmem:[#allocation17 + $0x174] ss:$8 sps:$4 sm:$0xff]  }
0x19dd   :  { %8506 = vmatprep.subr.bf16.mxu0 %v10027_v10 }
0x19de   :  { %v8138_v5 = vcombine.low %v8042_v55, %v8049_v31  ;;  %v9068_v4 = vcombine.high %v8042_v55, %v8049_v31  ;;  %v8154_v50 = vcombine.low %v8058_v60, %v8065_v62  ;;  %v9069_v58 = vcombine.high %v8058_v60, %v8065_v62  ;;  %8507 = vmatpush1.bf16.msra.mxu0 %v10025_v11  ;;  %v10030_v60 = vld [vmem:[#allocation17 + $0x164] ss:$8 sps:$4 sm:$0xff]   ;;  %v10028_v62 = vld [vmem:[#allocation17 + $0x160] ss:$8 sps:$4 sm:$0xff]  }
0x19df   :  { %8508 = vmatprep.subr.bf16.mxu0 %v10030_v60 }
0x19e0   :  { %v8145_v13 = vrot.slane %v8138_v5, %v10674_v9  ;;  %v8153_v33 = vrot.slane %v9068_v4, %v10674_v9  ;;  %v8161_v32 = vrot.slane %v8154_v50, %v10674_v9  ;;  %v8169_v37 = vrot.slane %v9069_v58, %v10674_v9  ;;  %v10033_v5 = vld [vmem:[#allocation17 + $0x154] ss:$8 sps:$4 sm:$0xff]   ;;  %v10031_v4 = vld [vmem:[#allocation17 + $0x150] ss:$8 sps:$4 sm:$0xff]   ;;  %v10036_v50 = vld [vmem:[#allocation17 + $0x144] ss:$8 sps:$4 sm:$0xff]  }
0x19e1   :  { %v10034_v58 = vld [vmem:[#allocation17 + $0x140] ss:$8 sps:$4 sm:$0xff]  }
0x19e2   :  { %v8171_v44 = vcombine.high %v8145_v13, %v8153_v33  ;;  %v8187_v23 = vcombine.high %v8161_v32, %v8169_v37  ;;  %v8170_v26 = vcombine.low %v8145_v13, %v8153_v33  ;;  %v8186_v47 = vcombine.low %v8161_v32, %v8169_v37  ;;  %8509 = vmatpush1.bf16.msra.mxu0 %v10028_v62  ;;  %v10039_v13 = vld [vmem:[#allocation17 + $0x134] ss:$8 sps:$4 sm:$0xff]   ;;  %v10042_v33 = vld [vmem:[#allocation17 + $0x124] ss:$8 sps:$4 sm:$0xff]   ;;  %v10040_v32 = vld [vmem:[#allocation17 + $0x120] ss:$8 sps:$4 sm:$0xff]  }
0x19e3   :  { %8510 = vmatprep.subr.bf16.mxu0 %v10033_v5  ;;  %v10045_v37 = vld [vmem:[#allocation17 + $0x114] ss:$8 sps:$4 sm:$0xff]  }
0x19e4   :  { %v8185_v57 = vrot.slane %v8171_v44, %v10676_v16  ;;  %v8201_v54 = vrot.slane %v8187_v23, %v10676_v16  ;;  %v8178_v39 = vrot.slane %v8170_v26, %v10676_v16  ;;  %v8194_v24 = vrot.slane %v8186_v47, %v10676_v16  ;;  %v10043_v44 = vld [vmem:[#allocation17 + $0x110] ss:$8 sps:$4 sm:$0xff]   ;;  %v10048_v23 = vld [vmem:[#allocation17 + $0x104] ss:$8 sps:$4 sm:$0xff]  }
0x19e5   :  { %v10049_v26 = vld [vmem:[#allocation19 + $0x178] sm:$0xff]  }
0x19e6   :  { %v8204_v7 = vcombine.low %v8185_v57, %v8201_v54  ;;  %v8203_v56 = vcombine.high %v8178_v39, %v8194_v24  ;;  %v8202_v49 = vcombine.low %v8178_v39, %v8194_v24  ;;  %v8205_v17 = vcombine.high %v8185_v57, %v8201_v54  ;;  %8511 = vmatpush1.bf16.msra.mxu0 %v10031_v4  ;;  %v10050_v47 = vld [vmem:[#allocation19 + $0x138] sm:$0xff]   ;;  %v10051_v57 = vld [vmem:[#allocation19 + $0x170] sm:$0xff]   ;;  %v10046_v54 = vld [vmem:[#allocation17 + $0x100] ss:$8 sps:$4 sm:$0xff]  }
0x19e7   :  { %8512 = vmatprep.subr.bf16.mxu0 %v10036_v50  ;;  %9316 = vmatprep.subr.bf16.mxu1 %v10049_v26  ;;  %v10052_v39 = vld [vmem:[#allocation19 + $0x130] sm:$0xff]   ;;  %v10053_v24 = vld [vmem:[#allocation19 + $0x168] sm:$0xff]  }
0x19e8   :  { %v9814_v9 = vpack.i.bf16 %v8204_v7, %v8136_v51  ;;  %v9809_v27 = vpack.i.bf16 %v8203_v56, %v8135_v18  ;;  %v9819_v0 = vpack.i.bf16 %v8205_v17, %v8137_v1  ;;  %v10055_v7 = vld [vmem:[#allocation19 + $0x160] sm:$0xff]  }
0x19e9   :  { %v10056_v56 = vld [vmem:[#allocation19 + $0x120] sm:$0xff]  }
0x19ea   :  { %9815 = vrot.lane.b32.xlu1 %v9814_v9, %s10442_s1  ;;  %9810 = vrot.lane.b32.xlu0 %v9809_v27, %s10461_s20  ;;  %v10058_v9 = vld [vmem:[#allocation19 + $0x118] sm:$0xff]  }
0x19eb   :  { %8513 = vmatpush1.bf16.msra.mxu0 %v10034_v58 }
0x19ec   :  { %8514 = vmatprep.subr.bf16.mxu0 %v10039_v13 }
0x19ee   :  { %9820 = vrot.lane.b32.xlu0 %v9819_v0, %s10462_s26 }
0x19ef   :  { %8515 = vmatpush1.bf16.msra.mxu0 %v10037_v25 }
0x19f0   :  { %8516 = vmatprep.subr.bf16.mxu0 %v10042_v33 }
0x19f3   :  { %8517 = vmatpush1.bf16.msra.mxu0 %v10040_v32 }
0x19f4   :  { %8518 = vmatprep.subr.bf16.mxu0 %v10045_v37 }
0x19f7   :  { %8519 = vmatpush1.bf16.msra.mxu0 %v10043_v44 }
0x19f8   :  { %8520 = vmatprep.subr.bf16.mxu0 %v10048_v23 }
0x19fb   :  { %8521 = vmatpush1.bf16.msra.mxu0 %v10046_v54 }
0x1a5c   :  { %v9816_v6 = vpop.permute.xlu1 %9815  ;;  %v9811_v16 = vpop.permute.xlu0 %9810 }
0x1a5d   :  { %v9813_v20 = vunpack.i.h.bf16 %v9811_v16  ;;  %v9812_v40 = vunpack.i.l.bf16 %v9811_v16  ;;  %v9818_v30 = vunpack.i.h.bf16 %v9816_v6  ;;  %v9817_v34 = vunpack.i.l.bf16 %v9816_v6 }
0x1a5f   :  { %v8230_v51 = vsel %vm1428_vm2, %v8134_v2, %v9812_v40  ;;  %v8231_v18 = vsel %vm1428_vm2, %v8202_v49, %v9813_v20  ;;  %v10057_v49 = vld [vmem:[#allocation19 + $0x158] sm:$0xff]  }
0x1a60   :  { %v9821_v8 = vpop.permute.xlu0 %9820  ;;  %v8232_v48 = vsel %vm2561_vm5, %v8230_v51, %v9817_v34  ;;  %v8233_v63 = vsel %vm2561_vm5, %v8231_v18, %v9818_v30  ;;  %v9079_v34 = vld [vmem:[#allocation14 + $0x2] ss:$0 sm:$0xff] }
0x1a61   :  { %v9823_v12 = vunpack.i.h.bf16 %v9821_v8  ;;  %v9822_v42 = vunpack.i.l.bf16 %v9821_v8 }
0x1a63   :  { %v8234_v1 = vsel %vm2564_vm6, %v8232_v48, %v9822_v42  ;;  %v8235_v46 = vsel %vm2564_vm6, %v8233_v63, %v9823_v12  ;;  %v9080_v12 = vld [vmem:[#allocation16 + $0x2] ss:$0 sm:$0xff] }
0x1a64   :  { %v8236_v29 = vpack.c.bf16 %v8235_v46, %v8234_v1  ;;  %v10059_v46 = vld [vmem:[#allocation19 + $0x150] sm:$0xff]  }
0x1a66   :  { %9749 = vmatmul.mubr.bf16.vlgmr.msra.gmra.mxu1 %v8236_v29  ;;  %v10060_v29 = vld [vmem:[#allocation19 + $0x110] sm:$0xff]  }
0x1a67   :  { %9317 = vmatpush3.bf16.msra.mxu1 %v10050_v47 }
0x1a68   :  { %9318 = vmatprep.subr.bf16.mxu1 %v10051_v57 }
0x1a6b   :  { %9319 = vmatpush3.bf16.msra.mxu1 %v10052_v39 }
0x1a6c   :  { %9320 = vmatprep.subr.bf16.mxu1 %v10053_v24 }
0x1a6f   :  { %9321 = vmatpush3.bf16.msra.mxu1 %v10054_v3 }
0x1a70   :  { %9322 = vmatprep.subr.bf16.mxu1 %v10055_v7 }
0x1a73   :  { %9323 = vmatpush3.bf16.msra.mxu1 %v10056_v56 }
0x1a74   :  { %9324 = vmatprep.subr.bf16.mxu1 %v10057_v49 }
0x1a77   :  { %9325 = vmatpush3.bf16.msra.mxu1 %v10058_v9 }
0x1a78   :  { %9326 = vmatprep.subr.bf16.mxu1 %v10059_v46 }
0x1a7b   :  { %9327 = vmatpush3.bf16.msra.mxu1 %v10060_v29 }
0x1b26   :  { %v8344_v53 = vpop.f32.mrf.mxu1 }
0x1b27   :  { %v8345_v36 = vadd.f32 %v9070_v19, %v8344_v53  ;;  %v10062_v53 = vld [vmem:[#allocation19 + $0x108] sm:$0xff]  }
0x1b28   :  { %v9750_v22 = vpop.f32.mrf.mxu1 }
0x1b29   :  { %v8351_v2 = vadd.f32 %v8345_v36, %v11543_v28  ;;  %v10063_v36 = vld [vmem:[#allocation19 + $0x140] sm:$0xff]  }
0x1b2a   :  { %v8347_v38 = vpop.f32.mrf.mxu1  ;;  %v10064_v22 = vld [vmem:[#allocation19 + $0x100] sm:$0xff]  }
0x1b2b   :  { %v8348_v35 = vadd.f32 %v9070_v19, %v8347_v38  ;;  %8357 = vadd.xlane.f32.xlu1 %v8351_v2  ;;  %v10061_v19 = vld [vmem:[#allocation19 + $0x148] sm:$0xff]  }
0x1b2c   :  { %v9751_v21 = vpop.f32.mrf.mxu1  ;;  %9328 = vmatprep.subr.bf16.mxu1 %v10061_v19 }
0x1b2d   :  { %v8352_v52 = vadd.f32 %v8348_v35, %v11545_v14  ;;  %9329 = vmatpush3.bf16.msra.mxu1 %v10062_v53 }
0x1b2e   :  { %9330 = vmatprep.subr.bf16.mxu1 %v10063_v36 }
0x1b2f   :  { %8359 = vadd.xlane.f32.xlu0 %v8352_v52 }
0x1b31   :  { %9331 = vmatpush3.bf16.msra.mxu1 %v10064_v22 }
0x1bb4   :  { %v8358_v41 = vpop.xlane.xlu1 %8357 }
0x1bb5   :  { %v8361_v61 = vmul.f32 0.0078125, %v8358_v41 }
0x1bb7   :  { %v11954_v59 = vsub.f32 %v8351_v2, %v8361_v61  ;;  %v9081_v2 = vld [vmem:[%s11995_s11 + $0x4] sm:$0x3] }
0x1bb8   :  { %v8360_v15 = vpop.xlane.xlu0 %8359  ;;  %v8423_v35 = vrot.slane %v9081_v2, %v10634_v43  ;;  %v8419_v21 = vrot.slane %v9081_v2, %v10639_v45  ;;  %v9099_v43 = vld [vmem:[%s11997_s13 + $0x2] ss:$0 sm:$0xff] }
0x1bb9   :  { %v8362_v55 = vmul.f32 0.0078125, %v8360_v15  ;;  %v8365_v28 = vmul.f32 %v11954_v59, %v11954_v59 }
0x1bbb   :  { %v11958_v31 = vsub.f32 %v8352_v52, %v8362_v55  ;;  %8367 = vadd.xlane.f32.xlu0 %v8365_v28 }
0x1bbd   :  { %v8366_v14 = vmul.f32 %v11958_v31, %v11958_v31 }
0x1bbf   :  { %8369 = vadd.xlane.f32.xlu1 %v8366_v14 }
0x1c44   :  { %v8368_v27 = vpop.xlane.xlu0 %8367 }
0x1c45   :  { %v8371_v17 = vmul.f32 0.0078125, %v8368_v27 }
0x1c47   :  { %v8373_v0 = vadd.f32 1e-05, %v8371_v17 }
0x1c48   :  { %v8370_v6 = vpop.xlane.xlu1 %8369 }
0x1c49   :  { %10177 = vrsqrt.f32 %v8373_v0  ;;  %v8372_v16 = vmul.f32 0.0078125, %v8370_v6  ;;  %v9118_v0 = vld [vmem:[%s11998_s14 + $0x2] ss:$0 sm:$0xff] }
0x1c4b   :  { %v8374_v20 = vadd.f32 1e-05, %v8372_v16  ;;  %v9119_v16 = vld [vmem:[%s11999_s15 + $0x2] ss:$0 sm:$0xff] }
0x1c4d   :  { %10179 = vrsqrt.f32 %v8374_v20 }
0x1c56   :  { %v10178_v40 = vpop.eup %10177 }
0x1c57   :  { %v8377_v30 = vmul.f32 %v10178_v40, %v11954_v59 }
0x1c59   :  { %v8385_v8 = vmul.f32 %v9079_v34, %v8377_v30 }
0x1c5a   :  { %v10180_v51 = vpop.eup %10179 }
0x1c5b   :  { %v8378_v18 = vmul.f32 %v10180_v51, %v11958_v31  ;;  %v8393_v48 = vadd.f32 %v9080_v12, %v8385_v8 }
0x1c5d   :  { %v8386_v42 = vmul.f32 %v9079_v34, %v8378_v18 }
0x1c5f   :  { %v8394_v63 = vadd.f32 %v9080_v12, %v8386_v42 }
0x1c61   :  { %v8395_v1 = vpack.c.bf16 %v8394_v63, %v8393_v48 }
0x1c63   :  { %8539 = vmatmul.mubr.bf16.vlgmr.msra.gmra.mxu0 %v8395_v1 }
0x1d23   :  { %v8540_v38 = vpop.f32.mrf.mxu0 }
0x1d24   :  { %v8541_v61 = vadd.f32 %v8540_v38, %v8419_v21 }
0x1d25   :  { %v8542_v52 = vpop.f32.mrf.mxu0 }
0x1d26   :  { %v8543_v10 = vadd.f32 %v8542_v52, %v8423_v35  ;;  %v8549_v14 = vmax.f32 %v8541_v61, 0.0 }
0x1d27   :  { %v8544_v11 = vpop.f32.mrf.mxu0 }
0x1d28   :  { %v8545_v41 = vadd.f32 %v8544_v11, %v8419_v21  ;;  %v8550_v28 = vmax.f32 %v8543_v10, 0.0 }
0x1d29   :  { %v8546_v59 = vpop.f32.mrf.mxu0 }
0x1d2a   :  { %v8547_v15 = vadd.f32 %v8546_v59, %v8423_v35  ;;  %v8551_v55 = vmax.f32 %v8545_v41, 0.0 }
0x1d2c   :  { %v8552_v31 = vmax.f32 %v8547_v15, 0.0  ;;  %v8553_v62 = vpack.c.bf16 %v8551_v55, %v8549_v14 }
0x1d2e   :  { %v8554_v60 = vpack.c.bf16 %v8552_v31, %v8550_v28 }
0x1d30   :  { %8724 = vmatprep.mubr.bf16.mxu1 %v8554_v60 }
0x1d31   :  { %8725 = vmatmul.mubr.bf16.vlgmr.msra.gmra.mxu1 %v8553_v62 }
0x1df1   :  { %v9332_v5 = vpop.f32.mrf.mxu1 }
0x1df3   :  { %v9333_v45 = vpop.f32.mrf.mxu1 }
0x1df4   :  { %v9334_v4 = vadd.f32 %v9333_v45, %v9332_v5 }
0x1df5   :  { %v9335_v50 = vpop.f32.mrf.mxu1 }
0x1df6   :  { %v8727_v58 = vadd.f32 %v9334_v4, %v9099_v43 }
0x1df7   :  { %v9336_v25 = vpop.f32.mrf.mxu1 }
0x1df8   :  { %v9337_v13 = vadd.f32 %v9336_v25, %v9335_v50  ;;  %v8733_v33 = vadd.f32 %v8727_v58, %v8393_v48 }
0x1dfa   :  { %v8730_v32 = vadd.f32 %v9337_v13, %v9099_v43  ;;  %8739 = vadd.xlane.f32.xlu0 %v8733_v33 }
0x1dfc   :  { %v8734_v37 = vadd.f32 %v8730_v32, %v8394_v63 }
0x1dfe   :  { %8741 = vadd.xlane.f32.xlu1 %v8734_v37 }
0x1e83   :  { %v8740_v44 = vpop.xlane.xlu0 %8739 }
0x1e84   :  { %v8743_v23 = vmul.f32 0.0078125, %v8740_v44 }
0x1e86   :  { %v8745_v26 = vsub.f32 %v8733_v33, %v8743_v23 }
0x1e87   :  { %v8742_v47 = vpop.xlane.xlu1 %8741 }
0x1e88   :  { %v8744_v57 = vmul.f32 0.0078125, %v8742_v47  ;;  %v8747_v54 = vmul.f32 %v8745_v26, %v8745_v26 }
0x1e8a   :  { %v8746_v39 = vsub.f32 %v8734_v37, %v8744_v57  ;;  %8749 = vadd.xlane.f32.xlu0 %v8747_v54 }
0x1e8c   :  { %v8748_v24 = vmul.f32 %v8746_v39, %v8746_v39 }
0x1e8e   :  { %8751 = vadd.xlane.f32.xlu1 %v8748_v24 }
0x1f13   :  { %v8750_v3 = vpop.xlane.xlu0 %8749 }
0x1f14   :  { %v8753_v7 = vmul.f32 0.0078125, %v8750_v3 }
0x1f16   :  { %v8755_v56 = vadd.f32 1e-05, %v8753_v7 }
0x1f17   :  { %v8752_v49 = vpop.xlane.xlu1 %8751 }
0x1f18   :  { %10181 = vrsqrt.f32 %v8755_v56  ;;  %v8754_v9 = vmul.f32 0.0078125, %v8752_v49 }
0x1f1a   :  { %v8756_v27 = vadd.f32 1e-05, %v8754_v9 }
0x1f1c   :  { %10183 = vrsqrt.f32 %v8756_v27 }
0x1f25   :  { %v10182_v17 = vpop.eup %10181 }
0x1f26   :  { %v8759_v6 = vmul.f32 %v10182_v17, %v8745_v26 }
0x1f28   :  { %v8767_v20 = vmul.f32 %v9118_v0, %v8759_v6 }
0x1f29   :  { %v10184_v40 = vpop.eup %10183 }
0x1f2a   :  { %v8760_v30 = vmul.f32 %v10184_v40, %v8746_v39  ;;  %v8775_v34 = vadd.f32 %v9119_v16, %v8767_v20 }
0x1f2c   :  { %v8768_v51 = vmul.f32 %v9118_v0, %v8760_v30  ;;  %8777 = vst [vmem:[#allocation20] sm:$0xff] %v8775_v34 }
0x1f2e   :  { %v8776_v18 = vadd.f32 %v9119_v16, %v8768_v51 }
0x1f30   :  { %8778 = vst [vmem:[#allocation20 + $0x8] sm:$0xff] %v8776_v18 }
0x1f31   :  { %10416 = shalt.err (!%p10413_p3)
}
0x1f32   :  { %8790 = dma.vmem_to_hbm [thread:$0]  %s8785_s28, 256, %s12000_s16, [#allocation4], %s10449_s19, %s10449_s19, %s10450_s21  }
0x1f33   :  { %10437 = dma.done.wait [#allocation4], 256  }
0x1f34   :  { %10438 = vsyncadd [#allocation4], 4294967040 }
0x1f35   :  { %8794 = vsyncpa [#allocation3], 1 }
0x1f36   :  { %8795 = vsyncpa [#allocation6], 1 }
0x1f37   :  { %8796 = vsyncpa [#allocation9], 1 }
0x1f38   :  { %8797 = vsyncpa [#allocation12], 1 }
0x1f39   :  { %8798 = vsyncpa [#allocation15], 1 }
0x1f3a   :  { %8799 = vsyncpa [#allocation18], 1 }
0x1f3b   :  { %8800 = vsyncpa [#allocation4], 1 }

</bundles_post_ra>
